<compile_context>
chip_gen: v7x
topology: tpu7x:2x2x1
jax: 0.10.0
libtpu: 0.0.40
codegen_flags: <defaults>
</compile_context>

<pallas_src>
import functools

import jax
import jax.numpy as jnp
from jax.experimental import pallas as pl
from jax.experimental.pallas import tpu as pltpu


def _round_up(a, m):
    return (a + m - 1) // m * m


def gru_kernel(x_ref, wih_ref, whh_ref, bfold_ref, bhn_ref, out_ref, *, T, Hp):
    """Full GRU over T timesteps for one batch tile.

    x_ref:     (B_TILE*T, D)  rows laid out as b*T + t (batch-major, no transpose)
    wih_ref:   (D, 3*Hp)      gate-padded input weights  [r | z | n]
    whh_ref:   (Hp, 3*Hp)     gate-padded recurrent weights
    bfold_ref: (1, 3*Hp)      b_ih + [b_hh_r, b_hh_z, 0]  (folded into gi)
    bhn_ref:   (1, Hp)        b_hh_n (applied inside the r * (...) term)
    out_ref:   (B_TILE, Hp)   final hidden state
    """
    Bt = out_ref.shape[0]

    # ---- Hoisted input projection: all timesteps in one MXU matmul ----------
    gi2d = jnp.dot(x_ref[...], wih_ref[...], preferred_element_type=jnp.float32)
    gi2d = gi2d + bfold_ref[...]                       # (Bt*T, 3*Hp)
    gi = gi2d.reshape(Bt, T, 3 * Hp)                   # row b*T + t -> [b, t, :]

    whh = whh_ref[...]                                 # resident (Hp, 3*Hp)
    bhn = jnp.broadcast_to(bhn_ref[...], (Bt, Hp))     # hoisted broadcast

    # ---- Serial recurrence (statically unrolled; T is small) ----------------
    h = jnp.zeros((Bt, Hp), jnp.float32)
    for t in range(T):
        gi_t = gi[:, t, :]                             # (Bt, 3*Hp), static slice
        gh = jnp.dot(h, whh, preferred_element_type=jnp.float32)
        r = jax.nn.sigmoid(gi_t[:, :Hp] + gh[:, :Hp])
        z = jax.nn.sigmoid(gi_t[:, Hp:2 * Hp] + gh[:, Hp:2 * Hp])
        n = jnp.tanh(gi_t[:, 2 * Hp:] + r * (gh[:, 2 * Hp:] + bhn))
        h = n + z * (h - n)                            # == (1-z)*n + z*h

    out_ref[...] = h.astype(out_ref.dtype)


@jax.jit
def updn_question_embedding(x, w_ih, w_hh, b_ih, b_hh):
    """Forward pass of UpDnQuestionEmbedding (GRU, 1 layer, unidirectional).

    x:     (B, T, D)  float32   (batch_first, like the PyTorch module)
    w_ih:  (D, 3H)    float32   (= PyTorch weight_ih_l0.T, gate order r,z,n)
    w_hh:  (H, 3H)    float32   (= PyTorch weight_hh_l0.T)
    b_ih:  (1, 3H)    float32
    b_hh:  (1, 3H)    float32
    returns (B, H)    float32   == output[:, -1] of the PyTorch module
    """
    B, T, D = x.shape
    H = w_hh.shape[0]
    Hp = _round_up(H, 128)                     # lane-align each gate
    # Sublane-align the batch tile; grow with batch but keep the per-tile gate
    # slab (B_TILE*T, 3*Hp) comfortably inside VMEM (v7x: 64 MiB).
    B_TILE = min(_round_up(B, 8), 32)
    Bp = _round_up(B, B_TILE)

    pad_h = [(0, 0), (0, Hp - H)]

    def pad_gate_cols(w):
        # (rows, 3H) -> (rows, 3Hp): each gate individually zero-padded to Hp
        r, z, n = jnp.split(w, 3, axis=-1)
        return jnp.concatenate([jnp.pad(g, pad_h) for g in (r, z, n)], axis=-1)

    wih_p = pad_gate_cols(w_ih)                                   # (D, 3Hp)
    whh_p = pad_gate_cols(jnp.pad(w_hh, [(0, Hp - H), (0, 0)]))   # (Hp, 3Hp)

    b_ih2 = b_ih.reshape(1, 3 * H)
    b_hh2 = b_hh.reshape(1, 3 * H)
    bi_r, bi_z, bi_n = jnp.split(b_ih2, 3, axis=-1)
    bh_r, bh_z, bh_n = jnp.split(b_hh2, 3, axis=-1)
    # Fold b_ih (all gates) and the r/z parts of b_hh into the input precompute.
    b_fold = jnp.concatenate([jnp.pad(bi_r + bh_r, pad_h),
                              jnp.pad(bi_z + bh_z, pad_h),
                              jnp.pad(bi_n, pad_h)], axis=-1)     # (1, 3Hp)
    b_hn = jnp.pad(bh_n, pad_h)                                   # (1, Hp)

    # Pad batch only; no time transpose.  Flatten (Bp, T, D) -> (Bp*T, D)
    # (row index = b*T + t), which is a free row-major reshape.
    x_p = jnp.pad(x, [(0, Bp - B), (0, 0), (0, 0)]).reshape(Bp * T, D)

    grid = (Bp // B_TILE,)
    out = pl.pallas_call(
        functools.partial(gru_kernel, T=T, Hp=Hp),
        out_shape=jax.ShapeDtypeStruct((Bp, Hp), jnp.float32),
        grid_spec=pltpu.PrefetchScalarGridSpec(
            num_scalar_prefetch=0,
            grid=grid,
            in_specs=[
                pl.BlockSpec((B_TILE * T, D), lambda bc: (bc, 0)),   # x tile
                pl.BlockSpec((D, 3 * Hp), lambda bc: (0, 0)),        # W_ih (resident)
                pl.BlockSpec((Hp, 3 * Hp), lambda bc: (0, 0)),       # W_hh (resident)
                pl.BlockSpec((1, 3 * Hp), lambda bc: (0, 0)),        # folded bias
                pl.BlockSpec((1, Hp), lambda bc: (0, 0)),            # b_hh_n
            ],
            out_specs=pl.BlockSpec((B_TILE, Hp), lambda bc: (bc, 0)),
        ),
        compiler_params=pltpu.CompilerParams(
            dimension_semantics=("parallel",)),   # batch tiles are independent
    )(x_p, wih_p, whh_p, b_fold, b_hn)

    return out[:B, :H]


def gru_reference(x, w_ih, w_hh, b_ih, b_hh):
    """Pure-JAX reference of the same GRU forward (PyTorch semantics)."""
    B, T, D = x.shape
    H = w_hh.shape[0]

    def step(h, x_t):
        gi = x_t @ w_ih + b_ih
        gh = h @ w_hh + b_hh
        i_r, i_z, i_n = jnp.split(gi, 3, axis=-1)
        h_r, h_z, h_n = jnp.split(gh, 3, axis=-1)
        r = jax.nn.sigmoid(i_r + h_r)
        z = jax.nn.sigmoid(i_z + h_z)
        n = jnp.tanh(i_n + r * h_n)
        h_new = (1.0 - z) * n + z * h
        return h_new, None

    h0 = jnp.zeros((B, H), jnp.float32)
    h_final, _ = jax.lax.scan(step, h0, jnp.transpose(x, (1, 0, 2)))
    return h_final


if __name__ == "__main__":
    # Small shapes consistent with the module: batch=2, seq=8, in_dim=32, num_hid=32
    B, T, D, H = 2, 8, 32, 32

    key = jax.random.PRNGKey(0)
    kx, k1, k2, k3, k4 = jax.random.split(key, 5)

    # Deterministic parameter init, matching PyTorch's U(-1/sqrt(H), 1/sqrt(H)).
    bound = 1.0 / jnp.sqrt(jnp.float32(H))
    w_ih = jax.random.uniform(k1, (D, 3 * H), jnp.float32, -bound, bound)
    w_hh = jax.random.uniform(k2, (H, 3 * H), jnp.float32, -bound, bound)
    b_ih = jax.random.uniform(k3, (1, 3 * H), jnp.float32, -bound, bound)
    b_hh = jax.random.uniform(k4, (1, 3 * H), jnp.float32, -bound, bound)

    x = jax.random.normal(kx, (B, T, D), jnp.float32)

    out = updn_question_embedding(x, w_ih, w_hh, b_ih, b_hh)
    out = jax.block_until_ready(out)

    ref = gru_reference(x, w_ih, w_hh, b_ih, b_hh)
    assert out.shape == (B, H)
    assert jnp.allclose(out, ref, atol=1e-5, rtol=1e-5), "Pallas GRU mismatch vs reference"

    print("KERNEL_OK")
</pallas_src>

<mosaic_0001>
module attributes {stable_mosaic.version = 11 : i64} {
  func.func @gru_kernel(%arg0: i32, %arg1: memref<64x32xf32, #tpu.memory_space<vmem>>, %arg2: memref<32x384xf32, #tpu.memory_space<vmem>>, %arg3: memref<128x384xf32, #tpu.memory_space<vmem>>, %arg4: memref<1x384xf32, #tpu.memory_space<vmem>>, %arg5: memref<1x128xf32, #tpu.memory_space<vmem>>, %arg6: memref<8x128xf32, #tpu.memory_space<vmem>>) attributes {dimension_semantics = [#tpu.dimension_semantics<parallel>], iteration_bounds = array<i64: 1>, scalar_prefetch = 0 : i64, scratch_operands = 0 : i64, tpu.core_type = #tpu.core_type<tc>, window_params = [{transform_indices = @transform_0, window_bounds = array<i64: 64, 32>}, {pipeline_mode = #tpu.pipeline_mode<synchronous>, transform_indices = @transform_1, window_bounds = array<i64: 32, 384>}, {pipeline_mode = #tpu.pipeline_mode<synchronous>, transform_indices = @transform_2, window_bounds = array<i64: 128, 384>}, {pipeline_mode = #tpu.pipeline_mode<synchronous>, transform_indices = @transform_3, window_bounds = array<i64: 1, 384>}, {pipeline_mode = #tpu.pipeline_mode<synchronous>, transform_indices = @transform_4, window_bounds = array<i64: 1, 128>}, {transform_indices = @transform_5, window_bounds = array<i64: 8, 128>}]} {
    %c0 = arith.constant 0 : index
    %c0_0 = arith.constant 0 : index
    %0 = vector.load %arg1[%c0, %c0_0] : memref<64x32xf32, #tpu.memory_space<vmem>>, vector<64x32xf32>
    %c0_1 = arith.constant 0 : index
    %c0_2 = arith.constant 0 : index
    %1 = vector.load %arg2[%c0_1, %c0_2] : memref<32x384xf32, #tpu.memory_space<vmem>>, vector<32x384xf32>
    %cst = arith.constant dense<0.000000e+00> : vector<64x384xf32>
    %2 = tpu.matmul %0, %1, %cst {dimension_numbers = #tpu.dot_dimension_numbers<[1], [0], [0], [1], [0, 0, 1, 1], [], []>} : vector<64x32xf32>, vector<32x384xf32>, vector<64x384xf32> -> vector<64x384xf32>
    %c0_3 = arith.constant 0 : index
    %c0_4 = arith.constant 0 : index
    %3 = vector.load %arg4[%c0_3, %c0_4] : memref<1x384xf32, #tpu.memory_space<vmem>>, vector<1x384xf32>
    %4 = vector.broadcast %3 : vector<1x384xf32> to vector<64x384xf32>
    %5 = arith.addf %2, %4 : vector<64x384xf32>
    %6 = vector.shape_cast %5 : vector<64x384xf32> to vector<8x8x384xf32>
    %c0_5 = arith.constant 0 : index
    %c0_6 = arith.constant 0 : index
    %7 = vector.load %arg3[%c0_5, %c0_6] : memref<128x384xf32, #tpu.memory_space<vmem>>, vector<128x384xf32>
    %c0_7 = arith.constant 0 : index
    %c0_8 = arith.constant 0 : index
    %8 = vector.load %arg5[%c0_7, %c0_8] : memref<1x128xf32, #tpu.memory_space<vmem>>, vector<1x128xf32>
    %9 = vector.shape_cast %8 : vector<1x128xf32> to vector<1x128xf32>
    %10 = vector.broadcast %9 : vector<1x128xf32> to vector<8x128xf32>
    %cst_9 = arith.constant 0.000000e+00 : f32
    %11 = vector.broadcast %cst_9 : f32 to vector<8x128xf32>
    %12 = vector.extract_strided_slice %6 {offsets = [0, 0, 0], sizes = [8, 1, 384], strides = [1, 1, 1]} : vector<8x8x384xf32> to vector<8x1x384xf32>
    %13 = vector.shape_cast %12 : vector<8x1x384xf32> to vector<8x384xf32>
    %cst_10 = arith.constant dense<0.000000e+00> : vector<8x384xf32>
    %14 = tpu.matmul %11, %7, %cst_10 {dimension_numbers = #tpu.dot_dimension_numbers<[1], [0], [0], [1], [0, 0, 1, 1], [], []>} : vector<8x128xf32>, vector<128x384xf32>, vector<8x384xf32> -> vector<8x384xf32>
    %15 = vector.extract_strided_slice %13 {offsets = [0, 0], sizes = [8, 128], strides = [1, 1]} : vector<8x384xf32> to vector<8x128xf32>
    %16 = vector.extract_strided_slice %14 {offsets = [0, 0], sizes = [8, 128], strides = [1, 1]} : vector<8x384xf32> to vector<8x128xf32>
    %17 = arith.addf %15, %16 : vector<8x128xf32>
    %18 = arith.negf %17 : vector<8x128xf32>
    %19 = math.exp %18 : vector<8x128xf32>
    %cst_11 = arith.constant 1.000000e+00 : f32
    %20 = vector.broadcast %cst_11 : f32 to vector<8x128xf32>
    %21 = arith.addf %20, %19 : vector<8x128xf32>
    %22 = arith.divf %20, %21 : vector<8x128xf32>
    %23 = vector.extract_strided_slice %13 {offsets = [0, 128], sizes = [8, 128], strides = [1, 1]} : vector<8x384xf32> to vector<8x128xf32>
    %24 = vector.extract_strided_slice %14 {offsets = [0, 128], sizes = [8, 128], strides = [1, 1]} : vector<8x384xf32> to vector<8x128xf32>
    %25 = arith.addf %23, %24 : vector<8x128xf32>
    %26 = arith.negf %25 : vector<8x128xf32>
    %27 = math.exp %26 : vector<8x128xf32>
    %cst_12 = arith.constant 1.000000e+00 : f32
    %28 = vector.broadcast %cst_12 : f32 to vector<8x128xf32>
    %29 = arith.addf %28, %27 : vector<8x128xf32>
    %30 = arith.divf %28, %29 : vector<8x128xf32>
    %31 = vector.extract_strided_slice %13 {offsets = [0, 256], sizes = [8, 128], strides = [1, 1]} : vector<8x384xf32> to vector<8x128xf32>
    %32 = vector.extract_strided_slice %14 {offsets = [0, 256], sizes = [8, 128], strides = [1, 1]} : vector<8x384xf32> to vector<8x128xf32>
    %33 = arith.addf %32, %10 : vector<8x128xf32>
    %34 = arith.mulf %22, %33 : vector<8x128xf32>
    %35 = arith.addf %31, %34 : vector<8x128xf32>
    %36 = math.tanh %35 : vector<8x128xf32>
    %37 = arith.subf %11, %36 : vector<8x128xf32>
    %38 = arith.mulf %30, %37 : vector<8x128xf32>
    %39 = arith.addf %36, %38 : vector<8x128xf32>
    %40 = vector.extract_strided_slice %6 {offsets = [0, 1, 0], sizes = [8, 1, 384], strides = [1, 1, 1]} : vector<8x8x384xf32> to vector<8x1x384xf32>
    %41 = vector.shape_cast %40 : vector<8x1x384xf32> to vector<8x384xf32>
    %cst_13 = arith.constant dense<0.000000e+00> : vector<8x384xf32>
    %42 = tpu.matmul %39, %7, %cst_13 {dimension_numbers = #tpu.dot_dimension_numbers<[1], [0], [0], [1], [0, 0, 1, 1], [], []>} : vector<8x128xf32>, vector<128x384xf32>, vector<8x384xf32> -> vector<8x384xf32>
    %43 = vector.extract_strided_slice %41 {offsets = [0, 0], sizes = [8, 128], strides = [1, 1]} : vector<8x384xf32> to vector<8x128xf32>
    %44 = vector.extract_strided_slice %42 {offsets = [0, 0], sizes = [8, 128], strides = [1, 1]} : vector<8x384xf32> to vector<8x128xf32>
    %45 = arith.addf %43, %44 : vector<8x128xf32>
    %46 = arith.negf %45 : vector<8x128xf32>
    %47 = math.exp %46 : vector<8x128xf32>
    %cst_14 = arith.constant 1.000000e+00 : f32
    %48 = vector.broadcast %cst_14 : f32 to vector<8x128xf32>
    %49 = arith.addf %48, %47 : vector<8x128xf32>
    %50 = arith.divf %48, %49 : vector<8x128xf32>
    %51 = vector.extract_strided_slice %41 {offsets = [0, 128], sizes = [8, 128], strides = [1, 1]} : vector<8x384xf32> to vector<8x128xf32>
    %52 = vector.extract_strided_slice %42 {offsets = [0, 128], sizes = [8, 128], strides = [1, 1]} : vector<8x384xf32> to vector<8x128xf32>
    %53 = arith.addf %51, %52 : vector<8x128xf32>
    %54 = arith.negf %53 : vector<8x128xf32>
    %55 = math.exp %54 : vector<8x128xf32>
    %cst_15 = arith.constant 1.000000e+00 : f32
    %56 = vector.broadcast %cst_15 : f32 to vector<8x128xf32>
    %57 = arith.addf %56, %55 : vector<8x128xf32>
    %58 = arith.divf %56, %57 : vector<8x128xf32>
    %59 = vector.extract_strided_slice %41 {offsets = [0, 256], sizes = [8, 128], strides = [1, 1]} : vector<8x384xf32> to vector<8x128xf32>
    %60 = vector.extract_strided_slice %42 {offsets = [0, 256], sizes = [8, 128], strides = [1, 1]} : vector<8x384xf32> to vector<8x128xf32>
    %61 = arith.addf %60, %10 : vector<8x128xf32>
    %62 = arith.mulf %50, %61 : vector<8x128xf32>
    %63 = arith.addf %59, %62 : vector<8x128xf32>
    %64 = math.tanh %63 : vector<8x128xf32>
    %65 = arith.subf %39, %64 : vector<8x128xf32>
    %66 = arith.mulf %58, %65 : vector<8x128xf32>
    %67 = arith.addf %64, %66 : vector<8x128xf32>
    %68 = vector.extract_strided_slice %6 {offsets = [0, 2, 0], sizes = [8, 1, 384], strides = [1, 1, 1]} : vector<8x8x384xf32> to vector<8x1x384xf32>
    %69 = vector.shape_cast %68 : vector<8x1x384xf32> to vector<8x384xf32>
    %cst_16 = arith.constant dense<0.000000e+00> : vector<8x384xf32>
    %70 = tpu.matmul %67, %7, %cst_16 {dimension_numbers = #tpu.dot_dimension_numbers<[1], [0], [0], [1], [0, 0, 1, 1], [], []>} : vector<8x128xf32>, vector<128x384xf32>, vector<8x384xf32> -> vector<8x384xf32>
    %71 = vector.extract_strided_slice %69 {offsets = [0, 0], sizes = [8, 128], strides = [1, 1]} : vector<8x384xf32> to vector<8x128xf32>
    %72 = vector.extract_strided_slice %70 {offsets = [0, 0], sizes = [8, 128], strides = [1, 1]} : vector<8x384xf32> to vector<8x128xf32>
    %73 = arith.addf %71, %72 : vector<8x128xf32>
    %74 = arith.negf %73 : vector<8x128xf32>
    %75 = math.exp %74 : vector<8x128xf32>
    %cst_17 = arith.constant 1.000000e+00 : f32
    %76 = vector.broadcast %cst_17 : f32 to vector<8x128xf32>
    %77 = arith.addf %76, %75 : vector<8x128xf32>
    %78 = arith.divf %76, %77 : vector<8x128xf32>
    %79 = vector.extract_strided_slice %69 {offsets = [0, 128], sizes = [8, 128], strides = [1, 1]} : vector<8x384xf32> to vector<8x128xf32>
    %80 = vector.extract_strided_slice %70 {offsets = [0, 128], sizes = [8, 128], strides = [1, 1]} : vector<8x384xf32> to vector<8x128xf32>
    %81 = arith.addf %79, %80 : vector<8x128xf32>
    %82 = arith.negf %81 : vector<8x128xf32>
    %83 = math.exp %82 : vector<8x128xf32>
    %cst_18 = arith.constant 1.000000e+00 : f32
    %84 = vector.broadcast %cst_18 : f32 to vector<8x128xf32>
    %85 = arith.addf %84, %83 : vector<8x128xf32>
    %86 = arith.divf %84, %85 : vector<8x128xf32>
    %87 = vector.extract_strided_slice %69 {offsets = [0, 256], sizes = [8, 128], strides = [1, 1]} : vector<8x384xf32> to vector<8x128xf32>
    %88 = vector.extract_strided_slice %70 {offsets = [0, 256], sizes = [8, 128], strides = [1, 1]} : vector<8x384xf32> to vector<8x128xf32>
    %89 = arith.addf %88, %10 : vector<8x128xf32>
    %90 = arith.mulf %78, %89 : vector<8x128xf32>
    %91 = arith.addf %87, %90 : vector<8x128xf32>
    %92 = math.tanh %91 : vector<8x128xf32>
    %93 = arith.subf %67, %92 : vector<8x128xf32>
    %94 = arith.mulf %86, %93 : vector<8x128xf32>
    %95 = arith.addf %92, %94 : vector<8x128xf32>
    %96 = vector.extract_strided_slice %6 {offsets = [0, 3, 0], sizes = [8, 1, 384], strides = [1, 1, 1]} : vector<8x8x384xf32> to vector<8x1x384xf32>
    %97 = vector.shape_cast %96 : vector<8x1x384xf32> to vector<8x384xf32>
    %cst_19 = arith.constant dense<0.000000e+00> : vector<8x384xf32>
    %98 = tpu.matmul %95, %7, %cst_19 {dimension_numbers = #tpu.dot_dimension_numbers<[1], [0], [0], [1], [0, 0, 1, 1], [], []>} : vector<8x128xf32>, vector<128x384xf32>, vector<8x384xf32> -> vector<8x384xf32>
    %99 = vector.extract_strided_slice %97 {offsets = [0, 0], sizes = [8, 128], strides = [1, 1]} : vector<8x384xf32> to vector<8x128xf32>
    %100 = vector.extract_strided_slice %98 {offsets = [0, 0], sizes = [8, 128], strides = [1, 1]} : vector<8x384xf32> to vector<8x128xf32>
    %101 = arith.addf %99, %100 : vector<8x128xf32>
    %102 = arith.negf %101 : vector<8x128xf32>
    %103 = math.exp %102 : vector<8x128xf32>
    %cst_20 = arith.constant 1.000000e+00 : f32
    %104 = vector.broadcast %cst_20 : f32 to vector<8x128xf32>
    %105 = arith.addf %104, %103 : vector<8x128xf32>
    %106 = arith.divf %104, %105 : vector<8x128xf32>
    %107 = vector.extract_strided_slice %97 {offsets = [0, 128], sizes = [8, 128], strides = [1, 1]} : vector<8x384xf32> to vector<8x128xf32>
    %108 = vector.extract_strided_slice %98 {offsets = [0, 128], sizes = [8, 128], strides = [1, 1]} : vector<8x384xf32> to vector<8x128xf32>
    %109 = arith.addf %107, %108 : vector<8x128xf32>
    %110 = arith.negf %109 : vector<8x128xf32>
    %111 = math.exp %110 : vector<8x128xf32>
    %cst_21 = arith.constant 1.000000e+00 : f32
    %112 = vector.broadcast %cst_21 : f32 to vector<8x128xf32>
    %113 = arith.addf %112, %111 : vector<8x128xf32>
    %114 = arith.divf %112, %113 : vector<8x128xf32>
    %115 = vector.extract_strided_slice %97 {offsets = [0, 256], sizes = [8, 128], strides = [1, 1]} : vector<8x384xf32> to vector<8x128xf32>
    %116 = vector.extract_strided_slice %98 {offsets = [0, 256], sizes = [8, 128], strides = [1, 1]} : vector<8x384xf32> to vector<8x128xf32>
    %117 = arith.addf %116, %10 : vector<8x128xf32>
    %118 = arith.mulf %106, %117 : vector<8x128xf32>
    %119 = arith.addf %115, %118 : vector<8x128xf32>
    %120 = math.tanh %119 : vector<8x128xf32>
    %121 = arith.subf %95, %120 : vector<8x128xf32>
    %122 = arith.mulf %114, %121 : vector<8x128xf32>
    %123 = arith.addf %120, %122 : vector<8x128xf32>
    %124 = vector.extract_strided_slice %6 {offsets = [0, 4, 0], sizes = [8, 1, 384], strides = [1, 1, 1]} : vector<8x8x384xf32> to vector<8x1x384xf32>
    %125 = vector.shape_cast %124 : vector<8x1x384xf32> to vector<8x384xf32>
    %cst_22 = arith.constant dense<0.000000e+00> : vector<8x384xf32>
    %126 = tpu.matmul %123, %7, %cst_22 {dimension_numbers = #tpu.dot_dimension_numbers<[1], [0], [0], [1], [0, 0, 1, 1], [], []>} : vector<8x128xf32>, vector<128x384xf32>, vector<8x384xf32> -> vector<8x384xf32>
    %127 = vector.extract_strided_slice %125 {offsets = [0, 0], sizes = [8, 128], strides = [1, 1]} : vector<8x384xf32> to vector<8x128xf32>
    %128 = vector.extract_strided_slice %126 {offsets = [0, 0], sizes = [8, 128], strides = [1, 1]} : vector<8x384xf32> to vector<8x128xf32>
    %129 = arith.addf %127, %128 : vector<8x128xf32>
    %130 = arith.negf %129 : vector<8x128xf32>
    %131 = math.exp %130 : vector<8x128xf32>
    %cst_23 = arith.constant 1.000000e+00 : f32
    %132 = vector.broadcast %cst_23 : f32 to vector<8x128xf32>
    %133 = arith.addf %132, %131 : vector<8x128xf32>
    %134 = arith.divf %132, %133 : vector<8x128xf32>
    %135 = vector.extract_strided_slice %125 {offsets = [0, 128], sizes = [8, 128], strides = [1, 1]} : vector<8x384xf32> to vector<8x128xf32>
    %136 = vector.extract_strided_slice %126 {offsets = [0, 128], sizes = [8, 128], strides = [1, 1]} : vector<8x384xf32> to vector<8x128xf32>
    %137 = arith.addf %135, %136 : vector<8x128xf32>
    %138 = arith.negf %137 : vector<8x128xf32>
    %139 = math.exp %138 : vector<8x128xf32>
    %cst_24 = arith.constant 1.000000e+00 : f32
    %140 = vector.broadcast %cst_24 : f32 to vector<8x128xf32>
    %141 = arith.addf %140, %139 : vector<8x128xf32>
    %142 = arith.divf %140, %141 : vector<8x128xf32>
    %143 = vector.extract_strided_slice %125 {offsets = [0, 256], sizes = [8, 128], strides = [1, 1]} : vector<8x384xf32> to vector<8x128xf32>
    %144 = vector.extract_strided_slice %126 {offsets = [0, 256], sizes = [8, 128], strides = [1, 1]} : vector<8x384xf32> to vector<8x128xf32>
    %145 = arith.addf %144, %10 : vector<8x128xf32>
    %146 = arith.mulf %134, %145 : vector<8x128xf32>
    %147 = arith.addf %143, %146 : vector<8x128xf32>
    %148 = math.tanh %147 : vector<8x128xf32>
    %149 = arith.subf %123, %148 : vector<8x128xf32>
    %150 = arith.mulf %142, %149 : vector<8x128xf32>
    %151 = arith.addf %148, %150 : vector<8x128xf32>
    %152 = vector.extract_strided_slice %6 {offsets = [0, 5, 0], sizes = [8, 1, 384], strides = [1, 1, 1]} : vector<8x8x384xf32> to vector<8x1x384xf32>
    %153 = vector.shape_cast %152 : vector<8x1x384xf32> to vector<8x384xf32>
    %cst_25 = arith.constant dense<0.000000e+00> : vector<8x384xf32>
    %154 = tpu.matmul %151, %7, %cst_25 {dimension_numbers = #tpu.dot_dimension_numbers<[1], [0], [0], [1], [0, 0, 1, 1], [], []>} : vector<8x128xf32>, vector<128x384xf32>, vector<8x384xf32> -> vector<8x384xf32>
    %155 = vector.extract_strided_slice %153 {offsets = [0, 0], sizes = [8, 128], strides = [1, 1]} : vector<8x384xf32> to vector<8x128xf32>
    %156 = vector.extract_strided_slice %154 {offsets = [0, 0], sizes = [8, 128], strides = [1, 1]} : vector<8x384xf32> to vector<8x128xf32>
    %157 = arith.addf %155, %156 : vector<8x128xf32>
    %158 = arith.negf %157 : vector<8x128xf32>
    %159 = math.exp %158 : vector<8x128xf32>
    %cst_26 = arith.constant 1.000000e+00 : f32
    %160 = vector.broadcast %cst_26 : f32 to vector<8x128xf32>
    %161 = arith.addf %160, %159 : vector<8x128xf32>
    %162 = arith.divf %160, %161 : vector<8x128xf32>
    %163 = vector.extract_strided_slice %153 {offsets = [0, 128], sizes = [8, 128], strides = [1, 1]} : vector<8x384xf32> to vector<8x128xf32>
    %164 = vector.extract_strided_slice %154 {offsets = [0, 128], sizes = [8, 128], strides = [1, 1]} : vector<8x384xf32> to vector<8x128xf32>
    %165 = arith.addf %163, %164 : vector<8x128xf32>
    %166 = arith.negf %165 : vector<8x128xf32>
    %167 = math.exp %166 : vector<8x128xf32>
    %cst_27 = arith.constant 1.000000e+00 : f32
    %168 = vector.broadcast %cst_27 : f32 to vector<8x128xf32>
    %169 = arith.addf %168, %167 : vector<8x128xf32>
    %170 = arith.divf %168, %169 : vector<8x128xf32>
    %171 = vector.extract_strided_slice %153 {offsets = [0, 256], sizes = [8, 128], strides = [1, 1]} : vector<8x384xf32> to vector<8x128xf32>
    %172 = vector.extract_strided_slice %154 {offsets = [0, 256], sizes = [8, 128], strides = [1, 1]} : vector<8x384xf32> to vector<8x128xf32>
    %173 = arith.addf %172, %10 : vector<8x128xf32>
    %174 = arith.mulf %162, %173 : vector<8x128xf32>
    %175 = arith.addf %171, %174 : vector<8x128xf32>
    %176 = math.tanh %175 : vector<8x128xf32>
    %177 = arith.subf %151, %176 : vector<8x128xf32>
    %178 = arith.mulf %170, %177 : vector<8x128xf32>
    %179 = arith.addf %176, %178 : vector<8x128xf32>
    %180 = vector.extract_strided_slice %6 {offsets = [0, 6, 0], sizes = [8, 1, 384], strides = [1, 1, 1]} : vector<8x8x384xf32> to vector<8x1x384xf32>
    %181 = vector.shape_cast %180 : vector<8x1x384xf32> to vector<8x384xf32>
    %cst_28 = arith.constant dense<0.000000e+00> : vector<8x384xf32>
    %182 = tpu.matmul %179, %7, %cst_28 {dimension_numbers = #tpu.dot_dimension_numbers<[1], [0], [0], [1], [0, 0, 1, 1], [], []>} : vector<8x128xf32>, vector<128x384xf32>, vector<8x384xf32> -> vector<8x384xf32>
    %183 = vector.extract_strided_slice %181 {offsets = [0, 0], sizes = [8, 128], strides = [1, 1]} : vector<8x384xf32> to vector<8x128xf32>
    %184 = vector.extract_strided_slice %182 {offsets = [0, 0], sizes = [8, 128], strides = [1, 1]} : vector<8x384xf32> to vector<8x128xf32>
    %185 = arith.addf %183, %184 : vector<8x128xf32>
    %186 = arith.negf %185 : vector<8x128xf32>
    %187 = math.exp %186 : vector<8x128xf32>
    %cst_29 = arith.constant 1.000000e+00 : f32
    %188 = vector.broadcast %cst_29 : f32 to vector<8x128xf32>
    %189 = arith.addf %188, %187 : vector<8x128xf32>
    %190 = arith.divf %188, %189 : vector<8x128xf32>
    %191 = vector.extract_strided_slice %181 {offsets = [0, 128], sizes = [8, 128], strides = [1, 1]} : vector<8x384xf32> to vector<8x128xf32>
    %192 = vector.extract_strided_slice %182 {offsets = [0, 128], sizes = [8, 128], strides = [1, 1]} : vector<8x384xf32> to vector<8x128xf32>
    %193 = arith.addf %191, %192 : vector<8x128xf32>
    %194 = arith.negf %193 : vector<8x128xf32>
    %195 = math.exp %194 : vector<8x128xf32>
    %cst_30 = arith.constant 1.000000e+00 : f32
    %196 = vector.broadcast %cst_30 : f32 to vector<8x128xf32>
    %197 = arith.addf %196, %195 : vector<8x128xf32>
    %198 = arith.divf %196, %197 : vector<8x128xf32>
    %199 = vector.extract_strided_slice %181 {offsets = [0, 256], sizes = [8, 128], strides = [1, 1]} : vector<8x384xf32> to vector<8x128xf32>
    %200 = vector.extract_strided_slice %182 {offsets = [0, 256], sizes = [8, 128], strides = [1, 1]} : vector<8x384xf32> to vector<8x128xf32>
    %201 = arith.addf %200, %10 : vector<8x128xf32>
    %202 = arith.mulf %190, %201 : vector<8x128xf32>
    %203 = arith.addf %199, %202 : vector<8x128xf32>
    %204 = math.tanh %203 : vector<8x128xf32>
    %205 = arith.subf %179, %204 : vector<8x128xf32>
    %206 = arith.mulf %198, %205 : vector<8x128xf32>
    %207 = arith.addf %204, %206 : vector<8x128xf32>
    %208 = vector.extract_strided_slice %6 {offsets = [0, 7, 0], sizes = [8, 1, 384], strides = [1, 1, 1]} : vector<8x8x384xf32> to vector<8x1x384xf32>
    %209 = vector.shape_cast %208 : vector<8x1x384xf32> to vector<8x384xf32>
    %cst_31 = arith.constant dense<0.000000e+00> : vector<8x384xf32>
    %210 = tpu.matmul %207, %7, %cst_31 {dimension_numbers = #tpu.dot_dimension_numbers<[1], [0], [0], [1], [0, 0, 1, 1], [], []>} : vector<8x128xf32>, vector<128x384xf32>, vector<8x384xf32> -> vector<8x384xf32>
    %211 = vector.extract_strided_slice %209 {offsets = [0, 0], sizes = [8, 128], strides = [1, 1]} : vector<8x384xf32> to vector<8x128xf32>
    %212 = vector.extract_strided_slice %210 {offsets = [0, 0], sizes = [8, 128], strides = [1, 1]} : vector<8x384xf32> to vector<8x128xf32>
    %213 = arith.addf %211, %212 : vector<8x128xf32>
    %214 = arith.negf %213 : vector<8x128xf32>
    %215 = math.exp %214 : vector<8x128xf32>
    %cst_32 = arith.constant 1.000000e+00 : f32
    %216 = vector.broadcast %cst_32 : f32 to vector<8x128xf32>
    %217 = arith.addf %216, %215 : vector<8x128xf32>
    %218 = arith.divf %216, %217 : vector<8x128xf32>
    %219 = vector.extract_strided_slice %209 {offsets = [0, 128], sizes = [8, 128], strides = [1, 1]} : vector<8x384xf32> to vector<8x128xf32>
    %220 = vector.extract_strided_slice %210 {offsets = [0, 128], sizes = [8, 128], strides = [1, 1]} : vector<8x384xf32> to vector<8x128xf32>
    %221 = arith.addf %219, %220 : vector<8x128xf32>
    %222 = arith.negf %221 : vector<8x128xf32>
    %223 = math.exp %222 : vector<8x128xf32>
    %cst_33 = arith.constant 1.000000e+00 : f32
    %224 = vector.broadcast %cst_33 : f32 to vector<8x128xf32>
    %225 = arith.addf %224, %223 : vector<8x128xf32>
    %226 = arith.divf %224, %225 : vector<8x128xf32>
    %227 = vector.extract_strided_slice %209 {offsets = [0, 256], sizes = [8, 128], strides = [1, 1]} : vector<8x384xf32> to vector<8x128xf32>
    %228 = vector.extract_strided_slice %210 {offsets = [0, 256], sizes = [8, 128], strides = [1, 1]} : vector<8x384xf32> to vector<8x128xf32>
    %229 = arith.addf %228, %10 : vector<8x128xf32>
    %230 = arith.mulf %218, %229 : vector<8x128xf32>
    %231 = arith.addf %227, %230 : vector<8x128xf32>
    %232 = math.tanh %231 : vector<8x128xf32>
    %233 = arith.subf %207, %232 : vector<8x128xf32>
    %234 = arith.mulf %226, %233 : vector<8x128xf32>
    %235 = arith.addf %232, %234 : vector<8x128xf32>
    %c0_34 = arith.constant 0 : index
    %c0_35 = arith.constant 0 : index
    %236 = vector.load %arg6[%c0_34, %c0_35] : memref<8x128xf32, #tpu.memory_space<vmem>>, vector<8x128xf32>
    tpu.vector_store %arg6[%c0_34, %c0_35], %235 {strides = array<i32>} : memref<8x128xf32, #tpu.memory_space<vmem>>, vector<8x128xf32>,
    return
  }
  func.func @transform_0(%arg0: i32) -> (i32, i32) {
    %c0_i32 = arith.constant 0 : i32
    %c0_i32_0 = arith.constant 0 : i32
    return %arg0, %c0_i32 : i32, i32
  }
  func.func @transform_1(%arg0: i32) -> (i32, i32) {
    %c0_i32 = arith.constant 0 : i32
    %c0_i32_0 = arith.constant 0 : i32
    %c0_i32_1 = arith.constant 0 : i32
    return %c0_i32, %c0_i32_0 : i32, i32
  }
  func.func @transform_2(%arg0: i32) -> (i32, i32) {
    %c0_i32 = arith.constant 0 : i32
    %c0_i32_0 = arith.constant 0 : i32
    %c0_i32_1 = arith.constant 0 : i32
    return %c0_i32, %c0_i32_0 : i32, i32
  }
  func.func @transform_3(%arg0: i32) -> (i32, i32) {
    %c0_i32 = arith.constant 0 : i32
    %c0_i32_0 = arith.constant 0 : i32
    %c0_i32_1 = arith.constant 0 : i32
    return %c0_i32, %c0_i32_0 : i32, i32
  }
  func.func @transform_4(%arg0: i32) -> (i32, i32) {
    %c0_i32 = arith.constant 0 : i32
    %c0_i32_0 = arith.constant 0 : i32
    %c0_i32_1 = arith.constant 0 : i32
    return %c0_i32, %c0_i32_0 : i32, i32
  }
  func.func @transform_5(%arg0: i32) -> (i32, i32) {
    %c0_i32 = arith.constant 0 : i32
    %c0_i32_0 = arith.constant 0 : i32
    return %arg0, %c0_i32 : i32, i32
  }
}

</mosaic_0001>

<bundles_post_ra>
// kernel: updn_question_embedding.1
= control target key start
LH: loop header
LB: loop body
LE: loop exit
PB: predicated region body
PF: predicated region fallthrough
CT: control target
= control target key end

     0   :  { %v6708_v3 = vmov 0.0   ;;  %vm57_vm0 = vcmask 261120   ;;  %v6710_v57 = vmov 0.0|0.0   ;;  %vm5393_vm1 = vmmov 0   ;;  %s6702_s1 = inlined_call_operand.vmem [shape: f32[32,384], index: 1, kind: input, shape index: {}]   ;;  %s6703_s0 = inlined_call_operand.vmem [shape: f32[64,32], index: 0, kind: input, shape index: {}]   ;;  %s6704_s2 = inlined_call_operand.vmem [shape: f32[128,384], index: 2, kind: input, shape index: {}]   ;;  %s6705_s3 = inlined_call_operand.vmem [shape: f32[1,384], index: 3, kind: input, shape index: {}]   ;;  %s6706_s4 = inlined_call_operand.vmem [shape: f32[1,128], index: 4, kind: input, shape index: {}]   ;;  %s6707_s5 = inlined_call_operand.vmem [shape: f32[8,128], index: 5, kind: output, shape index: {}]  }
   0x1   :  { %v29_v0 = vld [vmem:[%s6702_s1 + $0x8] sm:$0xff]  ;;  %v32_v1 = vld [vmem:[%s6702_s1 + $0x20] sm:$0xff]  ;;  %146 = vmatprep.mubr.f32.mxu0 %v6708_v3  ;;  %v31_v5 = vld [vmem:[%s6702_s1 + $0x18] sm:$0xff]  ;;  %vm714_vm2 = vcmask 1041409   ;;  %vm717_vm3 = vcmask 1042434   ;;  %vm720_vm4 = vcmask 1043459  }
   0x2   :  { %v28_v2 = vld [vmem:[%s6702_s1] sm:$0xff]  ;;  %v4281_v4 = vpack.c.bf16 %v32_v1, %v29_v0  ;;  %v35_v6 = vld [vmem:[%s6702_s1 + $0x38] sm:$0xff]  ;;  %v38_v7 = vld [vmem:[%s6702_s1 + $0x50] sm:$0xff]  ;;  %vm723_vm5 = vcmask 1044484   ;;  %vm726_vm6 = vcmask 1045509   ;;  %vm729_vm7 = vcmask 1046534  }
   0x3   :  { %v4283_v8 = vpack.c.bf16 %v31_v5, %v28_v2  ;;  %v4285_v9 = vpack.c.bf16 %v38_v7, %v35_v6  ;;  %v34_v10 = vld [vmem:[%s6702_s1 + $0x30] sm:$0xff]  ;;  %v37_v11 = vld [vmem:[%s6702_s1 + $0x48] sm:$0xff]  ;;  %v20_v12 = vld [vmem:[%s6703_s0] sm:$0xff]  ;;  %vm732_vm8 = vcmask 1047559  }
   0x4   :  { %4282 = vmatprep.subr.bf16.mxu0 %v4281_v4  ;;  %v301_v13 = vld [vmem:[%s6704_s2 + $0x8] sm:$0xff]  ;;  %v304_v14 = vld [vmem:[%s6704_s2 + $0x20] sm:$0xff]  ;;  %3989 = vmatprep.mubr.msk.f32.mxu1 %vm57_vm0, %v20_v12  ;;  %v4287_v15 = vpack.c.bf16 %v37_v11, %v34_v10  ;;  %v303_v18 = vld [vmem:[%s6704_s2 + $0x18] sm:$0xff] }
   0x5   :  { %4284 = vmatpush1.bf16.msra.mxu0 %v4283_v8  ;;  %v5459_v16 = vpack.c.bf16 %v304_v14, %v301_v13  ;;  %v300_v17 = vld [vmem:[%s6704_s2] sm:$0xff]  ;;  %v307_v19 = vld [vmem:[%s6704_s2 + $0x38] sm:$0xff]  ;;  %v310_v20 = vld [vmem:[%s6704_s2 + $0x50] sm:$0xff] }
   0x6   :  { %4286 = vmatprep.subr.bf16.mxu0 %v4285_v9  ;;  %v5473_v21 = vpack.c.bf16 %v303_v18, %v300_v17  ;;  %v5476_v22 = vpack.c.bf16 %v310_v20, %v307_v19  ;;  %v306_v23 = vld [vmem:[%s6704_s2 + $0x30] sm:$0xff]  ;;  %v309_v24 = vld [vmem:[%s6704_s2 + $0x48] sm:$0xff]  ;;  %v316_v26 = vld [vmem:[%s6704_s2 + $0x80] sm:$0xff] }
   0x7   :  { %6784 = vst [vmem:[#allocation2_spill] sm:$0xff] %v5459_v16  ;;  %v313_v25 = vld [vmem:[%s6704_s2 + $0x68] sm:$0xff]  ;;  %v30_v27 = vld [vmem:[%s6702_s1 + $0x10] sm:$0xff]  ;;  %v5502_v30 = vpack.c.bf16 %v309_v24, %v306_v23  ;;  %v312_v31 = vld [vmem:[%s6704_s2 + $0x60] sm:$0xff] }
   0x8   :  { %v33_v28 = vld [vmem:[%s6702_s1 + $0x28] sm:$0xff]  ;;  %v5508_v33 = vpack.c.bf16 %v316_v26, %v313_v25  ;;  %v315_v34 = vld [vmem:[%s6704_s2 + $0x78] sm:$0xff]  ;;  %v36_v35 = vld [vmem:[%s6702_s1 + $0x40] sm:$0xff] }
   0x9   :  { %4288 = vmatpush1.bf16.msra.mxu0 %v4287_v15  ;;  %v21_v29 = vld [vmem:[%s6703_s0 + $0x8] sm:$0xff]  ;;  %v4289_v32 = vpack.c.bf16 %v33_v28, %v30_v27  ;;  %v39_v36 = vld [vmem:[%s6702_s1 + $0x58] sm:$0xff]  ;;  %v322_v38 = vld [vmem:[%s6704_s2 + $0xb0] sm:$0xff]  ;;  %v5531_v41 = vpack.c.bf16 %v315_v34, %v312_v31 }
   0xa   :  { %4298 = vmatprep.subr.bf16.mxu0 %v5459_v16  ;;  %v319_v37 = vld [vmem:[%s6704_s2 + $0x98] sm:$0xff]  ;;  %v4293_v39 = vpack.c.bf16 %v39_v36, %v36_v35  ;;  %v22_v40 = vld [vmem:[%s6703_s0 + $0x10] sm:$0xff]  ;;  %v305_v43 = vld [vmem:[%s6704_s2 + $0x28] sm:$0xff] }
   0xb   :  { %4290 = vmatprep.subr.bf16.mxu1 %v4289_v32  ;;  %v302_v42 = vld [vmem:[%s6704_s2 + $0x10] sm:$0xff]  ;;  %v5540_v44 = vpack.c.bf16 %v322_v38, %v319_v37  ;;  %v321_v46 = vld [vmem:[%s6704_s2 + $0xa8] sm:$0xff]  ;;  %v328_v48 = vld [vmem:[%s6704_s2 + $0xe0] sm:$0xff] }
   0xc   :  { %3688 = vmatmul.mubr.msk.f32.vlgmr.msra.gmra.mrb[0].mxu0 %vm57_vm0, %v20_v12  ;;  %4292 = vmatpush3.bf16.msra.mxu1 %v4289_v32  ;;  %v318_v45 = vld [vmem:[%s6704_s2 + $0x90] sm:$0xff]  ;;  %v325_v47 = vld [vmem:[%s6704_s2 + $0xc8] sm:$0xff]  ;;  %v5555_v49 = vpack.c.bf16 %v305_v43, %v302_v42  ;;  %v23_v50 = vld [vmem:[%s6703_s0 + $0x18] sm:$0xff] }
   0xd   :  { %4300 = vmatpush1.bf16.msra.mxu0 %v5473_v21  ;;  %152 = vmatprep.mubr.f32.mxu0 %v6708_v3  ;;  %v5562_v51 = vpack.c.bf16 %v321_v46, %v318_v45  ;;  %v308_v52 = vld [vmem:[%s6704_s2 + $0x40] sm:$0xff]  ;;  %v311_v53 = vld [vmem:[%s6704_s2 + $0x58] sm:$0xff]  ;;  %v5571_v54 = vpack.c.bf16 %v328_v48, %v325_v47  ;;  %v334_v59 = vld [vmem:[%s6704_s2 + $0x110] sm:$0xff] }
   0xe   :  { %4302 = vmatprep.subr.bf16.mxu0 %v5476_v22  ;;  %4294 = vmatprep.subr.bf16.mxu1 %v4293_v39  ;;  %v324_v55 = vld [vmem:[%s6704_s2 + $0xc0] sm:$0xff]  ;;  %v327_v56 = vld [vmem:[%s6704_s2 + $0xd8] sm:$0xff]  ;;  %v5589_v60 = vpack.c.bf16 %v311_v53, %v308_v52  ;;  %v314_v63 = vld [vmem:[%s6704_s2 + $0x70] sm:$0xff] }
   0xf   :  { %6785 = vst [vmem:[#allocation3_spill] sm:$0xff] %v5571_v54  ;;  %v331_v58 = vld [vmem:[%s6704_s2 + $0xf8] sm:$0xff]  ;;  %v24_v61 = vld [vmem:[%s6703_s0 + $0x20] sm:$0xff]  ;;  %v5596_v62 = vpack.c.bf16 %v327_v56, %v324_v55  ;;  %v317_v0 = vld [vmem:[%s6704_s2 + $0x88] sm:$0xff] }
  0x10   :  { %3689 = vmatmul.mubr.msk.f32.gmra.mrb[2].mxu0 %vm57_vm0, %v21_v29  ;;  %4296 = vmatpush3.bf16.msra.mxu1 %v4293_v39  ;;  %v5605_v1 = vpack.c.bf16 %v334_v59, %v331_v58  ;;  %v330_v2 = vld [vmem:[%s6704_s2 + $0xf0] sm:$0xff]  ;;  %v333_v4 = vld [vmem:[%s6704_s2 + $0x108] sm:$0xff]  ;;  %v340_v6 = vld [vmem:[%s6704_s2 + $0x140] sm:$0xff]  ;;  %v5623_v7 = vpack.c.bf16 %v317_v0, %v314_v63  ;;  %v42_v58 = vlaneseq }
  0x11   :  { %4304 = vmatpush1.bf16.msra.mxu0 %v5502_v30  ;;  %158 = vmatprep.mubr.f32.mxu0 %v6708_v3  ;;  %6786 = vst [vmem:[#allocation4_spill] sm:$0xff] %v5596_v62  ;;  %v337_v5 = vld [vmem:[%s6704_s2 + $0x128] sm:$0xff]  ;;  %v5630_v9 = vpack.c.bf16 %v333_v4, %v330_v2  ;;  %v320_v10 = vld [vmem:[%s6704_s2 + $0xa0] sm:$0xff]  ;;  %v323_v11 = vld [vmem:[%s6704_s2 + $0xb8] sm:$0xff] }
  0x12   :  { %4306 = vmatprep.subr.bf16.mxu0 %v5508_v33  ;;  %4329 = vmatprep.subr.bf16.mxu1 %v6710_v57  ;;  %6787 = vst [vmem:[#allocation5_spill] sm:$0xff] %v5605_v1  ;;  %v25_v8 = vld [vmem:[%s6703_s0 + $0x28] sm:$0xff]  ;;  %v5639_v12 = vpack.c.bf16 %v340_v6, %v337_v5  ;;  %v336_v13 = vld [vmem:[%s6704_s2 + $0x120] sm:$0xff]  ;;  %v339_v14 = vld [vmem:[%s6704_s2 + $0x138] sm:$0xff]  ;;  %v5657_v18 = vpack.c.bf16 %v323_v11, %v320_v10  ;;  %v5778_v63 = vshrl.u32 %v42_v58, 7 }
  0x13   :  { %3990 = vmatmul.mubr.msk.f32.vlgmr.msra.gmra.mrb[0].mxu1 %vm57_vm0, %v21_v29  ;;  %6788 = vst [vmem:[#allocation6_spill] sm:$0xff] %v5630_v9  ;;  %v343_v15 = vld [vmem:[%s6704_s2 + $0x158] sm:$0xff]  ;;  %v346_v17 = vld [vmem:[%s6704_s2 + $0x170] sm:$0xff]  ;;  %v5664_v20 = vpack.c.bf16 %v339_v14, %v336_v13  ;;  %v329_v24 = vld [vmem:[%s6704_s2 + $0xe8] sm:$0xff] }
  0x14   :  { %3690 = vmatmul.mubr.msk.f32.gmra.mrb[4].mxu0 %vm57_vm0, %v22_v40  ;;  %4331 = vmatpush3.bf16.msra.mxu1 %v5555_v49  ;;  %6789 = vst [vmem:[#allocation7_spill] sm:$0xff] %v5639_v12  ;;  %v26_v19 = vld [vmem:[%s6703_s0 + $0x30] sm:$0xff]  ;;  %v5673_v25 = vpack.c.bf16 %v346_v17, %v343_v15  ;;  %v345_v27 = vld [vmem:[%s6704_s2 + $0x168] sm:$0xff]  ;;  %v27_v29 = vld [vmem:[%s6703_s0 + $0x38] sm:$0xff]  ;;  %v44_v6 = vsub.s32 0, %v5778_v63 }
  0x15   :  { %4308 = vmatpush1.bf16.msra.mxu0 %v5531_v41  ;;  %164 = vmatprep.mubr.f32.mxu0 %v6708_v3  ;;  %6790 = vst [vmem:[#allocation8_spill] sm:$0xff] %v5664_v20  ;;  %v326_v23 = vld [vmem:[%s6704_s2 + $0xd0] sm:$0xff]  ;;  %v332_v32 = vld [vmem:[%s6704_s2 + $0x100] sm:$0xff]  ;;  %v335_v34 = vld [vmem:[%s6704_s2 + $0x118] sm:$0xff] }
  0x16   :  { %4310 = vmatprep.subr.bf16.mxu0 %v5540_v44  ;;  %4332 = vmatprep.subr.bf16.mxu1 %v6710_v57  ;;  %6791 = vst [vmem:[#allocation9_spill] sm:$0xff] %v5673_v25  ;;  %v342_v26 = vld [vmem:[%s6704_s2 + $0x150] sm:$0xff]  ;;  %v5685_v28 = vpack.c.bf16 %v329_v24, %v326_v23  ;;  %v5705_v35 = vpack.c.bf16 %v335_v34, %v332_v32  ;;  %v341_v37 = vld [vmem:[%s6704_s2 + $0x148] sm:$0xff]  ;;  %v344_v39 = vld [vmem:[%s6704_s2 + $0x160] sm:$0xff] }
  0x17   :  { %3992 = vmatprep.mubr.msk.f32.mxu1 %vm57_vm0, %v22_v40  ;;  %v5692_v31 = vpack.c.bf16 %v345_v27, %v342_v26  ;;  %v338_v36 = vld [vmem:[%s6704_s2 + $0x130] sm:$0xff]  ;;  %v347_v40 = vld [vmem:[%s6704_s2 + $0x178] sm:$0xff]  ;;  %v5791_v10 = vld [vmem:[%s6705_s3] sm:$0x7] }
  0x18   :  { %3691 = vmatmul.mubr.msk.f32.gmra.mrb[6].mxu0 %vm57_vm0, %v23_v50  ;;  %4334 = vmatpush3.bf16.msra.mxu1 %v5589_v60  ;;  %6792 = vst [vmem:[#allocation10_spill] sm:$0xff] %v5685_v28  ;;  %6794 = vst [vmem:[#allocation12_spill] sm:$0xff] %v5705_v35  ;;  %v5721_v38 = vpack.c.bf16 %v341_v37, %v338_v36  ;;  %v5736_v42 = vpack.c.bf16 %v347_v40, %v344_v39 }
  0x19   :  { %4312 = vmatpush1.bf16.msra.mxu0 %v5562_v51  ;;  %170 = vmatprep.mubr.f32.mxu0 %v6708_v3  ;;  %6793 = vst [vmem:[#allocation11_spill] sm:$0xff] %v5692_v31  ;;  %v45_v14 = vrot.slane %v5791_v10, %v44_v6 }
  0x1a   :  { %4314 = vmatprep.subr.bf16.mxu0 %v5571_v54  ;;  %4335 = vmatprep.subr.bf16.mxu1 %v6710_v57  ;;  %6795 = vst [vmem:[#allocation13_spill] sm:$0xff] %v5721_v38  ;;  %6796 = vst [vmem:[#allocation14_spill] sm:$0xff] %v5736_v42 }
  0x1b   :  { %3993 = vmatmul.mubr.msk.f32.gmra.mrb[2].mxu1 %vm57_vm0, %v23_v50 }
  0x1c   :  { %3692 = vmatmul.mubr.msk.f32.gmra.mrb[8].mxu0 %vm57_vm0, %v24_v61  ;;  %4337 = vmatpush3.bf16.msra.mxu1 %v5623_v7 }
  0x1d   :  { %4316 = vmatpush1.bf16.msra.mxu0 %v5596_v62  ;;  %176 = vmatprep.mubr.f32.mxu0 %v6708_v3 }
  0x1e   :  { %4318 = vmatprep.subr.bf16.mxu0 %v5605_v1  ;;  %4338 = vmatprep.subr.bf16.mxu1 %v6710_v57 }
  0x1f   :  { %3995 = vmatprep.mubr.msk.f32.mxu1 %vm57_vm0, %v24_v61 }
  0x20   :  { %3693 = vmatmul.mubr.msk.f32.gmra.mrb[10].mxu0 %vm57_vm0, %v25_v8  ;;  %4340 = vmatpush3.bf16.msra.mxu1 %v5657_v18 }
  0x21   :  { %4320 = vmatpush1.bf16.msra.mxu0 %v5630_v9  ;;  %182 = vmatprep.mubr.f32.mxu0 %v6708_v3 }
  0x22   :  { %4322 = vmatprep.subr.bf16.mxu0 %v5639_v12  ;;  %4341 = vmatprep.subr.bf16.mxu1 %v6710_v57 }
  0x23   :  { %3996 = vmatmul.mubr.msk.f32.gmra.mrb[4].mxu1 %vm57_vm0, %v25_v8  ;;  %v48_v8 = vsub.s32 1, %v5778_v63 }
  0x24   :  { %3694 = vmatmul.mubr.msk.f32.gmra.mrb[12].mxu0 %vm57_vm0, %v26_v19  ;;  %4343 = vmatpush3.bf16.msra.mxu1 %v5685_v28 }
  0x25   :  { %4324 = vmatpush1.bf16.msra.mxu0 %v5664_v20  ;;  %188 = vmatprep.mubr.f32.mxu0 %v6708_v3  ;;  %v5797_v15 = vrot.slane %v5791_v10, %v48_v8 }
  0x26   :  { %4326 = vmatprep.subr.bf16.mxu0 %v5673_v25  ;;  %4344 = vmatprep.subr.bf16.mxu1 %v6710_v57 }
  0x27   :  { %3998 = vmatprep.mubr.msk.f32.mxu1 %vm57_vm0, %v26_v19 }
  0x28   :  { %3695 = vmatmul.mubr.msk.f32.gmra.mrb[14].mxu0 %vm57_vm0, %v27_v29  ;;  %3999 = vmatmul.mubr.msk.f32.gmra.mrb[6].mxu1 %vm57_vm0, %v27_v29 }
  0x29   :  { %4328 = vmatpush1.bf16.msra.mxu0 %v5692_v31  ;;  %419 = vmatprep.mubr.f32.mxu0 %v6708_v3 }
  0x2a   :  { %4354 = vmatprep.subr.bf16.mxu0 %v5459_v16  ;;  %4346 = vmatpush3.bf16.msra.mxu1 %v5705_v35 }
  0x2b   :  { %4347 = vmatprep.subr.bf16.mxu1 %v6710_v57  ;;  %4033 = vmatprep.mubr.msk.f32.mxu1 %vm5393_vm1, %v6708_v3 }
  0x2c   :  { %420 = vmatmul.mubr.f32.vlgmr.msra.gmra.mrb[16].mxu0 %v6708_v3 }
  0x2d   :  { %4356 = vmatpush1.bf16.msra.mxu0 %v5473_v21  ;;  %799 = vmatprep.mubr.f32.mxu0 %v6708_v3 }
  0x2e   :  { %4358 = vmatprep.subr.bf16.mxu0 %v5476_v22  ;;  %4349 = vmatpush3.bf16.msra.mxu1 %v5721_v38 }
  0x2f   :  { %4350 = vmatprep.subr.bf16.mxu1 %v6710_v57 }
  0x31   :  { %4360 = vmatpush1.bf16.msra.mxu0 %v5502_v30 }
  0x32   :  { %4362 = vmatprep.subr.bf16.mxu0 %v5508_v33  ;;  %4352 = vmatpush3.bf16.msra.mxu1 %v5736_v42 }
  0x33   :  { %4385 = vmatprep.subr.bf16.mxu1 %v6710_v57 }
  0x35   :  { %4364 = vmatpush1.bf16.msra.mxu0 %v5531_v41  ;;  %4034 = vmatmul.mubr.f32.vlgmr.msra.gmra.mrb[8].mxu1 %v6708_v3 }
  0x36   :  { %4366 = vmatprep.subr.bf16.mxu0 %v5540_v44  ;;  %4387 = vmatpush3.bf16.msra.mxu1 %v5555_v49 }
  0x37   :  { %4068 = vmatprep.mubr.msk.f32.mxu1 %vm5393_vm1, %v6708_v3  ;;  %4388 = vmatprep.subr.bf16.mxu1 %v6710_v57 }
  0x39   :  { %4368 = vmatpush1.bf16.msra.mxu0 %v5562_v51 }
  0x3a   :  { %4370 = vmatprep.subr.bf16.mxu0 %v5571_v54  ;;  %4390 = vmatpush3.bf16.msra.mxu1 %v5589_v60 }
  0x3b   :  { %4391 = vmatprep.subr.bf16.mxu1 %v6710_v57 }
  0x3d   :  { %4372 = vmatpush1.bf16.msra.mxu0 %v5596_v62 }
  0x3e   :  { %4374 = vmatprep.subr.bf16.mxu0 %v5605_v1  ;;  %4393 = vmatpush3.bf16.msra.mxu1 %v5623_v7 }
  0x3f   :  { %4394 = vmatprep.subr.bf16.mxu1 %v6710_v57 }
  0x41   :  { %4376 = vmatpush1.bf16.msra.mxu0 %v5630_v9 }
  0x42   :  { %4378 = vmatprep.subr.bf16.mxu0 %v5639_v12  ;;  %4396 = vmatpush3.bf16.msra.mxu1 %v5657_v18 }
  0x43   :  { %4397 = vmatprep.subr.bf16.mxu1 %v6710_v57 }
  0x45   :  { %4380 = vmatpush1.bf16.msra.mxu0 %v5664_v20 }
  0x46   :  { %4382 = vmatprep.subr.bf16.mxu0 %v5673_v25  ;;  %4399 = vmatpush3.bf16.msra.mxu1 %v5685_v28 }
  0x47   :  { %4400 = vmatprep.subr.bf16.mxu1 %v6710_v57 }
  0x49   :  { %4384 = vmatpush1.bf16.msra.mxu0 %v5692_v31 }
  0x4a   :  { %4410 = vmatprep.subr.bf16.mxu0 %v5459_v16  ;;  %4402 = vmatpush3.bf16.msra.mxu1 %v5705_v35 }
  0x4b   :  { %4403 = vmatprep.subr.bf16.mxu1 %v6710_v57 }
  0x4e   :  { %4405 = vmatpush3.bf16.msra.mxu1 %v5721_v38 }
  0x4f   :  { %4406 = vmatprep.subr.bf16.mxu1 %v6710_v57 }
  0x52   :  { %4408 = vmatpush3.bf16.msra.mxu1 %v5736_v42 }
  0x53   :  { %4441 = vmatprep.subr.bf16.mxu1 %v6710_v57 }
  0xdf   :  { %v148_v43 = vpop.f32.mrb[0].mxu0 }
  0xe0   :  { %v150_v45 = vpop.f32.mrb[1].mxu0  ;;  %v5805_v26 = vadd.f32 %v148_v43, %v45_v14 }
  0xe1   :  { %v5808_v27 = vadd.f32 %v150_v45, %v5797_v15 }
  0xe2   :  { %6797 = vst [vmem:[#allocation15_spill] sm:$0xff] %v5805_v26 }
  0xe3   :  { %v154_v46 = vpop.f32.mrb[2].mxu0  ;;  %6798 = vst [vmem:[#allocation16_spill] sm:$0xff] %v5808_v27 }
  0xe4   :  { %v156_v47 = vpop.f32.mrb[3].mxu0  ;;  %v5810_v29 = vadd.f32 %v154_v46, %v45_v14 }
  0xe5   :  { %v5813_v32 = vadd.f32 %v156_v47, %v5797_v15 }
  0xe6   :  { %v5774_v52 = vpop.f32.mrb[0].mxu1 }
  0xe7   :  { %v160_v48 = vpop.f32.mrb[4].mxu0  ;;  %v5776_v55 = vpop.f32.mrb[1].mxu1  ;;  %6799 = vst [vmem:[#allocation17_spill] sm:$0xff] %v5813_v32 }
  0xe8   :  { %v162_v50 = vpop.f32.mrb[5].mxu0  ;;  %v5815_v34 = vadd.f32 %v160_v48, %v45_v14 }
  0xe9   :  { %v5818_v36 = vadd.f32 %v162_v50, %v5797_v15 }
  0xea   :  { %6800 = vst [vmem:[#allocation18_spill] sm:$0xff] %v5815_v34 }
  0xeb   :  { %v166_v53 = vpop.f32.mrb[6].mxu0  ;;  %6801 = vst [vmem:[#allocation19_spill] sm:$0xff] %v5818_v36 }
  0xec   :  { %v168_v56 = vpop.f32.mrb[7].mxu0  ;;  %v5820_v37 = vadd.f32 %v166_v53, %v45_v14 }
  0xed   :  { %v5842_v42 = vadd.f32 %v168_v56, %v5797_v15 }
  0xee   :  { %v5780_v0 = vpop.f32.mrb[2].mxu1  ;;  %6802 = vst [vmem:[#allocation20_spill] sm:$0xff] %v5820_v37 }
  0xef   :  { %v172_v59 = vpop.f32.mrb[8].mxu0  ;;  %v5782_v4 = vpop.f32.mrb[3].mxu1  ;;  %6807 = vst [vmem:[#allocation25_spill] sm:$0xff] %v5842_v42 }
  0xf0   :  { %v174_v61 = vpop.f32.mrb[9].mxu0  ;;  %v5824_v40 = vadd.f32 %v172_v59, %v45_v14 }
  0xf2   :  { %6803 = vst [vmem:[#allocation21_spill] sm:$0xff] %v5824_v40 }
  0xf3   :  { %v178_v2 = vpop.f32.mrb[10].mxu0 }
  0xf4   :  { %v5784_v5 = vpop.f32.mrb[11].mxu0  ;;  %v5826_v43 = vadd.f32 %v178_v2, %v45_v14 }
  0xf6   :  { %v5799_v17 = vpop.f32.mrb[4].mxu1  ;;  %6804 = vst [vmem:[#allocation22_spill] sm:$0xff] %v5826_v43 }
  0xf7   :  { %v184_v11 = vpop.f32.mrb[12].mxu0  ;;  %v5801_v23 = vpop.f32.mrb[5].mxu1 }
  0xf8   :  { %v5793_v13 = vpop.f32.mrb[13].mxu0  ;;  %v5828_v45 = vadd.f32 %v184_v11, %v45_v14 }
  0xfa   :  { %6805 = vst [vmem:[#allocation23_spill] sm:$0xff] %v5828_v45 }
  0xfb   :  { %v190_v19 = vpop.f32.mrb[14].mxu0  ;;  %v5822_v39 = vpop.f32.mrb[6].mxu1 }
  0xfc   :  { %v5803_v24 = vpop.f32.mrb[15].mxu0  ;;  %v5830_v46 = vadd.f32 %v190_v19, %v45_v14  ;;  %v5832_v47 = vpop.f32.mrb[7].mxu1 }
  0xfe   :  { %6806 = vst [vmem:[#allocation24_spill] sm:$0xff] %v5830_v46 }
  0xff   :  { %v421_v58 = vpop.f32.mrb[16].mxu0 }
 0x100   :  { %v497_v48 = vrot.slane %v421_v58, 1  ;;  %v498_v6 = vrot.slane %v421_v58, 2  ;;  %v499_v8 = vrot.slane %v421_v58, 3  ;;  %v500_v50 = vrot.slane %v421_v58, 4  ;;  %v5834_v3 = vpop.f32.mrb[17].mxu0 }
 0x101   :  { %v501_v53 = vrot.slane %v421_v58, 5  ;;  %v502_v57 = vrot.slane %v421_v58, 6  ;;  %v503_v16 = vrot.slane %v421_v58, 7  ;;  %v512_v59 = vadd.f32 %v421_v58, %v5805_v26 }
 0x102   :  { %v513_v2 = vadd.f32 %v497_v48, %v5810_v29  ;;  %v514_v11 = vadd.f32 %v498_v6, %v5815_v34  ;;  %v515_v14 = vadd.f32 %v499_v8, %v5820_v37  ;;  %v516_v19 = vadd.f32 %v500_v50, %v5824_v40 }
 0x103   :  { %v517_v31 = vadd.f32 %v501_v53, %v5826_v43  ;;  %v518_v25 = vadd.f32 %v502_v57, %v5828_v45  ;;  %v3705_v38 = vmul.f32 -1.442695, %v512_v59  ;;  %v519_v20 = vadd.f32 %v503_v16, %v5830_v46 }
 0x104   :  { %v3706_v12 = vmul.f32 -1.442695, %v513_v2  ;;  %v3707_v58 = vmul.f32 -1.442695, %v514_v11  ;;  %v3708_v26 = vmul.f32 -1.442695, %v515_v14  ;;  %v5848_v48 = vadd.f32 %v174_v61, %v5797_v15 }
 0x105   :  { %4748 = vpow2.f32 %v3705_v38  ;;  %v3709_v6 = vmul.f32 -1.442695, %v516_v19  ;;  %v584_v8 = vadd.f32 %v5834_v3, %v5808_v27  ;;  %v3710_v56 = vmul.f32 -1.442695, %v517_v31 }
 0x106   :  { %6808 = vst [vmem:[#allocation26_spill] sm:$0xff] %v5848_v48  ;;  %4750 = vpow2.f32 %v3706_v12  ;;  %v569_v50 = vrot.slane %v5834_v3, 1  ;;  %v570_v57 = vrot.slane %v5834_v3, 2  ;;  %v3711_v53 = vmul.f32 -1.442695, %v518_v25 }
 0x107   :  { %4752 = vpow2.f32 %v3707_v58  ;;  %v571_v16 = vrot.slane %v5834_v3, 3  ;;  %v572_v59 = vrot.slane %v5834_v3, 4  ;;  %v3712_v61 = vmul.f32 -1.442695, %v519_v20 }
 0x108   :  { %4754 = vpow2.f32 %v3708_v26  ;;  %v585_v38 = vadd.f32 %v569_v50, %v5813_v32  ;;  %v586_v2 = vadd.f32 %v570_v57, %v5818_v36  ;;  %v492_v11 = vpop.f32.mrb[8].mxu1  ;;  %v3713_v14 = vmul.f32 -1.442695, %v584_v8 }
 0x109   :  { %4756 = vpow2.f32 %v3709_v6  ;;  %v587_v12 = vadd.f32 %v571_v16, %v5842_v42  ;;  %v588_v31 = vadd.f32 %v572_v59, %v5848_v48  ;;  %v4035_v20 = vpop.f32.mrb[9].mxu1  ;;  %v573_v50 = vrot.slane %v5834_v3, 5 }
 0x10a   :  { %4758 = vpow2.f32 %v3710_v56  ;;  %v3714_v25 = vmul.f32 -1.442695, %v585_v38  ;;  %v3715_v19 = vmul.f32 -1.442695, %v586_v2  ;;  %v5863_v16 = vadd.f32 %v5784_v5, %v5797_v15 }
 0x10b   :  { %4760 = vpow2.f32 %v3711_v53  ;;  %v3716_v58 = vmul.f32 -1.442695, %v587_v12  ;;  %v3717_v26 = vmul.f32 -1.442695, %v588_v31  ;;  %v574_v8 = vrot.slane %v5834_v3, 6 }
 0x10c   :  { %4762 = vpow2.f32 %v3712_v61  ;;  %6809 = vst [vmem:[#allocation27_spill] sm:$0xff] %v5863_v16  ;;  %v575_v61 = vrot.slane %v5834_v3, 7  ;;  %v5869_v2 = vadd.f32 %v5793_v13, %v5797_v15  ;;  %v589_v31 = vadd.f32 %v573_v50, %v5863_v16  ;;  %v5880_v3 = vld [vmem:[%s6706_s4] ss:$0 sm:$0xff] }
 0x10d   :  { %4764 = vpow2.f32 %v3713_v14  ;;  %v52_v14 = vsub.s32 2, %v5778_v63  ;;  %6812 = vst [vmem:[#allocation30_spill] sm:$0xff] %v5880_v3 }
 0x10e   :  { %4766 = vpow2.f32 %v3714_v25  ;;  %6810 = vst [vmem:[#allocation28_spill] sm:$0xff] %v5869_v2  ;;  %v5875_v25 = vadd.f32 %v5803_v24, %v5797_v15  ;;  %v3718_v24 = vmul.f32 -1.442695, %v589_v31 }
 0x10f   :  { %v4749_v6 = vpop.eup %4748  ;;  %4768 = vpow2.f32 %v3715_v19 }
 0x110   :  { %v4751_v57 = vpop.eup %4750  ;;  %v544_v56 = vadd.f32 1.0, %v4749_v6  ;;  %4770 = vpow2.f32 %v3716_v58  ;;  %6811 = vst [vmem:[#allocation29_spill] sm:$0xff] %v5875_v25  ;;  %v591_v63 = vadd.f32 %v575_v61, %v5875_v25 }
 0x111   :  { %v4753_v53 = vpop.eup %4752  ;;  %v545_v59 = vadd.f32 1.0, %v4751_v57  ;;  %4772 = vpow2.f32 %v3717_v26  ;;  %v590_v26 = vadd.f32 %v574_v8, %v5869_v2  ;;  %v640_v57 = vadd.f32 %v5880_v3, %v492_v11 }
 0x112   :  { %v4755_v38 = vpop.eup %4754  ;;  %v546_v12 = vadd.f32 1.0, %v4753_v53  ;;  %4774 = vrcp.f32 %v544_v56  ;;  %v5886_v53 = vrot.slane %v5791_v10, %v52_v14 }
 0x113   :  { %v4757_v5 = vpop.eup %4756  ;;  %v547_v19 = vadd.f32 1.0, %v4755_v38  ;;  %4776 = vrcp.f32 %v545_v59  ;;  %v3719_v8 = vmul.f32 -1.442695, %v590_v26  ;;  %v642_v61 = vrot.slane %v640_v57, 1 }
 0x114   :  { %v4759_v13 = vpop.eup %4758  ;;  %v548_v58 = vadd.f32 1.0, %v4757_v5  ;;  %4778 = vrcp.f32 %v546_v12  ;;  %v3720_v5 = vmul.f32 -1.442695, %v591_v63  ;;  %v5890_v31 = vadd.f32 %v5774_v52, %v5886_v53 }
 0x115   :  { %v4761_v20 = vpop.eup %4760  ;;  %v549_v50 = vadd.f32 1.0, %v4759_v13  ;;  %4780 = vrcp.f32 %v547_v19  ;;  %v5894_v14 = vadd.f32 %v5776_v55, %v5886_v53  ;;  %v5898_v52 = vadd.f32 %v5780_v0, %v5886_v53 }
 0x116   :  { %v4763_v6 = vpop.eup %4762  ;;  %v550_v15 = vadd.f32 1.0, %v4761_v20  ;;  %4782 = vrcp.f32 %v548_v58  ;;  %v643_v58 = vrot.slane %v640_v57, 2  ;;  %v644_v20 = vrot.slane %v640_v57, 3 }
 0x117   :  { %v4765_v56 = vpop.eup %4764  ;;  %v551_v59 = vadd.f32 1.0, %v4763_v6  ;;  %4784 = vrcp.f32 %v549_v50  ;;  %6813 = vst [vmem:[#allocation31_spill] sm:$0xff] %v5898_v52  ;;  %v646_v55 = vrot.slane %v640_v57, 5 }
 0x118   :  { %v4767_v38 = vpop.eup %4766  ;;  %4786 = vrcp.f32 %v550_v15  ;;  %v616_v11 = vadd.f32 1.0, %v4765_v56  ;;  %v645_v15 = vrot.slane %v640_v57, 4  ;;  %v5902_v56 = vadd.f32 %v5782_v4, %v5886_v53 }
 0x119   :  { %v4769_v12 = vpop.eup %4768  ;;  %4788 = vrcp.f32 %v551_v59  ;;  %v617_v26 = vadd.f32 1.0, %v4767_v38  ;;  %v5908_v4 = vadd.f32 %v5801_v23, %v5886_v53  ;;  %v5915_v23 = vadd.f32 %v5799_v17, %v5886_v53 }
 0x11a   :  { %v4771_v19 = vpop.eup %4770  ;;  %4790 = vpow2.f32 %v3718_v24  ;;  %v618_v63 = vadd.f32 1.0, %v4769_v12 }
 0x11b   :  { %v4773_v13 = vpop.eup %4772  ;;  %4792 = vpow2.f32 %v3719_v8  ;;  %v647_v8 = vrot.slane %v640_v57, 6  ;;  %6814 = vst [vmem:[#allocation32_spill] sm:$0xff] %v5908_v4  ;;  %6815 = vst [vmem:[#allocation33_spill] sm:$0xff] %v5915_v23 }
 0x11c   :  { %v4775_v10 = vpop.eup %4774  ;;  %4794 = vpow2.f32 %v3720_v5 }
 0x11d   :  { %v4777_v50 = vpop.eup %4776  ;;  %v657_v6 = vmul.f32 %v4775_v10, %v640_v57  ;;  %4796 = vrcp.f32 %v616_v11  ;;  %v648_v10 = vrot.slane %v640_v57, 7 }
 0x11e   :  { %v4779_v24 = vpop.eup %4778  ;;  %v658_v59 = vmul.f32 %v4777_v50, %v642_v61  ;;  %4798 = vrcp.f32 %v617_v26  ;;  %v619_v26 = vadd.f32 1.0, %v4771_v19  ;;  %v5923_v19 = vadd.f32 %v5822_v39, %v5886_v53 }
 0x11f   :  { %v4781_v25 = vpop.eup %4780  ;;  %v659_v38 = vmul.f32 %v4779_v24, %v643_v58  ;;  %v665_v5 = vadd.f32 %v657_v6, %v5894_v14  ;;  %4800 = vrcp.f32 %v618_v63  ;;  %v620_v63 = vadd.f32 1.0, %v4773_v13 }
 0x120   :  { %v4783_v12 = vpop.eup %4782  ;;  %v660_v3 = vmul.f32 %v4781_v25, %v644_v20  ;;  %v666_v2 = vadd.f32 %v658_v59, %v5890_v31  ;;  %6817 = vst [vmem:[#allocation35_spill] sm:$0xff] %v5923_v19 }
 0x121   :  { %v4785_v0 = vpop.eup %4784  ;;  %v661_v61 = vmul.f32 %v4783_v12, %v645_v15  ;;  %v667_v50 = vadd.f32 %v659_v38, %v5902_v56  ;;  %4802 = vtanh.f32 %v665_v5 }
 0x122   :  { %v4787_v11 = vpop.eup %4786  ;;  %v662_v58 = vmul.f32 %v4785_v0, %v646_v55  ;;  %v668_v24 = vadd.f32 %v660_v3, %v5898_v52  ;;  %4804 = vtanh.f32 %v666_v2  ;;  %v5919_v55 = vadd.f32 %v5832_v47, %v5886_v53 }
 0x123   :  { %v4789_v6 = vpop.eup %4788  ;;  %v663_v57 = vmul.f32 %v4787_v11, %v647_v8  ;;  %v669_v25 = vadd.f32 %v661_v61, %v5908_v4  ;;  %4806 = vtanh.f32 %v667_v50 }
 0x124   :  { %v4791_v20 = vpop.eup %4790  ;;  %v664_v15 = vmul.f32 %v4789_v6, %v648_v10  ;;  %6816 = vst [vmem:[#allocation34_spill] sm:$0xff] %v5919_v55  ;;  %4808 = vtanh.f32 %v668_v24  ;;  %v670_v2 = vadd.f32 %v662_v58, %v5915_v23 }
 0x125   :  { %v621_v59 = vadd.f32 1.0, %v4791_v20  ;;  %v4793_v3 = vpop.eup %4792  ;;  %4810 = vtanh.f32 %v669_v25  ;;  %v671_v17 = vadd.f32 %v663_v57, %v5919_v55 }
 0x126   :  { %v4795_v13 = vpop.eup %4794  ;;  %4812 = vrcp.f32 %v619_v26  ;;  %v672_v38 = vadd.f32 %v664_v15, %v5923_v19  ;;  %v622_v5 = vadd.f32 1.0, %v4793_v3 }
 0x127   :  { %4814 = vrcp.f32 %v620_v63  ;;  %v4797_v8 = vpop.eup %4796  ;;  %v623_v12 = vadd.f32 1.0, %v4795_v13 }
 0x128   :  { %4816 = vrcp.f32 %v621_v59  ;;  %v4799_v47 = vpop.eup %4798 }
 0x129   :  { %4818 = vtanh.f32 %v670_v2  ;;  %v4801_v10 = vpop.eup %4800 }
 0x12a   :  { %4820 = vtanh.f32 %v671_v17 }
 0x12b   :  { %v4803_v39 = vpop.eup %4802  ;;  %4822 = vtanh.f32 %v672_v38 }
 0x12c   :  { %v4805_v53 = vpop.eup %4804  ;;  %4824 = vrcp.f32 %v622_v5  ;;  %v681_v0 = vsub.f32 0.0, %v4803_v39 }
 0x12d   :  { %v4807_v61 = vpop.eup %4806  ;;  %4826 = vrcp.f32 %v623_v12  ;;  %v682_v50 = vsub.f32 0.0, %v4805_v53 }
 0x12e   :  { %v4809_v11 = vpop.eup %4808  ;;  %v683_v58 = vsub.f32 0.0, %v4807_v61  ;;  %v689_v24 = vmul.f32 %v4797_v8, %v681_v0 }
 0x12f   :  { %v4811_v6 = vpop.eup %4810  ;;  %v684_v26 = vsub.f32 0.0, %v4809_v11  ;;  %v690_v57 = vmul.f32 %v4799_v47, %v682_v50 }
 0x130   :  { %v4813_v25 = vpop.eup %4812  ;;  %v685_v20 = vsub.f32 0.0, %v4811_v6  ;;  %v691_v63 = vmul.f32 %v4801_v10, %v683_v58  ;;  %v5928_v15 = vadd.f32 %v4803_v39, %v689_v24 }
 0x131   :  { %v4815_v59 = vpop.eup %4814  ;;  %v692_v3 = vmul.f32 %v4813_v25, %v684_v26  ;;  %v5930_v2 = vadd.f32 %v4805_v53, %v690_v57 }
 0x132   :  { %v4817_v13 = vpop.eup %4816  ;;  %v693_v17 = vmul.f32 %v4815_v59, %v685_v20  ;;  %v5932_v38 = vadd.f32 %v4807_v61, %v691_v63 }
 0x133   :  { %v4819_v5 = vpop.eup %4818  ;;  %v5934_v12 = vadd.f32 %v4809_v11, %v692_v3  ;;  %v713_v8 = vrot.slane %v5930_v2, 7 }
 0x134   :  { %v4821_v47 = vpop.eup %4820  ;;  %v686_v0 = vsub.f32 0.0, %v4819_v5  ;;  %v5937_v10 = vadd.f32 %v4811_v6, %v693_v17  ;;  %v716_v39 = vrot.slane %v5932_v38, 6 }
 0x135   :  { %6818 = vst [vmem:[#allocation36_spill] sm:$0xff] %v5934_v12  ;;  %v4823_v53 = vpop.eup %4822  ;;  %v687_v50 = vsub.f32 0.0, %v4821_v47  ;;  %v715_v61 = vsel %vm714_vm2, %v713_v8, %v5928_v15  ;;  %v719_v58 = vrot.slane %v5934_v12, 5 }
 0x136   :  { %v4825_v24 = vpop.eup %4824  ;;  %v688_v11 = vsub.f32 0.0, %v4823_v53  ;;  %v694_v26 = vmul.f32 %v4817_v13, %v686_v0  ;;  %v718_v57 = vsel %vm717_vm3, %v716_v39, %v715_v61  ;;  %v722_v63 = vrot.slane %v5937_v10, 4 }
 0x137   :  { %v4827_v25 = vpop.eup %4826  ;;  %v695_v20 = vmul.f32 %v4825_v24, %v687_v50  ;;  %v721_v6 = vsel %vm720_vm4, %v719_v58, %v718_v57  ;;  %v6820_v61 = vmov 0.0   ;;  %v6821_v58 = vld [vmem:[#allocation7_spill] sm:$0xff]  ;;  %v6822_v24 = vld [vmem:[#allocation8_spill] sm:$0xff] }
 0x138   :  { %v696_v59 = vmul.f32 %v4827_v25, %v688_v11  ;;  %v5946_v3 = vadd.f32 %v4819_v5, %v694_v26  ;;  %v724_v8 = vsel %vm723_vm5, %v722_v63, %v721_v6  ;;  %v6823_v11 = vld [vmem:[#allocation13_spill] sm:$0xff]  ;;  %v6825_v57 = vld [vmem:[#allocation11_spill] sm:$0xff]  ;;  %v6826_v25 = vld [vmem:[#allocation14_spill] sm:$0xff] }
 0x139   :  { %v5948_v17 = vadd.f32 %v4821_v47, %v695_v20  ;;  %v6824_v26 = vld [vmem:[#allocation9_spill] sm:$0xff]  ;;  %v6827_v20 = vld [vmem:[#allocation2_spill] sm:$0xff] }
 0x13a   :  { %v5951_v12 = vadd.f32 %v4823_v53, %v696_v59  ;;  %v725_v13 = vrot.slane %v5946_v3, 3  ;;  %v6819_v53 = vmov 0.0|0.0  }
 0x13b   :  { %v728_v0 = vrot.slane %v5948_v17, 2 }
 0x13c   :  { %v727_v39 = vsel %vm726_vm6, %v725_v13, %v724_v8  ;;  %v731_v50 = vrot.slane %v5951_v12, 1 }
 0x13d   :  { %v730_v5 = vsel %vm729_vm7, %v728_v0, %v727_v39 }
 0x13e   :  { %v733_v47 = vsel %vm732_vm8, %v731_v50, %v730_v5 }
 0x13f   :  { %800 = vmatmul.mubr.f32.vlgmr.msra.gmra.mrb[18].mxu0 %v733_v47  ;;  %4069 = vmatmul.mubr.f32.vlgmr.msra.gmra.mrb[10].mxu1 %v733_v47 }
 0x140   :  { %4412 = vmatpush1.bf16.msra.mxu0 %v5473_v21  ;;  %4443 = vmatpush3.bf16.msra.mxu1 %v5555_v49 }
 0x141   :  { %4414 = vmatprep.subr.bf16.mxu0 %v5476_v22  ;;  %4444 = vmatprep.subr.bf16.mxu1 %v6819_v53 }
 0x142   :  { %1220 = vmatprep.mubr.f32.mxu0 %v6820_v61  ;;  %4103 = vmatprep.mubr.msk.f32.mxu1 %vm5393_vm1, %v6820_v61 }
 0x144   :  { %4416 = vmatpush1.bf16.msra.mxu0 %v5502_v30  ;;  %4446 = vmatpush3.bf16.msra.mxu1 %v5589_v60 }
 0x145   :  { %4418 = vmatprep.subr.bf16.mxu0 %v5508_v33  ;;  %4447 = vmatprep.subr.bf16.mxu1 %v6819_v53 }
 0x148   :  { %4420 = vmatpush1.bf16.msra.mxu0 %v5531_v41  ;;  %4449 = vmatpush3.bf16.msra.mxu1 %v5623_v7 }
 0x149   :  { %4422 = vmatprep.subr.bf16.mxu0 %v5540_v44  ;;  %4450 = vmatprep.subr.bf16.mxu1 %v6819_v53 }
 0x14c   :  { %4424 = vmatpush1.bf16.msra.mxu0 %v5562_v51  ;;  %4452 = vmatpush3.bf16.msra.mxu1 %v5657_v18 }
 0x14d   :  { %4426 = vmatprep.subr.bf16.mxu0 %v5571_v54  ;;  %4453 = vmatprep.subr.bf16.mxu1 %v6819_v53 }
 0x150   :  { %4428 = vmatpush1.bf16.msra.mxu0 %v5596_v62  ;;  %4455 = vmatpush3.bf16.msra.mxu1 %v5685_v28 }
 0x151   :  { %4430 = vmatprep.subr.bf16.mxu0 %v5605_v1  ;;  %4456 = vmatprep.subr.bf16.mxu1 %v6819_v53 }
 0x154   :  { %4432 = vmatpush1.bf16.msra.mxu0 %v5630_v9  ;;  %4458 = vmatpush3.bf16.msra.mxu1 %v5705_v35 }
 0x155   :  { %4434 = vmatprep.subr.bf16.mxu0 %v6821_v58  ;;  %4459 = vmatprep.subr.bf16.mxu1 %v6819_v53 }
 0x158   :  { %4436 = vmatpush1.bf16.msra.mxu0 %v6822_v24  ;;  %4461 = vmatpush3.bf16.msra.mxu1 %v6823_v11 }
 0x159   :  { %4438 = vmatprep.subr.bf16.mxu0 %v6824_v26  ;;  %4462 = vmatprep.subr.bf16.mxu1 %v6819_v53 }
 0x15c   :  { %4440 = vmatpush1.bf16.msra.mxu0 %v6825_v57  ;;  %4464 = vmatpush3.bf16.msra.mxu1 %v6826_v25  ;;  %v6828_v25 = vld [vmem:[#allocation15_spill] sm:$0xff] }
 0x15d   :  { %4466 = vmatprep.subr.bf16.mxu0 %v6827_v20  ;;  %4497 = vmatprep.subr.bf16.mxu1 %v6819_v53 }
 0x212   :  { %v801_v6 = vpop.f32.mrb[18].mxu0  ;;  %v5994_v63 = vpop.f32.mrb[10].mxu1 }
 0x213   :  { %v877_v59 = vrot.slane %v801_v6, 7  ;;  %v878_v8 = vrot.slane %v801_v6, 1  ;;  %v879_v13 = vrot.slane %v801_v6, 2  ;;  %v880_v0 = vrot.slane %v801_v6, 3  ;;  %v5996_v39 = vpop.f32.mrb[19].mxu0  ;;  %v4070_v50 = vpop.f32.mrb[11].mxu1 }
 0x214   :  { %v881_v5 = vrot.slane %v801_v6, 4  ;;  %v882_v47 = vrot.slane %v801_v6, 5  ;;  %v883_v26 = vrot.slane %v801_v6, 6  ;;  %v893_v57 = vadd.f32 %v801_v6, %v5810_v29 }
 0x215   :  { %v892_v11 = vadd.f32 %v877_v59, %v6828_v25  ;;  %v894_v20 = vadd.f32 %v878_v8, %v5815_v34  ;;  %v895_v24 = vadd.f32 %v879_v13, %v5820_v37  ;;  %v896_v58 = vadd.f32 %v880_v0, %v5824_v40 }
 0x216   :  { %v897_v35 = vadd.f32 %v881_v5, %v5826_v43  ;;  %v898_v9 = vadd.f32 %v882_v47, %v5828_v45  ;;  %v3722_v1 = vmul.f32 -1.442695, %v893_v57  ;;  %v899_v50 = vadd.f32 %v883_v26, %v5830_v46 }
 0x217   :  { %v3721_v28 = vmul.f32 -1.442695, %v892_v11  ;;  %v3723_v62 = vmul.f32 -1.442695, %v894_v20  ;;  %v3724_v54 = vmul.f32 -1.442695, %v895_v24 }
 0x218   :  { %4828 = vpow2.f32 %v3722_v1  ;;  %v3725_v6 = vmul.f32 -1.442695, %v896_v58  ;;  %v3726_v59 = vmul.f32 -1.442695, %v897_v35  ;;  %v3727_v8 = vmul.f32 -1.442695, %v898_v9 }
 0x219   :  { %4830 = vpow2.f32 %v3721_v28  ;;  %v949_v13 = vrot.slane %v5996_v39, 7  ;;  %v950_v0 = vrot.slane %v5996_v39, 1  ;;  %v3728_v5 = vmul.f32 -1.442695, %v899_v50 }
 0x21a   :  { %4832 = vpow2.f32 %v3723_v62  ;;  %v951_v47 = vrot.slane %v5996_v39, 2  ;;  %v965_v1 = vadd.f32 %v5996_v39, %v5813_v32  ;;  %v952_v24 = vrot.slane %v5996_v39, 3 }
 0x21b   :  { %4834 = vpow2.f32 %v3724_v54  ;;  %v964_v26 = vadd.f32 %v949_v13, %v5808_v27  ;;  %v966_v28 = vadd.f32 %v950_v0, %v5818_v36 }
 0x21c   :  { %4836 = vpow2.f32 %v3725_v6  ;;  %v967_v62 = vadd.f32 %v951_v47, %v5842_v42  ;;  %v3730_v35 = vmul.f32 -1.442695, %v965_v1  ;;  %v968_v0 = vadd.f32 %v952_v24, %v5848_v48 }
 0x21d   :  { %4838 = vpow2.f32 %v3726_v59  ;;  %v3729_v9 = vmul.f32 -1.442695, %v964_v26  ;;  %v3731_v58 = vmul.f32 -1.442695, %v966_v28  ;;  %v954_v26 = vrot.slane %v5996_v39, 5 }
 0x21e   :  { %4840 = vpow2.f32 %v3727_v8  ;;  %v3732_v54 = vmul.f32 -1.442695, %v967_v62  ;;  %v953_v8 = vrot.slane %v5996_v39, 4  ;;  %v955_v62 = vrot.slane %v5996_v39, 6 }
 0x21f   :  { %4842 = vpow2.f32 %v3728_v5 }
 0x220   :  { %4844 = vpow2.f32 %v3729_v9 }
 0x221   :  { %4846 = vpow2.f32 %v3730_v35 }
 0x222   :  { %v4829_v11 = vpop.eup %4828  ;;  %4848 = vpow2.f32 %v3731_v58 }
 0x223   :  { %v4831_v57 = vpop.eup %4830  ;;  %v925_v20 = vadd.f32 1.0, %v4829_v11  ;;  %4850 = vpow2.f32 %v3732_v54  ;;  %v969_v11 = vadd.f32 %v953_v8, %v5863_v16 }
 0x224   :  { %v4833_v50 = vpop.eup %4832  ;;  %v924_v6 = vadd.f32 1.0, %v4831_v57  ;;  %v3733_v57 = vmul.f32 -1.442695, %v968_v0 }
 0x225   :  { %v4835_v59 = vpop.eup %4834  ;;  %v926_v13 = vadd.f32 1.0, %v4833_v50  ;;  %4852 = vrcp.f32 %v925_v20  ;;  %v6829_v20 = vld [vmem:[#allocation28_spill] sm:$0xff] }
 0x226   :  { %v4837_v5 = vpop.eup %4836  ;;  %v927_v47 = vadd.f32 1.0, %v4835_v59  ;;  %4854 = vrcp.f32 %v924_v6  ;;  %v970_v50 = vadd.f32 %v954_v26, %v6829_v20  ;;  %v6830_v59 = vld [vmem:[#allocation30_spill] sm:$0xff] }
 0x227   :  { %v4839_v1 = vpop.eup %4838  ;;  %v928_v28 = vadd.f32 1.0, %v4837_v5  ;;  %4856 = vrcp.f32 %v926_v13  ;;  %v1020_v13 = vadd.f32 %v6830_v59, %v5994_v63  ;;  %v6831_v5 = vld [vmem:[#allocation29_spill] sm:$0xff] }
 0x228   :  { %v4841_v9 = vpop.eup %4840  ;;  %v929_v35 = vadd.f32 1.0, %v4839_v1  ;;  %4858 = vrcp.f32 %v927_v47  ;;  %v971_v39 = vadd.f32 %v955_v62, %v6831_v5  ;;  %v3734_v1 = vmul.f32 -1.442695, %v969_v11 }
 0x229   :  { %v4843_v58 = vpop.eup %4842  ;;  %v930_v54 = vadd.f32 1.0, %v4841_v9  ;;  %4860 = vrcp.f32 %v928_v28  ;;  %v3735_v9 = vmul.f32 -1.442695, %v970_v50  ;;  %v1022_v0 = vrot.slane %v1020_v13, 7 }
 0x22a   :  { %v931_v24 = vadd.f32 1.0, %v4843_v58  ;;  %4862 = vrcp.f32 %v929_v35  ;;  %v4845_v6 = vpop.eup %4844  ;;  %v3736_v58 = vmul.f32 -1.442695, %v971_v39  ;;  %v1023_v16 = vrot.slane %v1020_v13, 1 }
 0x22b   :  { %4864 = vrcp.f32 %v930_v54  ;;  %v4847_v48 = vpop.eup %4846  ;;  %v996_v20 = vadd.f32 1.0, %v4845_v6  ;;  %v1024_v42 = vrot.slane %v1020_v13, 2  ;;  %v1026_v50 = vrot.slane %v1020_v13, 4 }
 0x22c   :  { %4866 = vrcp.f32 %v931_v24  ;;  %v4849_v47 = vpop.eup %4848  ;;  %v1025_v24 = vrot.slane %v1020_v13, 3 }
 0x22d   :  { %4868 = vpow2.f32 %v3733_v57  ;;  %v4851_v28 = vpop.eup %4850 }
 0x22e   :  { %4870 = vpow2.f32 %v3734_v1  ;;  %v1028_v1 = vrot.slane %v1020_v13, 6 }
 0x22f   :  { %v4853_v8 = vpop.eup %4852  ;;  %4872 = vpow2.f32 %v3735_v9 }
 0x230   :  { %v4855_v35 = vpop.eup %4854  ;;  %v1038_v26 = vmul.f32 %v4853_v8, %v1020_v13  ;;  %4874 = vpow2.f32 %v3736_v58  ;;  %v1027_v8 = vrot.slane %v1020_v13, 5 }
 0x231   :  { %v4857_v54 = vpop.eup %4856  ;;  %v1037_v36 = vmul.f32 %v4855_v35, %v1022_v0  ;;  %4876 = vrcp.f32 %v996_v20  ;;  %v999_v20 = vadd.f32 1.0, %v4851_v28 }
 0x232   :  { %v4859_v63 = vpop.eup %4858  ;;  %v1039_v62 = vmul.f32 %v4857_v54, %v1023_v16  ;;  %v1046_v57 = vadd.f32 %v1038_v26, %v5890_v31  ;;  %v997_v26 = vadd.f32 1.0, %v4847_v48 }
 0x233   :  { %v4861_v11 = vpop.eup %4860  ;;  %v1040_v59 = vmul.f32 %v4859_v63, %v1024_v42  ;;  %v1045_v39 = vadd.f32 %v1037_v36, %v5894_v14  ;;  %v998_v36 = vadd.f32 1.0, %v4849_v47 }
 0x234   :  { %v4863_v5 = vpop.eup %4862  ;;  %v1041_v6 = vmul.f32 %v4861_v11, %v1025_v24  ;;  %v1047_v32 = vadd.f32 %v1039_v62, %v5902_v56 }
 0x235   :  { %v4865_v0 = vpop.eup %4864  ;;  %v1042_v35 = vmul.f32 %v4863_v5, %v1026_v50  ;;  %v1048_v16 = vadd.f32 %v1040_v59, %v5898_v52  ;;  %4878 = vtanh.f32 %v1045_v39 }
 0x236   :  { %v4867_v9 = vpop.eup %4866  ;;  %v1043_v54 = vmul.f32 %v4865_v0, %v1027_v8  ;;  %v1049_v58 = vadd.f32 %v1041_v6, %v5908_v4  ;;  %4880 = vtanh.f32 %v1046_v57 }
 0x237   :  { %v4869_v42 = vpop.eup %4868  ;;  %v1044_v63 = vmul.f32 %v4867_v9, %v1028_v1  ;;  %4882 = vtanh.f32 %v1047_v32  ;;  %v1050_v13 = vadd.f32 %v1042_v35, %v5915_v23 }
 0x238   :  { %4884 = vtanh.f32 %v1048_v16  ;;  %v1000_v24 = vadd.f32 1.0, %v4869_v42  ;;  %v4871_v5 = vpop.eup %4870  ;;  %v1051_v62 = vadd.f32 %v1043_v54, %v5919_v55 }
 0x239   :  { %4886 = vtanh.f32 %v1049_v58  ;;  %v4873_v48 = vpop.eup %4872  ;;  %v1052_v11 = vadd.f32 %v1044_v63, %v5923_v19  ;;  %v1001_v50 = vadd.f32 1.0, %v4871_v5 }
 0x23a   :  { %4888 = vrcp.f32 %v997_v26  ;;  %v4875_v57 = vpop.eup %4874  ;;  %v1002_v8 = vadd.f32 1.0, %v4873_v48 }
 0x23b   :  { %4890 = vrcp.f32 %v998_v36  ;;  %v4877_v47 = vpop.eup %4876  ;;  %v1003_v1 = vadd.f32 1.0, %v4875_v57 }
 0x23c   :  { %4892 = vrcp.f32 %v999_v20 }
 0x23d   :  { %4894 = vrcp.f32 %v1000_v24  ;;  %v6832_v24 = vld [vmem:[#allocation36_spill] sm:$0xff] }
 0x23e   :  { %4896 = vtanh.f32 %v1050_v13 }
 0x23f   :  { %v4879_v32 = vpop.eup %4878  ;;  %4898 = vtanh.f32 %v1051_v62 }
 0x240   :  { %v4881_v28 = vpop.eup %4880  ;;  %4900 = vtanh.f32 %v1052_v11  ;;  %v1069_v59 = vrot.slane %v4879_v32, 1 }
 0x241   :  { %v4883_v39 = vpop.eup %4882  ;;  %v1070_v6 = vrot.slane %v4881_v28, 1  ;;  %4902 = vrcp.f32 %v1001_v50 }
 0x242   :  { %v4885_v0 = vpop.eup %4884  ;;  %v1071_v35 = vrot.slane %v4883_v39, 1  ;;  %v1085_v16 = vsub.f32 %v5928_v15, %v1069_v59  ;;  %4904 = vrcp.f32 %v1002_v8 }
 0x243   :  { %v4887_v9 = vpop.eup %4886  ;;  %v1072_v26 = vrot.slane %v4885_v0, 1  ;;  %v1086_v54 = vsub.f32 %v5930_v2, %v1070_v6  ;;  %4906 = vrcp.f32 %v1003_v1 }
 0x244   :  { %v4889_v58 = vpop.eup %4888  ;;  %v1073_v42 = vrot.slane %v4887_v9, 1  ;;  %v1087_v36 = vsub.f32 %v5932_v38, %v1071_v35  ;;  %v1101_v63 = vrot.slane %v1085_v16, 7 }
 0x245   :  { %v4891_v20 = vpop.eup %4890  ;;  %v1088_v13 = vsub.f32 %v6832_v24, %v1072_v26  ;;  %v1102_v5 = vrot.slane %v1086_v54, 7 }
 0x246   :  { %v4893_v62 = vpop.eup %4892  ;;  %v1089_v48 = vsub.f32 %v5937_v10, %v1073_v42  ;;  %v1103_v15 = vrot.slane %v1087_v36, 7  ;;  %v1117_v11 = vmul.f32 %v4877_v47, %v1101_v63 }
 0x247   :  { %v4895_v57 = vpop.eup %4894  ;;  %v1104_v59 = vrot.slane %v1088_v13, 7  ;;  %v1118_v2 = vmul.f32 %v4889_v58, %v1102_v5 }
 0x248   :  { %v4897_v6 = vpop.eup %4896  ;;  %v1105_v50 = vrot.slane %v1089_v48, 7  ;;  %v1119_v19 = vmul.f32 %v4891_v20, %v1103_v15  ;;  %v6037_v55 = vadd.f32 %v4879_v32, %v1117_v11 }
 0x249   :  { %v4899_v38 = vpop.eup %4898  ;;  %v1074_v35 = vrot.slane %v4897_v6, 1  ;;  %v1120_v8 = vmul.f32 %v4893_v62, %v1104_v59  ;;  %v6039_v16 = vadd.f32 %v4881_v28, %v1118_v2 }
 0x24a   :  { %v4901_v26 = vpop.eup %4900  ;;  %v1075_v54 = vrot.slane %v4899_v38, 1  ;;  %v1121_v1 = vmul.f32 %v4895_v57, %v1105_v50  ;;  %v6041_v24 = vadd.f32 %v4883_v39, %v1119_v19  ;;  %v1141_v10 = vrot.slane %v6037_v55, 1 }
 0x24b   :  { %v1076_v47 = vrot.slane %v4901_v26, 1  ;;  %v1090_v58 = vsub.f32 %v5946_v3, %v1074_v35  ;;  %v6045_v42 = vadd.f32 %v4885_v0, %v1120_v8  ;;  %v4903_v13 = vpop.eup %4902 }
 0x24c   :  { %v1091_v32 = vsub.f32 %v5948_v17, %v1075_v54  ;;  %v6048_v36 = vadd.f32 %v4887_v9, %v1121_v1  ;;  %v1142_v28 = vsel %vm714_vm2, %v6039_v16, %v1141_v10  ;;  %v1143_v63 = vrot.slane %v6041_v24, 7  ;;  %v4905_v0 = vpop.eup %4904 }
 0x24d   :  { %v1092_v20 = vsub.f32 %v5951_v12, %v1076_v47  ;;  %v1106_v19 = vrot.slane %v1090_v58, 7  ;;  %v1145_v39 = vrot.slane %v6045_v42, 6  ;;  %v4907_v9 = vpop.eup %4906  ;;  %v6836_v58 = vld [vmem:[#allocation5_spill] sm:$0xff] }
 0x24e   :  { %v1107_v5 = vrot.slane %v1091_v32, 7  ;;  %v1144_v3 = vsel %vm717_vm3, %v1143_v63, %v1142_v28  ;;  %v1147_v11 = vrot.slane %v6048_v36, 5  ;;  %v6837_v32 = vld [vmem:[#allocation6_spill] sm:$0xff]  ;;  %v6838_v28 = vld [vmem:[#allocation12_spill] sm:$0xff]  ;;  %v6839_v63 = vld [vmem:[#allocation7_spill] sm:$0xff] }
 0x24f   :  { %v1108_v62 = vrot.slane %v1092_v20, 7  ;;  %v1122_v48 = vmul.f32 %v4903_v13, %v1106_v19  ;;  %v1146_v17 = vsel %vm720_vm4, %v1145_v39, %v1144_v3  ;;  %v6840_v20 = vld [vmem:[#allocation8_spill] sm:$0xff]  ;;  %v6841_v19 = vld [vmem:[#allocation13_spill] sm:$0xff]  ;;  %v6843_v13 = vld [vmem:[#allocation11_spill] sm:$0xff] }
 0x250   :  { %v1123_v15 = vmul.f32 %v4905_v0, %v1107_v5  ;;  %v1148_v2 = vsel %vm723_vm5, %v1147_v11, %v1146_v17  ;;  %v6842_v39 = vld [vmem:[#allocation9_spill] sm:$0xff]  ;;  %v6844_v5 = vld [vmem:[#allocation14_spill] sm:$0xff] }
 0x251   :  { %v1124_v57 = vmul.f32 %v4907_v9, %v1108_v62  ;;  %v6058_v59 = vadd.f32 %v4897_v6, %v1122_v48  ;;  %v6833_v6 = vld [vmem:[#allocation3_spill] sm:$0xff]  ;;  %v6845_v3 = vld [vmem:[#allocation2_spill] sm:$0xff] }
 0x252   :  { %v6060_v12 = vadd.f32 %v4899_v38, %v1123_v15  ;;  %v6834_v38 = vld [vmem:[#allocation4_spill] sm:$0xff] }
 0x253   :  { %v6063_v50 = vadd.f32 %v4901_v26, %v1124_v57  ;;  %v1149_v35 = vrot.slane %v6058_v59, 4  ;;  %v6835_v26 = vld [vmem:[#allocation10_spill] sm:$0xff] }
 0x254   :  { %v1151_v8 = vrot.slane %v6060_v12, 3 }
 0x255   :  { %v1150_v54 = vsel %vm726_vm6, %v1149_v35, %v1148_v2  ;;  %v1153_v1 = vrot.slane %v6063_v50, 2 }
 0x256   :  { %v1152_v10 = vsel %vm729_vm7, %v1151_v8, %v1150_v54 }
 0x257   :  { %v1154_v47 = vsel %vm732_vm8, %v1153_v1, %v1152_v10 }
 0x258   :  { %1221 = vmatmul.mubr.f32.vlgmr.msra.gmra.mrb[20].mxu0 %v1154_v47  ;;  %4104 = vmatmul.mubr.f32.vlgmr.msra.gmra.mrb[12].mxu1 %v1154_v47 }
 0x259   :  { %4468 = vmatpush1.bf16.msra.mxu0 %v5473_v21  ;;  %4499 = vmatpush3.bf16.msra.mxu1 %v5555_v49 }
 0x25a   :  { %4470 = vmatprep.subr.bf16.mxu0 %v5476_v22  ;;  %4500 = vmatprep.subr.bf16.mxu1 %v6819_v53 }
 0x25b   :  { %1641 = vmatprep.mubr.f32.mxu0 %v6820_v61  ;;  %4138 = vmatprep.mubr.msk.f32.mxu1 %vm5393_vm1, %v6820_v61 }
 0x25d   :  { %4472 = vmatpush1.bf16.msra.mxu0 %v5502_v30  ;;  %4502 = vmatpush3.bf16.msra.mxu1 %v5589_v60 }
 0x25e   :  { %4474 = vmatprep.subr.bf16.mxu0 %v5508_v33  ;;  %4503 = vmatprep.subr.bf16.mxu1 %v6819_v53 }
 0x261   :  { %4476 = vmatpush1.bf16.msra.mxu0 %v5531_v41  ;;  %4505 = vmatpush3.bf16.msra.mxu1 %v5623_v7 }
 0x262   :  { %4478 = vmatprep.subr.bf16.mxu0 %v5540_v44  ;;  %4506 = vmatprep.subr.bf16.mxu1 %v6819_v53 }
 0x265   :  { %4480 = vmatpush1.bf16.msra.mxu0 %v5562_v51  ;;  %4508 = vmatpush3.bf16.msra.mxu1 %v5657_v18 }
 0x266   :  { %4482 = vmatprep.subr.bf16.mxu0 %v6833_v6  ;;  %4509 = vmatprep.subr.bf16.mxu1 %v6819_v53 }
 0x269   :  { %4484 = vmatpush1.bf16.msra.mxu0 %v6834_v38  ;;  %4511 = vmatpush3.bf16.msra.mxu1 %v6835_v26 }
 0x26a   :  { %4486 = vmatprep.subr.bf16.mxu0 %v6836_v58  ;;  %4512 = vmatprep.subr.bf16.mxu1 %v6819_v53 }
 0x26d   :  { %4488 = vmatpush1.bf16.msra.mxu0 %v6837_v32  ;;  %4514 = vmatpush3.bf16.msra.mxu1 %v6838_v28 }
 0x26e   :  { %4490 = vmatprep.subr.bf16.mxu0 %v6839_v63  ;;  %4515 = vmatprep.subr.bf16.mxu1 %v6819_v53 }
 0x271   :  { %4492 = vmatpush1.bf16.msra.mxu0 %v6840_v20  ;;  %4517 = vmatpush3.bf16.msra.mxu1 %v6841_v19 }
 0x272   :  { %4494 = vmatprep.subr.bf16.mxu0 %v6842_v39  ;;  %4518 = vmatprep.subr.bf16.mxu1 %v6819_v53 }
 0x275   :  { %4496 = vmatpush1.bf16.msra.mxu0 %v6843_v13  ;;  %4520 = vmatpush3.bf16.msra.mxu1 %v6844_v5 }
 0x276   :  { %4522 = vmatprep.subr.bf16.mxu0 %v6845_v3  ;;  %4553 = vmatprep.subr.bf16.mxu1 %v6819_v53 }
 0x32b   :  { %v1222_v0 = vpop.f32.mrb[20].mxu0  ;;  %v6106_v62 = vpop.f32.mrb[12].mxu1 }
 0x32c   :  { %v1298_v48 = vrot.slane %v1222_v0, 6  ;;  %v1299_v17 = vrot.slane %v1222_v0, 7  ;;  %v1300_v9 = vrot.slane %v1222_v0, 1  ;;  %v1301_v15 = vrot.slane %v1222_v0, 2  ;;  %v6108_v11 = vpop.f32.mrb[21].mxu0  ;;  %v4105_v57 = vpop.f32.mrb[13].mxu1 }
 0x32d   :  { %v1302_v2 = vrot.slane %v1222_v0, 3  ;;  %v1303_v35 = vrot.slane %v1222_v0, 4  ;;  %v1304_v8 = vrot.slane %v1222_v0, 5  ;;  %v1315_v54 = vadd.f32 %v1222_v0, %v5815_v34 }
 0x32e   :  { %v1313_v1 = vadd.f32 %v1298_v48, %v6828_v25  ;;  %v1314_v10 = vadd.f32 %v1299_v17, %v5810_v29  ;;  %v1316_v47 = vadd.f32 %v1300_v9, %v5820_v37  ;;  %v1317_v3 = vadd.f32 %v1301_v15, %v5824_v40 }
 0x32f   :  { %v1318_v5 = vadd.f32 %v1302_v2, %v5826_v43  ;;  %v1319_v13 = vadd.f32 %v1303_v35, %v5828_v45  ;;  %v3739_v39 = vmul.f32 -1.442695, %v1315_v54  ;;  %v1320_v57 = vadd.f32 %v1304_v8, %v5830_v46  ;;  %v6846_v54 = vld [vmem:[#allocation17_spill] sm:$0xff] }
 0x330   :  { %v3737_v19 = vmul.f32 -1.442695, %v1313_v1  ;;  %v3738_v20 = vmul.f32 -1.442695, %v1314_v10  ;;  %v3740_v63 = vmul.f32 -1.442695, %v1316_v47 }
 0x331   :  { %4908 = vpow2.f32 %v3739_v39  ;;  %v3741_v0 = vmul.f32 -1.442695, %v1317_v3  ;;  %v3742_v48 = vmul.f32 -1.442695, %v1318_v5  ;;  %v3743_v17 = vmul.f32 -1.442695, %v1319_v13 }
 0x332   :  { %4910 = vpow2.f32 %v3737_v19  ;;  %v1370_v9 = vrot.slane %v6108_v11, 6  ;;  %v1371_v15 = vrot.slane %v6108_v11, 7  ;;  %v3744_v2 = vmul.f32 -1.442695, %v1320_v57  ;;  %v6847_v39 = vld [vmem:[#allocation19_spill] sm:$0xff]  ;;  %v6848_v5 = vld [vmem:[#allocation25_spill] sm:$0xff] }
 0x333   :  { %4912 = vpow2.f32 %v3738_v20  ;;  %v1372_v35 = vrot.slane %v6108_v11, 1  ;;  %v1387_v19 = vadd.f32 %v6108_v11, %v6847_v39  ;;  %v1373_v47 = vrot.slane %v6108_v11, 2 }
 0x334   :  { %4914 = vpow2.f32 %v3740_v63  ;;  %v1385_v8 = vadd.f32 %v1370_v9, %v5808_v27  ;;  %v1386_v1 = vadd.f32 %v1371_v15, %v6846_v54 }
 0x335   :  { %4916 = vpow2.f32 %v3741_v0  ;;  %v1388_v20 = vadd.f32 %v1372_v35, %v6848_v5  ;;  %v3747_v10 = vmul.f32 -1.442695, %v1387_v19  ;;  %v1375_v19 = vrot.slane %v6108_v11, 4 }
 0x336   :  { %4918 = vpow2.f32 %v3742_v48  ;;  %v3745_v13 = vmul.f32 -1.442695, %v1385_v8  ;;  %v3746_v3 = vmul.f32 -1.442695, %v1386_v1 }
 0x337   :  { %4920 = vpow2.f32 %v3743_v17  ;;  %v3748_v63 = vmul.f32 -1.442695, %v1388_v20  ;;  %v1374_v17 = vrot.slane %v6108_v11, 3 }
 0x338   :  { %4922 = vpow2.f32 %v3744_v2  ;;  %v6849_v2 = vld [vmem:[#allocation26_spill] sm:$0xff] }
 0x339   :  { %4924 = vpow2.f32 %v3745_v13  ;;  %v1389_v35 = vadd.f32 %v1373_v47, %v6849_v2 }
 0x33a   :  { %4926 = vpow2.f32 %v3746_v3  ;;  %v1376_v3 = vrot.slane %v6108_v11, 5 }
 0x33b   :  { %v4909_v57 = vpop.eup %4908  ;;  %4928 = vpow2.f32 %v3747_v10  ;;  %v3749_v5 = vmul.f32 -1.442695, %v1389_v35 }
 0x33c   :  { %v4911_v0 = vpop.eup %4910  ;;  %v1347_v48 = vadd.f32 1.0, %v4909_v57  ;;  %4930 = vpow2.f32 %v3748_v63 }
 0x33d   :  { %v4913_v9 = vpop.eup %4912  ;;  %v1345_v15 = vadd.f32 1.0, %v4911_v0 }
 0x33e   :  { %v4915_v39 = vpop.eup %4914  ;;  %v1346_v54 = vadd.f32 1.0, %v4913_v9  ;;  %4932 = vrcp.f32 %v1347_v48  ;;  %v6850_v48 = vld [vmem:[#allocation27_spill] sm:$0xff] }
 0x33f   :  { %v4917_v8 = vpop.eup %4916  ;;  %v1348_v1 = vadd.f32 1.0, %v4915_v39  ;;  %4934 = vrcp.f32 %v1345_v15  ;;  %v1390_v9 = vadd.f32 %v1374_v17, %v6850_v48  ;;  %v6851_v39 = vld [vmem:[#allocation28_spill] sm:$0xff] }
 0x340   :  { %v4919_v20 = vpop.eup %4918  ;;  %v1349_v13 = vadd.f32 1.0, %v4917_v8  ;;  %4936 = vrcp.f32 %v1346_v54  ;;  %v1391_v15 = vadd.f32 %v1375_v19, %v6851_v39  ;;  %v6136_v54 = vld [vmem:[%s6706_s4] ss:$0 sm:$0xff]  ;;  %v6853_v8 = vld [vmem:[#allocation29_spill] sm:$0xff] }
 0x341   :  { %v4921_v10 = vpop.eup %4920  ;;  %v1350_v57 = vadd.f32 1.0, %v4919_v20  ;;  %4938 = vrcp.f32 %v1348_v1  ;;  %6852 = vst [vmem:[#allocation15_spill] sm:$0xff] %v6136_v54  ;;  %v1441_v11 = vadd.f32 %v6136_v54, %v6106_v62  ;;  %v1392_v1 = vadd.f32 %v1376_v3, %v6853_v8 }
 0x342   :  { %v4923_v63 = vpop.eup %4922  ;;  %v1351_v0 = vadd.f32 1.0, %v4921_v10  ;;  %4940 = vrcp.f32 %v1349_v13  ;;  %v3750_v35 = vmul.f32 -1.442695, %v1390_v9  ;;  %v3751_v10 = vmul.f32 -1.442695, %v1391_v15 }
 0x343   :  { %v1352_v47 = vadd.f32 1.0, %v4923_v63  ;;  %4942 = vrcp.f32 %v1350_v57  ;;  %v4925_v2 = vpop.eup %4924  ;;  %v1443_v57 = vrot.slane %v1441_v11, 6  ;;  %v3752_v63 = vmul.f32 -1.442695, %v1392_v1 }
 0x344   :  { %4944 = vrcp.f32 %v1351_v0  ;;  %v4927_v20 = vpop.eup %4926  ;;  %v1444_v39 = vrot.slane %v1441_v11, 7  ;;  %v1417_v27 = vadd.f32 1.0, %v4925_v2  ;;  %v1445_v45 = vrot.slane %v1441_v11, 1 }
 0x345   :  { %4946 = vrcp.f32 %v1352_v47  ;;  %v4929_v17 = vpop.eup %4928  ;;  %v1446_v47 = vrot.slane %v1441_v11, 2  ;;  %v1447_v8 = vrot.slane %v1441_v11, 3 }
 0x346   :  { %4948 = vpow2.f32 %v3749_v5  ;;  %v4931_v13 = vpop.eup %4930 }
 0x347   :  { %4950 = vpow2.f32 %v3750_v35  ;;  %v1449_v35 = vrot.slane %v1441_v11, 5 }
 0x348   :  { %v4933_v19 = vpop.eup %4932  ;;  %4952 = vpow2.f32 %v3751_v10  ;;  %v1418_v10 = vadd.f32 1.0, %v4927_v20 }
 0x349   :  { %v4935_v0 = vpop.eup %4934  ;;  %v1460_v48 = vmul.f32 %v4933_v19, %v1441_v11  ;;  %4954 = vpow2.f32 %v3752_v63  ;;  %v1448_v19 = vrot.slane %v1441_v11, 4 }
 0x34a   :  { %v4937_v46 = vpop.eup %4936  ;;  %v1458_v43 = vmul.f32 %v4935_v0, %v1443_v57  ;;  %4956 = vrcp.f32 %v1417_v27  ;;  %v1420_v27 = vadd.f32 1.0, %v4931_v13 }
 0x34b   :  { %v4939_v62 = vpop.eup %4938  ;;  %v1459_v3 = vmul.f32 %v4937_v46, %v1444_v39  ;;  %v1468_v1 = vadd.f32 %v1460_v48, %v5902_v56  ;;  %v1419_v48 = vadd.f32 1.0, %v4929_v17 }
 0x34c   :  { %v4941_v5 = vpop.eup %4940  ;;  %v1461_v9 = vmul.f32 %v4939_v62, %v1445_v45  ;;  %v1466_v15 = vadd.f32 %v1458_v43, %v5894_v14 }
 0x34d   :  { %v4943_v54 = vpop.eup %4942  ;;  %v1462_v2 = vmul.f32 %v4941_v5, %v1446_v47  ;;  %v1467_v40 = vadd.f32 %v1459_v3, %v5890_v31  ;;  %v6855_v5 = vld [vmem:[#allocation35_spill] sm:$0xff] }
 0x34e   :  { %v4945_v57 = vpop.eup %4944  ;;  %v1463_v0 = vmul.f32 %v4943_v54, %v1447_v8  ;;  %v1469_v46 = vadd.f32 %v1461_v9, %v5898_v52  ;;  %4958 = vtanh.f32 %v1466_v15  ;;  %v6854_v8 = vld [vmem:[#allocation34_spill] sm:$0xff] }
 0x34f   :  { %v4947_v39 = vpop.eup %4946  ;;  %v1464_v63 = vmul.f32 %v4945_v57, %v1448_v19  ;;  %v1470_v45 = vadd.f32 %v1462_v2, %v5908_v4  ;;  %4960 = vtanh.f32 %v1467_v40 }
 0x350   :  { %v4949_v43 = vpop.eup %4948  ;;  %v1465_v62 = vmul.f32 %v4947_v39, %v1449_v35  ;;  %4962 = vtanh.f32 %v1468_v1  ;;  %v1471_v54 = vadd.f32 %v1463_v0, %v5915_v23 }
 0x351   :  { %4964 = vtanh.f32 %v1469_v46  ;;  %v1421_v47 = vadd.f32 1.0, %v4949_v43  ;;  %v4951_v11 = vpop.eup %4950  ;;  %v1472_v3 = vadd.f32 %v1464_v63, %v6854_v8 }
 0x352   :  { %4966 = vtanh.f32 %v1470_v45  ;;  %v4953_v20 = vpop.eup %4952  ;;  %v1473_v9 = vadd.f32 %v1465_v62, %v6855_v5  ;;  %v1422_v1 = vadd.f32 1.0, %v4951_v11 }
 0x353   :  { %4968 = vrcp.f32 %v1418_v10  ;;  %v4955_v40 = vpop.eup %4954  ;;  %v1423_v57 = vadd.f32 1.0, %v4953_v20 }
 0x354   :  { %4970 = vrcp.f32 %v1419_v48  ;;  %v4957_v17 = vpop.eup %4956  ;;  %v1424_v46 = vadd.f32 1.0, %v4955_v40 }
 0x355   :  { %4972 = vrcp.f32 %v1420_v27 }
 0x356   :  { %4974 = vrcp.f32 %v1421_v47 }
 0x357   :  { %4976 = vtanh.f32 %v1471_v54 }
 0x358   :  { %v4959_v15 = vpop.eup %4958  ;;  %4978 = vtanh.f32 %v1472_v3 }
 0x359   :  { %v4961_v13 = vpop.eup %4960  ;;  %4980 = vtanh.f32 %v1473_v9  ;;  %v1490_v19 = vrot.slane %v4959_v15, 1 }
 0x35a   :  { %v4963_v2 = vpop.eup %4962  ;;  %v1491_v35 = vrot.slane %v4961_v13, 1  ;;  %4982 = vrcp.f32 %v1422_v1 }
 0x35b   :  { %v4965_v0 = vpop.eup %4964  ;;  %v1492_v39 = vrot.slane %v4963_v2, 1  ;;  %v1506_v10 = vsub.f32 %v6037_v55, %v1490_v19  ;;  %4984 = vrcp.f32 %v1423_v57 }
 0x35c   :  { %v4967_v63 = vpop.eup %4966  ;;  %v1493_v45 = vrot.slane %v4965_v0, 1  ;;  %v1507_v43 = vsub.f32 %v6039_v16, %v1491_v35  ;;  %4986 = vrcp.f32 %v1424_v46 }
 0x35d   :  { %v4969_v48 = vpop.eup %4968  ;;  %v1494_v62 = vrot.slane %v4967_v63, 1  ;;  %v1508_v27 = vsub.f32 %v6041_v24, %v1492_v39  ;;  %v1522_v47 = vrot.slane %v1506_v10, 7 }
 0x35e   :  { %v4971_v54 = vpop.eup %4970  ;;  %v1509_v11 = vsub.f32 %v6045_v42, %v1493_v45  ;;  %v1523_v3 = vrot.slane %v1507_v43, 7 }
 0x35f   :  { %v4973_v20 = vpop.eup %4972  ;;  %v1510_v9 = vsub.f32 %v6048_v36, %v1494_v62  ;;  %v1524_v55 = vrot.slane %v1508_v27, 7  ;;  %v1538_v40 = vmul.f32 %v4957_v17, %v1522_v47 }
 0x360   :  { %v4975_v19 = vpop.eup %4974  ;;  %v1525_v5 = vrot.slane %v1509_v11, 7  ;;  %v1539_v16 = vmul.f32 %v4969_v48, %v1523_v3 }
 0x361   :  { %v4977_v35 = vpop.eup %4976  ;;  %v1526_v1 = vrot.slane %v1510_v9, 7  ;;  %v1540_v8 = vmul.f32 %v4971_v54, %v1524_v55  ;;  %v6154_v23 = vadd.f32 %v4959_v15, %v1538_v40 }
 0x362   :  { %v4979_v24 = vpop.eup %4978  ;;  %v1495_v39 = vrot.slane %v4977_v35, 1  ;;  %v1541_v57 = vmul.f32 %v4973_v20, %v1525_v5  ;;  %v6156_v10 = vadd.f32 %v4961_v13, %v1539_v16 }
 0x363   :  { %v4981_v42 = vpop.eup %4980  ;;  %v1496_v45 = vrot.slane %v4979_v24, 1  ;;  %v1542_v46 = vmul.f32 %v4975_v19, %v1526_v1  ;;  %v6158_v43 = vadd.f32 %v4963_v2, %v1540_v8  ;;  %v1562_v36 = vrot.slane %v6154_v23, 2 }
 0x364   :  { %v1497_v17 = vrot.slane %v4981_v42, 1  ;;  %v1511_v48 = vsub.f32 %v6058_v59, %v1495_v39  ;;  %v6162_v62 = vadd.f32 %v4965_v0, %v1541_v57  ;;  %v1563_v15 = vrot.slane %v6156_v10, 1  ;;  %v4983_v2 = vpop.eup %4982 }
 0x365   :  { %v1512_v27 = vsub.f32 %v6060_v12, %v1496_v45  ;;  %v6166_v47 = vadd.f32 %v4967_v63, %v1542_v46  ;;  %v4985_v0 = vpop.eup %4984 }
 0x366   :  { %v1513_v5 = vsub.f32 %v6063_v50, %v1497_v17  ;;  %v1527_v13 = vrot.slane %v1511_v48, 7  ;;  %v1564_v54 = vsel %vm714_vm2, %v1563_v15, %v1562_v36  ;;  %v1566_v8 = vrot.slane %v6162_v62, 7  ;;  %v4987_v12 = vpop.eup %4986  ;;  %v6859_v48 = vld [vmem:[#allocation9_spill] sm:$0xff]  ;;  %v6860_v15 = vld [vmem:[#allocation11_spill] sm:$0xff] }
 0x367   :  { %v1528_v11 = vrot.slane %v1512_v27, 7  ;;  %v1565_v59 = vsel %vm717_vm3, %v6158_v43, %v1564_v54  ;;  %v1568_v55 = vrot.slane %v6166_v47, 6  ;;  %v6861_v27 = vld [vmem:[#allocation14_spill] sm:$0xff] }
 0x368   :  { %v1529_v3 = vrot.slane %v1513_v5, 7  ;;  %v1543_v20 = vmul.f32 %v4983_v2, %v1527_v13  ;;  %v1567_v9 = vsel %vm720_vm4, %v1566_v8, %v1565_v59  ;;  %v6862_v5 = vld [vmem:[#allocation2_spill] sm:$0xff] }
 0x369   :  { %v1544_v63 = vmul.f32 %v4985_v0, %v1528_v11  ;;  %v1569_v16 = vsel %vm723_vm5, %v1568_v55, %v1567_v9 }
 0x36a   :  { %v1545_v50 = vmul.f32 %v4987_v12, %v1529_v3  ;;  %v6175_v40 = vadd.f32 %v4977_v35, %v1543_v20  ;;  %v6856_v35 = vld [vmem:[#allocation7_spill] sm:$0xff] }
 0x36b   :  { %v6177_v19 = vadd.f32 %v4979_v24, %v1544_v63  ;;  %v6857_v24 = vld [vmem:[#allocation8_spill] sm:$0xff] }
 0x36c   :  { %v6180_v1 = vadd.f32 %v4981_v42, %v1545_v50  ;;  %v1570_v39 = vrot.slane %v6175_v40, 5  ;;  %v6858_v42 = vld [vmem:[#allocation13_spill] sm:$0xff] }
 0x36d   :  { %v1572_v57 = vrot.slane %v6177_v19, 4 }
 0x36e   :  { %v1571_v45 = vsel %vm726_vm6, %v1570_v39, %v1569_v16  ;;  %v1574_v46 = vrot.slane %v6180_v1, 3  ;;  %v6863_v39 = vld [vmem:[#allocation21_spill] sm:$0xff] }
 0x36f   :  { %v1573_v36 = vsel %vm729_vm7, %v1572_v57, %v1571_v45  ;;  %v6864_v45 = vld [vmem:[#allocation22_spill] sm:$0xff] }
 0x370   :  { %v1575_v17 = vsel %vm732_vm8, %v1574_v46, %v1573_v36  ;;  %v6865_v36 = vld [vmem:[#allocation23_spill] sm:$0xff] }
 0x371   :  { %1642 = vmatmul.mubr.f32.vlgmr.msra.gmra.mrb[22].mxu0 %v1575_v17  ;;  %4139 = vmatmul.mubr.f32.vlgmr.msra.gmra.mrb[14].mxu1 %v1575_v17 }
 0x372   :  { %4524 = vmatpush1.bf16.msra.mxu0 %v5473_v21  ;;  %4555 = vmatpush3.bf16.msra.mxu1 %v5555_v49 }
 0x373   :  { %4526 = vmatprep.subr.bf16.mxu0 %v5476_v22  ;;  %4556 = vmatprep.subr.bf16.mxu1 %v6819_v53 }
 0x374   :  { %2062 = vmatprep.mubr.f32.mxu0 %v6820_v61  ;;  %4173 = vmatprep.mubr.msk.f32.mxu1 %vm5393_vm1, %v6820_v61 }
 0x376   :  { %4528 = vmatpush1.bf16.msra.mxu0 %v5502_v30  ;;  %4558 = vmatpush3.bf16.msra.mxu1 %v5589_v60 }
 0x377   :  { %4530 = vmatprep.subr.bf16.mxu0 %v5508_v33  ;;  %4559 = vmatprep.subr.bf16.mxu1 %v6819_v53 }
 0x37a   :  { %4532 = vmatpush1.bf16.msra.mxu0 %v5531_v41  ;;  %4561 = vmatpush3.bf16.msra.mxu1 %v5623_v7 }
 0x37b   :  { %4534 = vmatprep.subr.bf16.mxu0 %v5540_v44  ;;  %4562 = vmatprep.subr.bf16.mxu1 %v6819_v53 }
 0x37e   :  { %4536 = vmatpush1.bf16.msra.mxu0 %v5562_v51  ;;  %4564 = vmatpush3.bf16.msra.mxu1 %v5657_v18 }
 0x37f   :  { %4538 = vmatprep.subr.bf16.mxu0 %v6833_v6  ;;  %4565 = vmatprep.subr.bf16.mxu1 %v6819_v53 }
 0x382   :  { %4540 = vmatpush1.bf16.msra.mxu0 %v6834_v38  ;;  %4567 = vmatpush3.bf16.msra.mxu1 %v6835_v26 }
 0x383   :  { %4542 = vmatprep.subr.bf16.mxu0 %v6836_v58  ;;  %4568 = vmatprep.subr.bf16.mxu1 %v6819_v53 }
 0x386   :  { %4544 = vmatpush1.bf16.msra.mxu0 %v6837_v32  ;;  %4570 = vmatpush3.bf16.msra.mxu1 %v6838_v28 }
 0x387   :  { %4546 = vmatprep.subr.bf16.mxu0 %v6856_v35  ;;  %4571 = vmatprep.subr.bf16.mxu1 %v6819_v53 }
 0x38a   :  { %4548 = vmatpush1.bf16.msra.mxu0 %v6857_v24  ;;  %4573 = vmatpush3.bf16.msra.mxu1 %v6858_v42 }
 0x38b   :  { %4550 = vmatprep.subr.bf16.mxu0 %v6859_v48  ;;  %4574 = vmatprep.subr.bf16.mxu1 %v6819_v53 }
 0x38e   :  { %4552 = vmatpush1.bf16.msra.mxu0 %v6860_v15  ;;  %4576 = vmatpush3.bf16.msra.mxu1 %v6861_v27  ;;  %v6866_v27 = vld [vmem:[#allocation24_spill] sm:$0xff] }
 0x38f   :  { %4578 = vmatprep.subr.bf16.mxu0 %v6862_v5  ;;  %4609 = vmatprep.subr.bf16.mxu1 %v6819_v53 }
 0x444   :  { %v1643_v13 = vpop.f32.mrb[22].mxu0  ;;  %v6223_v54 = vpop.f32.mrb[14].mxu1 }
 0x445   :  { %v1719_v8 = vrot.slane %v1643_v13, 5  ;;  %v1720_v2 = vrot.slane %v1643_v13, 6  ;;  %v1721_v11 = vrot.slane %v1643_v13, 7  ;;  %v1722_v59 = vrot.slane %v1643_v13, 1  ;;  %v6225_v0 = vpop.f32.mrb[23].mxu0  ;;  %v4140_v3 = vpop.f32.mrb[15].mxu1 }
 0x446   :  { %v1723_v20 = vrot.slane %v1643_v13, 2  ;;  %v1724_v9 = vrot.slane %v1643_v13, 3  ;;  %v1725_v12 = vrot.slane %v1643_v13, 4  ;;  %v1737_v63 = vadd.f32 %v1643_v13, %v5820_v37 }
 0x447   :  { %v1734_v55 = vadd.f32 %v1719_v8, %v6828_v25  ;;  %v1735_v50 = vadd.f32 %v1720_v2, %v5810_v29  ;;  %v1736_v16 = vadd.f32 %v1721_v11, %v5815_v34  ;;  %v1738_v57 = vadd.f32 %v1722_v59, %v6863_v39 }
 0x448   :  { %v1739_v46 = vadd.f32 %v1723_v20, %v6864_v45  ;;  %v1740_v17 = vadd.f32 %v1724_v9, %v6865_v36  ;;  %v3756_v5 = vmul.f32 -1.442695, %v1737_v63  ;;  %v1741_v3 = vadd.f32 %v1725_v12, %v6866_v27  ;;  %v6867_v63 = vld [vmem:[#allocation16_spill] sm:$0xff]  ;;  %v6875_v27 = vld [vmem:[#allocation29_spill] sm:$0xff] }
 0x449   :  { %v3753_v15 = vmul.f32 -1.442695, %v1734_v55  ;;  %v3754_v48 = vmul.f32 -1.442695, %v1735_v50  ;;  %v3755_v42 = vmul.f32 -1.442695, %v1736_v16 }
 0x44a   :  { %4988 = vpow2.f32 %v3756_v5  ;;  %v3757_v13 = vmul.f32 -1.442695, %v1738_v57  ;;  %v3758_v8 = vmul.f32 -1.442695, %v1739_v46  ;;  %v3759_v2 = vmul.f32 -1.442695, %v1740_v17 }
 0x44b   :  { %4990 = vpow2.f32 %v3753_v15  ;;  %v1791_v11 = vrot.slane %v6225_v0, 5  ;;  %v1792_v59 = vrot.slane %v6225_v0, 6  ;;  %v3760_v20 = vmul.f32 -1.442695, %v1741_v3  ;;  %v6868_v55 = vld [vmem:[#allocation17_spill] sm:$0xff]  ;;  %v6869_v5 = vld [vmem:[#allocation19_spill] sm:$0xff] }
 0x44c   :  { %4992 = vpow2.f32 %v3754_v48  ;;  %v1793_v9 = vrot.slane %v6225_v0, 7  ;;  %v6870_v15 = vld [vmem:[#allocation25_spill] sm:$0xff]  ;;  %v1794_v3 = vrot.slane %v6225_v0, 1 }
 0x44d   :  { %4994 = vpow2.f32 %v3755_v42  ;;  %v1806_v12 = vadd.f32 %v1791_v11, %v6867_v63  ;;  %v1807_v50 = vadd.f32 %v1792_v59, %v6868_v55  ;;  %v1809_v48 = vadd.f32 %v6225_v0, %v6870_v15 }
 0x44e   :  { %4996 = vpow2.f32 %v3757_v13  ;;  %v1808_v16 = vadd.f32 %v1793_v9, %v6869_v5 }
 0x44f   :  { %4998 = vpow2.f32 %v3758_v8  ;;  %v3761_v57 = vmul.f32 -1.442695, %v1806_v12  ;;  %v3762_v46 = vmul.f32 -1.442695, %v1807_v50  ;;  %v3764_v42 = vmul.f32 -1.442695, %v1809_v48 }
 0x450   :  { %5000 = vpow2.f32 %v3759_v2  ;;  %v3763_v17 = vmul.f32 -1.442695, %v1808_v16  ;;  %v1795_v2 = vrot.slane %v6225_v0, 2  ;;  %v1796_v48 = vrot.slane %v6225_v0, 3 }
 0x451   :  { %5002 = vpow2.f32 %v3760_v20  ;;  %v6871_v20 = vld [vmem:[#allocation26_spill] sm:$0xff] }
 0x452   :  { %5004 = vpow2.f32 %v3761_v57  ;;  %v1810_v12 = vadd.f32 %v1794_v3, %v6871_v20 }
 0x453   :  { %5006 = vpow2.f32 %v3762_v46 }
 0x454   :  { %v4989_v13 = vpop.eup %4988  ;;  %5008 = vpow2.f32 %v3763_v17  ;;  %v1797_v17 = vrot.slane %v6225_v0, 4  ;;  %v3765_v63 = vmul.f32 -1.442695, %v1810_v12 }
 0x455   :  { %v4991_v11 = vpop.eup %4990  ;;  %v1769_v8 = vadd.f32 1.0, %v4989_v13  ;;  %5010 = vpow2.f32 %v3764_v42 }
 0x456   :  { %v4993_v59 = vpop.eup %4992  ;;  %v1766_v55 = vadd.f32 1.0, %v4991_v11  ;;  %v1813_v0 = vadd.f32 %v1797_v17, %v6875_v27 }
 0x457   :  { %v4995_v9 = vpop.eup %4994  ;;  %v1767_v5 = vadd.f32 1.0, %v4993_v59  ;;  %5012 = vrcp.f32 %v1769_v8  ;;  %v6872_v8 = vld [vmem:[#allocation27_spill] sm:$0xff] }
 0x458   :  { %v4997_v50 = vpop.eup %4996  ;;  %v1768_v16 = vadd.f32 1.0, %v4995_v9  ;;  %5014 = vrcp.f32 %v1766_v55  ;;  %v1811_v15 = vadd.f32 %v1795_v2, %v6872_v8  ;;  %v6873_v9 = vld [vmem:[#allocation28_spill] sm:$0xff] }
 0x459   :  { %v4999_v57 = vpop.eup %4998  ;;  %v1770_v46 = vadd.f32 1.0, %v4997_v50  ;;  %5016 = vrcp.f32 %v1767_v5  ;;  %v1812_v55 = vadd.f32 %v1796_v48, %v6873_v9  ;;  %v6874_v50 = vld [vmem:[#allocation15_spill] sm:$0xff] }
 0x45a   :  { %v5001_v13 = vpop.eup %5000  ;;  %v1771_v11 = vadd.f32 1.0, %v4999_v57  ;;  %5018 = vrcp.f32 %v1768_v16  ;;  %v1862_v5 = vadd.f32 %v6874_v50, %v6223_v54  ;;  %v3766_v57 = vmul.f32 -1.442695, %v1811_v15 }
 0x45b   :  { %v5003_v42 = vpop.eup %5002  ;;  %v1772_v59 = vadd.f32 1.0, %v5001_v13  ;;  %5020 = vrcp.f32 %v1770_v46  ;;  %v3767_v13 = vmul.f32 -1.442695, %v1812_v55 }
 0x45c   :  { %v1773_v3 = vadd.f32 1.0, %v5003_v42  ;;  %5022 = vrcp.f32 %v1771_v11  ;;  %v5005_v20 = vpop.eup %5004  ;;  %v1864_v12 = vrot.slane %v1862_v5, 5  ;;  %v3768_v42 = vmul.f32 -1.442695, %v1813_v0 }
 0x45d   :  { %5024 = vrcp.f32 %v1772_v59  ;;  %v5007_v36 = vpop.eup %5006  ;;  %v1865_v8 = vrot.slane %v1862_v5, 6  ;;  %v1838_v48 = vadd.f32 1.0, %v5005_v20  ;;  %v1866_v45 = vrot.slane %v1862_v5, 7 }
 0x45e   :  { %5026 = vrcp.f32 %v1773_v3  ;;  %v5009_v16 = vpop.eup %5008  ;;  %v1867_v3 = vrot.slane %v1862_v5, 1  ;;  %v1868_v50 = vrot.slane %v1862_v5, 2  ;;  %v1869_v55 = vrot.slane %v1862_v5, 3 }
 0x45f   :  { %5028 = vpow2.f32 %v3765_v63  ;;  %v5011_v46 = vpop.eup %5010 }
 0x460   :  { %5030 = vpow2.f32 %v3766_v57  ;;  %v1870_v57 = vrot.slane %v1862_v5, 4 }
 0x461   :  { %v5013_v2 = vpop.eup %5012  ;;  %5032 = vpow2.f32 %v3767_v13 }
 0x462   :  { %v5015_v11 = vpop.eup %5014  ;;  %v1882_v9 = vmul.f32 %v5013_v2, %v1862_v5  ;;  %5034 = vpow2.f32 %v3768_v42 }
 0x463   :  { %v5017_v59 = vpop.eup %5016  ;;  %v1879_v37 = vmul.f32 %v5015_v11, %v1864_v12  ;;  %5036 = vrcp.f32 %v1838_v48 }
 0x464   :  { %v5019_v54 = vpop.eup %5018  ;;  %v1880_v17 = vmul.f32 %v5017_v59, %v1865_v8  ;;  %v1890_v2 = vadd.f32 %v1882_v9, %v5898_v52  ;;  %v1839_v59 = vadd.f32 1.0, %v5007_v36  ;;  %v6876_v9 = vld [vmem:[#allocation33_spill] sm:$0xff] }
 0x465   :  { %v5021_v63 = vpop.eup %5020  ;;  %v1881_v15 = vmul.f32 %v5019_v54, %v1866_v45  ;;  %v1887_v27 = vadd.f32 %v1879_v37, %v5894_v14  ;;  %v1840_v54 = vadd.f32 1.0, %v5009_v16 }
 0x466   :  { %v5023_v0 = vpop.eup %5022  ;;  %v1883_v34 = vmul.f32 %v5021_v63, %v1867_v3  ;;  %v1888_v20 = vadd.f32 %v1880_v17, %v5890_v31  ;;  %v1841_v3 = vadd.f32 1.0, %v5011_v46 }
 0x467   :  { %v5025_v12 = vpop.eup %5024  ;;  %v1884_v11 = vmul.f32 %v5023_v0, %v1868_v50  ;;  %v1889_v8 = vadd.f32 %v1881_v15, %v5902_v56  ;;  %5038 = vtanh.f32 %v1887_v27  ;;  %v6877_v27 = vld [vmem:[#allocation34_spill] sm:$0xff]  ;;  %v6878_v15 = vld [vmem:[#allocation35_spill] sm:$0xff] }
 0x468   :  { %v5027_v13 = vpop.eup %5026  ;;  %v1885_v45 = vmul.f32 %v5025_v12, %v1869_v55  ;;  %v1891_v42 = vadd.f32 %v1883_v34, %v5908_v4  ;;  %5040 = vtanh.f32 %v1888_v20 }
 0x469   :  { %v5029_v37 = vpop.eup %5028  ;;  %v1886_v48 = vmul.f32 %v5027_v13, %v1870_v57  ;;  %5042 = vtanh.f32 %v1889_v8  ;;  %v1892_v5 = vadd.f32 %v1884_v11, %v6876_v9 }
 0x46a   :  { %5044 = vtanh.f32 %v1890_v2  ;;  %v1842_v17 = vadd.f32 1.0, %v5029_v37  ;;  %v5031_v50 = vpop.eup %5030  ;;  %v1893_v63 = vadd.f32 %v1885_v45, %v6877_v27 }
 0x46b   :  { %5046 = vtanh.f32 %v1891_v42  ;;  %v5033_v36 = vpop.eup %5032  ;;  %v1894_v34 = vadd.f32 %v1886_v48, %v6878_v15  ;;  %v1843_v20 = vadd.f32 1.0, %v5031_v50 }
 0x46c   :  { %5048 = vrcp.f32 %v1839_v59  ;;  %v5035_v55 = vpop.eup %5034  ;;  %v1844_v57 = vadd.f32 1.0, %v5033_v36 }
 0x46d   :  { %5050 = vrcp.f32 %v1840_v54  ;;  %v5037_v16 = vpop.eup %5036  ;;  %v1845_v13 = vadd.f32 1.0, %v5035_v55 }
 0x46e   :  { %5052 = vrcp.f32 %v1841_v3 }
 0x46f   :  { %5054 = vrcp.f32 %v1842_v17 }
 0x470   :  { %5056 = vtanh.f32 %v1892_v5 }
 0x471   :  { %v5039_v0 = vpop.eup %5038  ;;  %5058 = vtanh.f32 %v1893_v63 }
 0x472   :  { %v5041_v46 = vpop.eup %5040  ;;  %5060 = vtanh.f32 %v1894_v34  ;;  %v1911_v2 = vrot.slane %v5039_v0, 1 }
 0x473   :  { %v5043_v12 = vpop.eup %5042  ;;  %v1912_v11 = vrot.slane %v5041_v46, 1  ;;  %5062 = vrcp.f32 %v1843_v20 }
 0x474   :  { %v5045_v8 = vpop.eup %5044  ;;  %v1913_v59 = vrot.slane %v5043_v12, 1  ;;  %v1927_v45 = vsub.f32 %v6154_v23, %v1911_v2  ;;  %5064 = vrcp.f32 %v1844_v57 }
 0x475   :  { %v5047_v42 = vpop.eup %5046  ;;  %v1914_v37 = vrot.slane %v5045_v8, 1  ;;  %v1928_v54 = vsub.f32 %v6156_v10, %v1912_v11  ;;  %5066 = vrcp.f32 %v1845_v13 }
 0x476   :  { %v5049_v48 = vpop.eup %5048  ;;  %v1915_v3 = vrot.slane %v5047_v42, 1  ;;  %v1929_v17 = vsub.f32 %v6158_v43, %v1913_v59  ;;  %v1943_v5 = vrot.slane %v1927_v45, 7 }
 0x477   :  { %v5051_v50 = vpop.eup %5050  ;;  %v1930_v63 = vsub.f32 %v6162_v62, %v1914_v37  ;;  %v1944_v36 = vrot.slane %v1928_v54, 7 }
 0x478   :  { %v5053_v34 = vpop.eup %5052  ;;  %v1931_v55 = vsub.f32 %v6166_v47, %v1915_v3  ;;  %v1945_v23 = vrot.slane %v1929_v17, 7  ;;  %v1959_v2 = vmul.f32 %v5037_v16, %v1943_v5 }
 0x479   :  { %v5055_v15 = vpop.eup %5054  ;;  %v1946_v27 = vrot.slane %v1930_v63, 7  ;;  %v1960_v10 = vmul.f32 %v5049_v48, %v1944_v36 }
 0x47a   :  { %v5057_v11 = vpop.eup %5056  ;;  %v1947_v20 = vrot.slane %v1931_v55, 7  ;;  %v1961_v9 = vmul.f32 %v5051_v50, %v1945_v23  ;;  %v6266_v52 = vadd.f32 %v5039_v0, %v1959_v2 }
 0x47b   :  { %v5059_v43 = vpop.eup %5058  ;;  %v1916_v59 = vrot.slane %v5057_v11, 1  ;;  %v1962_v57 = vmul.f32 %v5053_v34, %v1946_v27  ;;  %v6268_v45 = vadd.f32 %v5041_v46, %v1960_v10 }
 0x47c   :  { %v5061_v62 = vpop.eup %5060  ;;  %v1917_v37 = vrot.slane %v5059_v43, 1  ;;  %v1963_v13 = vmul.f32 %v5055_v15, %v1947_v20  ;;  %v6270_v54 = vadd.f32 %v5043_v12, %v1961_v9  ;;  %v1983_v47 = vrot.slane %v6266_v52, 3 }
 0x47d   :  { %v1918_v16 = vrot.slane %v5061_v62, 1  ;;  %v1932_v48 = vsub.f32 %v6175_v40, %v1916_v59  ;;  %v6274_v3 = vadd.f32 %v5045_v8, %v1962_v57  ;;  %v1984_v0 = vrot.slane %v6268_v45, 2  ;;  %v5063_v12 = vpop.eup %5062 }
 0x47e   :  { %v1933_v17 = vsub.f32 %v6177_v19, %v1917_v37  ;;  %v6278_v5 = vadd.f32 %v5047_v42, %v1963_v13  ;;  %v1986_v27 = vrot.slane %v6270_v54, 1  ;;  %v5065_v40 = vpop.eup %5064 }
 0x47f   :  { %v1934_v46 = vsub.f32 %v6180_v1, %v1918_v16  ;;  %v1948_v15 = vrot.slane %v1932_v48, 7  ;;  %v1985_v9 = vsel %vm714_vm2, %v1984_v0, %v1983_v47  ;;  %v5067_v19 = vpop.eup %5066  ;;  %v6882_v48 = vld [vmem:[#allocation14_spill] sm:$0xff] }
 0x480   :  { %v1949_v50 = vrot.slane %v1933_v17, 7  ;;  %v1987_v63 = vsel %vm717_vm3, %v1986_v27, %v1985_v9  ;;  %v1989_v55 = vrot.slane %v6278_v5, 7  ;;  %v6883_v0 = vld [vmem:[#allocation2_spill] sm:$0xff] }
 0x481   :  { %v1950_v8 = vrot.slane %v1934_v46, 7  ;;  %v1964_v36 = vmul.f32 %v5063_v12, %v1948_v15  ;;  %v1988_v34 = vsel %vm720_vm4, %v6274_v3, %v1987_v63 }
 0x482   :  { %v1965_v42 = vmul.f32 %v5065_v40, %v1949_v50  ;;  %v1990_v10 = vsel %vm723_vm5, %v1989_v55, %v1988_v34  ;;  %v6884_v55 = vld [vmem:[#allocation18_spill] sm:$0xff] }
 0x483   :  { %v1966_v23 = vmul.f32 %v5067_v19, %v1950_v8  ;;  %v6287_v2 = vadd.f32 %v5057_v11, %v1964_v36  ;;  %v6879_v11 = vld [vmem:[#allocation13_spill] sm:$0xff] }
 0x484   :  { %v6289_v1 = vadd.f32 %v5059_v43, %v1965_v42  ;;  %v6880_v43 = vld [vmem:[#allocation9_spill] sm:$0xff] }
 0x485   :  { %v6292_v20 = vadd.f32 %v5061_v62, %v1966_v23  ;;  %v1991_v59 = vrot.slane %v6287_v2, 6  ;;  %v6881_v62 = vld [vmem:[#allocation11_spill] sm:$0xff] }
 0x486   :  { %v1993_v57 = vrot.slane %v6289_v1, 5 }
 0x487   :  { %v1992_v37 = vsel %vm726_vm6, %v1991_v59, %v1990_v10  ;;  %v1995_v13 = vrot.slane %v6292_v20, 4  ;;  %v6885_v10 = vld [vmem:[#allocation20_spill] sm:$0xff] }
 0x488   :  { %v1994_v47 = vsel %vm729_vm7, %v1993_v57, %v1992_v37  ;;  %v6886_v57 = vld [vmem:[#allocation22_spill] sm:$0xff] }
 0x489   :  { %v1996_v16 = vsel %vm732_vm8, %v1995_v13, %v1994_v47  ;;  %v6887_v13 = vld [vmem:[#allocation23_spill] sm:$0xff] }
 0x48a   :  { %2063 = vmatmul.mubr.f32.vlgmr.msra.gmra.mrb[24].mxu0 %v1996_v16  ;;  %4174 = vmatmul.mubr.f32.vlgmr.msra.gmra.mrb[16].mxu1 %v1996_v16  ;;  %v6888_v16 = vld [vmem:[#allocation24_spill] sm:$0xff] }
 0x48b   :  { %4580 = vmatpush1.bf16.msra.mxu0 %v5473_v21  ;;  %4611 = vmatpush3.bf16.msra.mxu1 %v5555_v49 }
 0x48c   :  { %4582 = vmatprep.subr.bf16.mxu0 %v5476_v22  ;;  %4612 = vmatprep.subr.bf16.mxu1 %v6819_v53 }
 0x48d   :  { %2483 = vmatprep.mubr.f32.mxu0 %v6820_v61  ;;  %4208 = vmatprep.mubr.msk.f32.mxu1 %vm5393_vm1, %v6820_v61 }
 0x48f   :  { %4584 = vmatpush1.bf16.msra.mxu0 %v5502_v30  ;;  %4614 = vmatpush3.bf16.msra.mxu1 %v5589_v60 }
 0x490   :  { %4586 = vmatprep.subr.bf16.mxu0 %v5508_v33  ;;  %4615 = vmatprep.subr.bf16.mxu1 %v6819_v53 }
 0x493   :  { %4588 = vmatpush1.bf16.msra.mxu0 %v5531_v41  ;;  %4617 = vmatpush3.bf16.msra.mxu1 %v5623_v7 }
 0x494   :  { %4590 = vmatprep.subr.bf16.mxu0 %v5540_v44  ;;  %4618 = vmatprep.subr.bf16.mxu1 %v6819_v53 }
 0x497   :  { %4592 = vmatpush1.bf16.msra.mxu0 %v5562_v51  ;;  %4620 = vmatpush3.bf16.msra.mxu1 %v5657_v18 }
 0x498   :  { %4594 = vmatprep.subr.bf16.mxu0 %v6833_v6  ;;  %4621 = vmatprep.subr.bf16.mxu1 %v6819_v53 }
 0x49b   :  { %4596 = vmatpush1.bf16.msra.mxu0 %v6834_v38  ;;  %4623 = vmatpush3.bf16.msra.mxu1 %v6835_v26 }
 0x49c   :  { %4598 = vmatprep.subr.bf16.mxu0 %v6836_v58  ;;  %4624 = vmatprep.subr.bf16.mxu1 %v6819_v53 }
 0x49f   :  { %4600 = vmatpush1.bf16.msra.mxu0 %v6837_v32  ;;  %4626 = vmatpush3.bf16.msra.mxu1 %v6838_v28 }
 0x4a0   :  { %4602 = vmatprep.subr.bf16.mxu0 %v6856_v35  ;;  %4627 = vmatprep.subr.bf16.mxu1 %v6819_v53 }
 0x4a3   :  { %4604 = vmatpush1.bf16.msra.mxu0 %v6857_v24  ;;  %4629 = vmatpush3.bf16.msra.mxu1 %v6879_v11 }
 0x4a4   :  { %4606 = vmatprep.subr.bf16.mxu0 %v6880_v43  ;;  %4630 = vmatprep.subr.bf16.mxu1 %v6819_v53 }
 0x4a7   :  { %4608 = vmatpush1.bf16.msra.mxu0 %v6881_v62  ;;  %4632 = vmatpush3.bf16.msra.mxu1 %v6882_v48 }
 0x4a8   :  { %4634 = vmatprep.subr.bf16.mxu0 %v6883_v0  ;;  %4665 = vmatprep.subr.bf16.mxu1 %v6819_v53 }
 0x55d   :  { %v2064_v17 = vpop.f32.mrb[24].mxu0  ;;  %v6335_v27 = vpop.f32.mrb[16].mxu1 }
 0x55e   :  { %v2140_v46 = vrot.slane %v2064_v17, 4  ;;  %v2141_v15 = vrot.slane %v2064_v17, 5  ;;  %v2142_v9 = vrot.slane %v2064_v17, 6  ;;  %v2143_v12 = vrot.slane %v2064_v17, 7  ;;  %v6337_v50 = vpop.f32.mrb[25].mxu0  ;;  %v4175_v63 = vpop.f32.mrb[17].mxu1 }
 0x55f   :  { %v2144_v40 = vrot.slane %v2064_v17, 1  ;;  %v2145_v8 = vrot.slane %v2064_v17, 2  ;;  %v2146_v36 = vrot.slane %v2064_v17, 3  ;;  %v2159_v34 = vadd.f32 %v2064_v17, %v6863_v39 }
 0x560   :  { %v2155_v19 = vadd.f32 %v2140_v46, %v6828_v25  ;;  %v2156_v42 = vadd.f32 %v2141_v15, %v5810_v29  ;;  %v2157_v23 = vadd.f32 %v2142_v9, %v6884_v55  ;;  %v2158_v59 = vadd.f32 %v2143_v12, %v6885_v10 }
 0x561   :  { %v2160_v37 = vadd.f32 %v2144_v40, %v6886_v57  ;;  %v2161_v47 = vadd.f32 %v2145_v8, %v6887_v13  ;;  %v2162_v0 = vadd.f32 %v2146_v36, %v6888_v16  ;;  %v3773_v63 = vmul.f32 -1.442695, %v2159_v34  ;;  %v6889_v36 = vld [vmem:[#allocation16_spill] sm:$0xff] }
 0x562   :  { %v3769_v48 = vmul.f32 -1.442695, %v2155_v19  ;;  %v3770_v62 = vmul.f32 -1.442695, %v2156_v42  ;;  %v3771_v43 = vmul.f32 -1.442695, %v2157_v23 }
 0x563   :  { %v3772_v11 = vmul.f32 -1.442695, %v2158_v59  ;;  %5068 = vpow2.f32 %v3773_v63  ;;  %v3774_v17 = vmul.f32 -1.442695, %v2160_v37  ;;  %v3775_v46 = vmul.f32 -1.442695, %v2161_v47 }
 0x564   :  { %5070 = vpow2.f32 %v3769_v48  ;;  %v3776_v15 = vmul.f32 -1.442695, %v2162_v0  ;;  %v2212_v9 = vrot.slane %v6337_v50, 4  ;;  %v2213_v12 = vrot.slane %v6337_v50, 5  ;;  %v6890_v19 = vld [vmem:[#allocation17_spill] sm:$0xff]  ;;  %v6891_v48 = vld [vmem:[#allocation19_spill] sm:$0xff] }
 0x565   :  { %5072 = vpow2.f32 %v3770_v62  ;;  %v2214_v40 = vrot.slane %v6337_v50, 6  ;;  %v2215_v8 = vrot.slane %v6337_v50, 7  ;;  %v6892_v62 = vld [vmem:[#allocation25_spill] sm:$0xff] }
 0x566   :  { %5074 = vpow2.f32 %v3771_v43  ;;  %v2227_v34 = vadd.f32 %v2212_v9, %v6889_v36  ;;  %v2228_v42 = vadd.f32 %v2213_v12, %v6890_v19 }
 0x567   :  { %5076 = vpow2.f32 %v3772_v11  ;;  %v2229_v23 = vadd.f32 %v2214_v40, %v6891_v48  ;;  %v2230_v0 = vadd.f32 %v2215_v8, %v6892_v62  ;;  %v6893_v40 = vld [vmem:[#allocation26_spill] sm:$0xff] }
 0x568   :  { %5078 = vpow2.f32 %v3774_v17  ;;  %v3777_v59 = vmul.f32 -1.442695, %v2227_v34  ;;  %v3778_v43 = vmul.f32 -1.442695, %v2228_v42  ;;  %v2217_v42 = vrot.slane %v6337_v50, 2 }
 0x569   :  { %5080 = vpow2.f32 %v3775_v46  ;;  %v3779_v37 = vmul.f32 -1.442695, %v2229_v23  ;;  %v3780_v47 = vmul.f32 -1.442695, %v2230_v0  ;;  %v2216_v46 = vrot.slane %v6337_v50, 1 }
 0x56a   :  { %5082 = vpow2.f32 %v3776_v15  ;;  %v2231_v15 = vadd.f32 %v6337_v50, %v6893_v40 }
 0x56b   :  { %5084 = vpow2.f32 %v3777_v59  ;;  %v2218_v59 = vrot.slane %v6337_v50, 3 }
 0x56c   :  { %5086 = vpow2.f32 %v3778_v43 }
 0x56d   :  { %v5069_v63 = vpop.eup %5068  ;;  %5088 = vpow2.f32 %v3779_v37 }
 0x56e   :  { %v5071_v16 = vpop.eup %5070  ;;  %v2191_v11 = vadd.f32 1.0, %v5069_v63  ;;  %5090 = vpow2.f32 %v3780_v47  ;;  %v6894_v63 = vld [vmem:[#allocation27_spill] sm:$0xff] }
 0x56f   :  { %v5073_v17 = vpop.eup %5072  ;;  %v2187_v9 = vadd.f32 1.0, %v5071_v16 }
 0x570   :  { %v5075_v12 = vpop.eup %5074  ;;  %v2188_v19 = vadd.f32 1.0, %v5073_v17  ;;  %5092 = vrcp.f32 %v2191_v11  ;;  %v2232_v11 = vadd.f32 %v2216_v46, %v6894_v63  ;;  %v3781_v17 = vmul.f32 -1.442695, %v2231_v15 }
 0x571   :  { %v5077_v8 = vpop.eup %5076  ;;  %v2189_v34 = vadd.f32 1.0, %v5075_v12  ;;  %5094 = vrcp.f32 %v2187_v9  ;;  %v6895_v12 = vld [vmem:[#allocation28_spill] sm:$0xff] }
 0x572   :  { %v5079_v23 = vpop.eup %5078  ;;  %v2190_v0 = vadd.f32 1.0, %v5077_v8  ;;  %5096 = vrcp.f32 %v2188_v19  ;;  %v2233_v9 = vadd.f32 %v2217_v42, %v6895_v12  ;;  %v6365_v19 = vld [vmem:[%s6706_s4] ss:$0 sm:$0xff]  ;;  %v6897_v8 = vld [vmem:[#allocation29_spill] sm:$0xff]  ;;  %v3782_v15 = vmul.f32 -1.442695, %v2232_v11 }
 0x573   :  { %v5081_v16 = vpop.eup %5080  ;;  %v2192_v43 = vadd.f32 1.0, %v5079_v23  ;;  %5098 = vrcp.f32 %v2189_v34  ;;  %6896 = vst [vmem:[#allocation30_spill] sm:$0xff] %v6365_v19  ;;  %v2283_v50 = vadd.f32 %v6365_v19, %v6335_v27  ;;  %v2234_v34 = vadd.f32 %v2218_v59, %v6897_v8 }
 0x574   :  { %v5083_v37 = vpop.eup %5082  ;;  %v2193_v47 = vadd.f32 1.0, %v5081_v16  ;;  %5100 = vrcp.f32 %v2190_v0  ;;  %v3783_v16 = vmul.f32 -1.442695, %v2233_v9 }
 0x575   :  { %v2194_v40 = vadd.f32 1.0, %v5083_v37  ;;  %5102 = vrcp.f32 %v2192_v43  ;;  %v5085_v62 = vpop.eup %5084  ;;  %v2285_v43 = vrot.slane %v2283_v50, 4  ;;  %v3784_v37 = vmul.f32 -1.442695, %v2234_v34 }
 0x576   :  { %5104 = vrcp.f32 %v2193_v47  ;;  %v5087_v23 = vpop.eup %5086  ;;  %v2286_v12 = vrot.slane %v2283_v50, 5  ;;  %v2259_v63 = vadd.f32 1.0, %v5085_v62  ;;  %v2287_v13 = vrot.slane %v2283_v50, 6 }
 0x577   :  { %5106 = vrcp.f32 %v2194_v40  ;;  %v5089_v46 = vpop.eup %5088  ;;  %v2288_v59 = vrot.slane %v2283_v50, 7  ;;  %v2289_v40 = vrot.slane %v2283_v50, 1  ;;  %v2290_v9 = vrot.slane %v2283_v50, 2 }
 0x578   :  { %5108 = vpow2.f32 %v3781_v17  ;;  %v5091_v0 = vpop.eup %5090  ;;  %v2291_v10 = vrot.slane %v2283_v50, 3 }
 0x579   :  { %5110 = vpow2.f32 %v3782_v15 }
 0x57a   :  { %v5093_v42 = vpop.eup %5092  ;;  %5112 = vpow2.f32 %v3783_v16  ;;  %v2260_v16 = vadd.f32 1.0, %v5087_v23 }
 0x57b   :  { %v5095_v47 = vpop.eup %5094  ;;  %v2304_v48 = vmul.f32 %v5093_v42, %v2283_v50  ;;  %5114 = vpow2.f32 %v3784_v37  ;;  %v6898_v37 = vld [vmem:[#allocation31_spill] sm:$0xff]  ;;  %v2262_v50 = vadd.f32 1.0, %v5091_v0 }
 0x57c   :  { %v5097_v36 = vpop.eup %5096  ;;  %v2300_v39 = vmul.f32 %v5095_v47, %v2285_v43  ;;  %5116 = vrcp.f32 %v2259_v63 }
 0x57d   :  { %v5099_v27 = vpop.eup %5098  ;;  %v2301_v8 = vmul.f32 %v5097_v36, %v2286_v12  ;;  %v2312_v36 = vadd.f32 %v2304_v48, %v5908_v4  ;;  %v6900_v48 = vld [vmem:[#allocation34_spill] sm:$0xff] }
 0x57e   :  { %v5101_v17 = vpop.eup %5100  ;;  %v2302_v11 = vmul.f32 %v5099_v27, %v2287_v13  ;;  %v2308_v19 = vadd.f32 %v2300_v39, %v5894_v14  ;;  %v2261_v27 = vadd.f32 1.0, %v5089_v46 }
 0x57f   :  { %v5103_v34 = vpop.eup %5102  ;;  %v2303_v62 = vmul.f32 %v5101_v17, %v2288_v59  ;;  %v2309_v42 = vadd.f32 %v2301_v8, %v5890_v31  ;;  %v6899_v59 = vld [vmem:[#allocation33_spill] sm:$0xff] }
 0x580   :  { %v5105_v55 = vpop.eup %5104  ;;  %v2305_v43 = vmul.f32 %v5103_v34, %v2289_v40  ;;  %v2310_v15 = vadd.f32 %v2302_v11, %v5902_v56  ;;  %5118 = vtanh.f32 %v2308_v19 }
 0x581   :  { %v5107_v12 = vpop.eup %5106  ;;  %v2306_v13 = vmul.f32 %v5105_v55, %v2290_v9  ;;  %v2311_v47 = vadd.f32 %v2303_v62, %v6898_v37  ;;  %5120 = vtanh.f32 %v2309_v42  ;;  %v6901_v55 = vld [vmem:[#allocation35_spill] sm:$0xff] }
 0x582   :  { %v5109_v39 = vpop.eup %5108  ;;  %v2307_v63 = vmul.f32 %v5107_v12, %v2291_v10  ;;  %5122 = vtanh.f32 %v2310_v15  ;;  %v2313_v40 = vadd.f32 %v2305_v43, %v6899_v59 }
 0x583   :  { %5124 = vtanh.f32 %v2311_v47  ;;  %v2263_v8 = vadd.f32 1.0, %v5109_v39  ;;  %v5111_v17 = vpop.eup %5110  ;;  %v2314_v19 = vadd.f32 %v2306_v13, %v6900_v48 }
 0x584   :  { %5126 = vtanh.f32 %v2312_v36  ;;  %v5113_v23 = vpop.eup %5112  ;;  %v2315_v11 = vadd.f32 %v2307_v63, %v6901_v55  ;;  %v2264_v34 = vadd.f32 1.0, %v5111_v17 }
 0x585   :  { %5128 = vrcp.f32 %v2260_v16  ;;  %v5115_v9 = vpop.eup %5114  ;;  %v2265_v43 = vadd.f32 1.0, %v5113_v23 }
 0x586   :  { %5130 = vrcp.f32 %v2261_v27  ;;  %v5117_v46 = vpop.eup %5116  ;;  %v2266_v12 = vadd.f32 1.0, %v5115_v9 }
 0x587   :  { %5132 = vrcp.f32 %v2262_v50 }
 0x588   :  { %5134 = vrcp.f32 %v2263_v8 }
 0x589   :  { %5136 = vtanh.f32 %v2313_v40 }
 0x58a   :  { %v5119_v10 = vpop.eup %5118  ;;  %5138 = vtanh.f32 %v2314_v19 }
 0x58b   :  { %v5121_v0 = vpop.eup %5120  ;;  %5140 = vtanh.f32 %v2315_v11  ;;  %v2332_v62 = vrot.slane %v5119_v10, 1 }
 0x58c   :  { %v5123_v42 = vpop.eup %5122  ;;  %v2333_v15 = vrot.slane %v5121_v0, 1  ;;  %5142 = vrcp.f32 %v2264_v34 }
 0x58d   :  { %v5125_v36 = vpop.eup %5124  ;;  %v2334_v16 = vrot.slane %v5123_v42, 1  ;;  %v2348_v13 = vsub.f32 %v6266_v52, %v2332_v62  ;;  %5144 = vrcp.f32 %v2265_v43 }
 0x58e   :  { %v5127_v47 = vpop.eup %5126  ;;  %v2335_v39 = vrot.slane %v5125_v36, 1  ;;  %v2349_v27 = vsub.f32 %v6268_v45, %v2333_v15  ;;  %5146 = vrcp.f32 %v2266_v12 }
 0x58f   :  { %v5129_v63 = vpop.eup %5128  ;;  %v2336_v50 = vrot.slane %v5127_v47, 1  ;;  %v2350_v8 = vsub.f32 %v6270_v54, %v2334_v16  ;;  %v2364_v40 = vrot.slane %v2348_v13, 7 }
 0x590   :  { %v5131_v17 = vpop.eup %5130  ;;  %v2351_v19 = vsub.f32 %v6274_v3, %v2335_v39  ;;  %v2365_v23 = vrot.slane %v2349_v27, 7 }
 0x591   :  { %v5133_v11 = vpop.eup %5132  ;;  %v2352_v9 = vsub.f32 %v6278_v5, %v2336_v50  ;;  %v2366_v52 = vrot.slane %v2350_v8, 7  ;;  %v2380_v62 = vmul.f32 %v5117_v46, %v2364_v40 }
 0x592   :  { %v5135_v55 = vpop.eup %5134  ;;  %v2367_v48 = vrot.slane %v2351_v19, 7  ;;  %v2381_v45 = vmul.f32 %v5129_v63, %v2365_v23 }
 0x593   :  { %v5137_v15 = vpop.eup %5136  ;;  %v2368_v34 = vrot.slane %v2352_v9, 7  ;;  %v2382_v59 = vmul.f32 %v5131_v17, %v2366_v52  ;;  %v6383_v4 = vadd.f32 %v5119_v10, %v2380_v62 }
 0x594   :  { %v5139_v54 = vpop.eup %5138  ;;  %v2337_v16 = vrot.slane %v5137_v15, 1  ;;  %v2383_v43 = vmul.f32 %v5133_v11, %v2367_v48  ;;  %v6385_v13 = vadd.f32 %v5121_v0, %v2381_v45 }
 0x595   :  { %v5141_v3 = vpop.eup %5140  ;;  %v2338_v39 = vrot.slane %v5139_v54, 1  ;;  %v2384_v12 = vmul.f32 %v5135_v55, %v2368_v34  ;;  %v6387_v27 = vadd.f32 %v5123_v42, %v2382_v59  ;;  %v2404_v5 = vrot.slane %v6383_v4, 4 }
 0x596   :  { %v2339_v46 = vrot.slane %v5141_v3, 1  ;;  %v2353_v63 = vsub.f32 %v6287_v2, %v2337_v16  ;;  %v6391_v50 = vadd.f32 %v5125_v36, %v2383_v43  ;;  %v2405_v10 = vrot.slane %v6385_v13, 3  ;;  %v5143_v17 = vpop.eup %5142 }
 0x597   :  { %v2354_v8 = vsub.f32 %v6289_v1, %v2338_v39  ;;  %v6395_v40 = vadd.f32 %v5127_v47, %v2384_v12  ;;  %v2407_v48 = vrot.slane %v6387_v27, 2  ;;  %v5145_v36 = vpop.eup %5144 }
 0x598   :  { %v2355_v0 = vsub.f32 %v6292_v20, %v2339_v46  ;;  %v2369_v55 = vrot.slane %v2353_v63, 7  ;;  %v2406_v59 = vsel %vm714_vm2, %v2405_v10, %v2404_v5  ;;  %v2409_v42 = vrot.slane %v6391_v50, 1  ;;  %v5147_v47 = vpop.eup %5146  ;;  %v6904_v46 = vld [vmem:[#allocation11_spill] sm:$0xff]  ;;  %v6905_v63 = vld [vmem:[#allocation14_spill] sm:$0xff] }
 0x599   :  { %v2370_v19 = vrot.slane %v2354_v8, 7  ;;  %v2408_v2 = vsel %vm717_vm3, %v2407_v48, %v2406_v59  ;;  %v6906_v10 = vld [vmem:[#allocation2_spill] sm:$0xff] }
 0x59a   :  { %v2371_v23 = vrot.slane %v2355_v0, 7  ;;  %v2385_v11 = vmul.f32 %v5143_v17, %v2369_v55  ;;  %v2410_v1 = vsel %vm720_vm4, %v2409_v42, %v2408_v2 }
 0x59b   :  { %v2386_v9 = vmul.f32 %v5145_v36, %v2370_v19  ;;  %v2411_v45 = vsel %vm723_vm5, %v6395_v40, %v2410_v1 }
 0x59c   :  { %v2387_v52 = vmul.f32 %v5147_v47, %v2371_v23  ;;  %v6403_v62 = vadd.f32 %v5137_v15, %v2385_v11 }
 0x59d   :  { %v6405_v20 = vadd.f32 %v5139_v54, %v2386_v9  ;;  %v6902_v54 = vld [vmem:[#allocation13_spill] sm:$0xff]  ;;  %v6907_v9 = vld [vmem:[#allocation18_spill] sm:$0xff] }
 0x59e   :  { %v6409_v34 = vadd.f32 %v5141_v3, %v2387_v52  ;;  %v2412_v16 = vrot.slane %v6403_v62, 7  ;;  %v6903_v3 = vld [vmem:[#allocation9_spill] sm:$0xff] }
 0x59f   :  { %v2414_v43 = vrot.slane %v6405_v20, 6 }
 0x5a0   :  { %v2413_v39 = vsel %vm726_vm6, %v2412_v16, %v2411_v45  ;;  %v2416_v12 = vrot.slane %v6409_v34, 5  ;;  %v6908_v45 = vld [vmem:[#allocation20_spill] sm:$0xff] }
 0x5a1   :  { %v2415_v5 = vsel %vm729_vm7, %v2414_v43, %v2413_v39  ;;  %v6909_v43 = vld [vmem:[#allocation21_spill] sm:$0xff] }
 0x5a2   :  { %v2417_v15 = vsel %vm732_vm8, %v2416_v12, %v2415_v5  ;;  %v6910_v12 = vld [vmem:[#allocation23_spill] sm:$0xff] }
 0x5a3   :  { %2484 = vmatmul.mubr.f32.vlgmr.msra.gmra.mrb[26].mxu0 %v2417_v15  ;;  %4209 = vmatmul.mubr.f32.vlgmr.msra.gmra.mrb[18].mxu1 %v2417_v15  ;;  %v6911_v15 = vld [vmem:[#allocation24_spill] sm:$0xff] }
 0x5a4   :  { %4636 = vmatpush1.bf16.msra.mxu0 %v5473_v21  ;;  %4667 = vmatpush3.bf16.msra.mxu1 %v5555_v49 }
 0x5a5   :  { %4638 = vmatprep.subr.bf16.mxu0 %v5476_v22  ;;  %4668 = vmatprep.subr.bf16.mxu1 %v6819_v53 }
 0x5a6   :  { %2904 = vmatprep.mubr.f32.mxu0 %v6820_v61  ;;  %4243 = vmatprep.mubr.msk.f32.mxu1 %vm5393_vm1, %v6820_v61 }
 0x5a8   :  { %4640 = vmatpush1.bf16.msra.mxu0 %v5502_v30  ;;  %4670 = vmatpush3.bf16.msra.mxu1 %v5589_v60 }
 0x5a9   :  { %4642 = vmatprep.subr.bf16.mxu0 %v5508_v33  ;;  %4671 = vmatprep.subr.bf16.mxu1 %v6819_v53 }
 0x5ac   :  { %4644 = vmatpush1.bf16.msra.mxu0 %v5531_v41  ;;  %4673 = vmatpush3.bf16.msra.mxu1 %v5623_v7 }
 0x5ad   :  { %4646 = vmatprep.subr.bf16.mxu0 %v5540_v44  ;;  %4674 = vmatprep.subr.bf16.mxu1 %v6819_v53 }
 0x5b0   :  { %4648 = vmatpush1.bf16.msra.mxu0 %v5562_v51  ;;  %4676 = vmatpush3.bf16.msra.mxu1 %v5657_v18 }
 0x5b1   :  { %4650 = vmatprep.subr.bf16.mxu0 %v6833_v6  ;;  %4677 = vmatprep.subr.bf16.mxu1 %v6819_v53 }
 0x5b4   :  { %4652 = vmatpush1.bf16.msra.mxu0 %v6834_v38  ;;  %4679 = vmatpush3.bf16.msra.mxu1 %v6835_v26 }
 0x5b5   :  { %4654 = vmatprep.subr.bf16.mxu0 %v6836_v58  ;;  %4680 = vmatprep.subr.bf16.mxu1 %v6819_v53 }
 0x5b8   :  { %4656 = vmatpush1.bf16.msra.mxu0 %v6837_v32  ;;  %4682 = vmatpush3.bf16.msra.mxu1 %v6838_v28 }
 0x5b9   :  { %4658 = vmatprep.subr.bf16.mxu0 %v6856_v35  ;;  %4683 = vmatprep.subr.bf16.mxu1 %v6819_v53 }
 0x5bc   :  { %4660 = vmatpush1.bf16.msra.mxu0 %v6857_v24  ;;  %4685 = vmatpush3.bf16.msra.mxu1 %v6902_v54 }
 0x5bd   :  { %4662 = vmatprep.subr.bf16.mxu0 %v6903_v3  ;;  %4686 = vmatprep.subr.bf16.mxu1 %v6819_v53 }
 0x5c0   :  { %4664 = vmatpush1.bf16.msra.mxu0 %v6904_v46  ;;  %4688 = vmatpush3.bf16.msra.mxu1 %v6905_v63 }
 0x5c1   :  { %4690 = vmatprep.subr.bf16.mxu0 %v6906_v10  ;;  %4721 = vmatprep.subr.bf16.mxu1 %v6819_v53 }
 0x676   :  { %v2485_v8 = vpop.f32.mrb[26].mxu0  ;;  %v6452_v48 = vpop.f32.mrb[18].mxu1 }
 0x677   :  { %v2561_v0 = vrot.slane %v2485_v8, 3  ;;  %v2562_v55 = vrot.slane %v2485_v8, 4  ;;  %v2563_v59 = vrot.slane %v2485_v8, 5  ;;  %v2564_v42 = vrot.slane %v2485_v8, 6  ;;  %v6454_v17 = vpop.f32.mrb[27].mxu0  ;;  %v4210_v19 = vpop.f32.mrb[19].mxu1 }
 0x678   :  { %v2565_v2 = vrot.slane %v2485_v8, 7  ;;  %v2566_v36 = vrot.slane %v2485_v8, 1  ;;  %v2567_v23 = vrot.slane %v2485_v8, 2  ;;  %v2581_v11 = vadd.f32 %v2485_v8, %v6886_v57 }
 0x679   :  { %v2576_v1 = vadd.f32 %v2561_v0, %v6828_v25  ;;  %v2577_v47 = vadd.f32 %v2562_v55, %v5810_v29  ;;  %v2578_v52 = vadd.f32 %v2563_v59, %v6907_v9  ;;  %v2579_v16 = vadd.f32 %v2564_v42, %v6908_v45 }
 0x67a   :  { %v2580_v39 = vadd.f32 %v2565_v2, %v6909_v43  ;;  %v2582_v5 = vadd.f32 %v2566_v36, %v6910_v12  ;;  %v2583_v10 = vadd.f32 %v2567_v23, %v6911_v15  ;;  %v3790_v19 = vmul.f32 -1.442695, %v2581_v11  ;;  %v6912_v23 = vld [vmem:[#allocation16_spill] sm:$0xff] }
 0x67b   :  { %v3785_v63 = vmul.f32 -1.442695, %v2576_v1  ;;  %v3786_v46 = vmul.f32 -1.442695, %v2577_v47  ;;  %v3787_v3 = vmul.f32 -1.442695, %v2578_v52 }
 0x67c   :  { %v3788_v54 = vmul.f32 -1.442695, %v2579_v16  ;;  %5148 = vpow2.f32 %v3790_v19  ;;  %v3789_v8 = vmul.f32 -1.442695, %v2580_v39  ;;  %v3791_v0 = vmul.f32 -1.442695, %v2582_v5 }
 0x67d   :  { %5150 = vpow2.f32 %v3785_v63  ;;  %v3792_v55 = vmul.f32 -1.442695, %v2583_v10  ;;  %v2633_v59 = vrot.slane %v6454_v17, 3  ;;  %v2634_v42 = vrot.slane %v6454_v17, 4  ;;  %v6913_v1 = vld [vmem:[#allocation17_spill] sm:$0xff]  ;;  %v6914_v63 = vld [vmem:[#allocation19_spill] sm:$0xff] }
 0x67e   :  { %5152 = vpow2.f32 %v3786_v46  ;;  %v2635_v2 = vrot.slane %v6454_v17, 5  ;;  %v2636_v36 = vrot.slane %v6454_v17, 6  ;;  %v6915_v46 = vld [vmem:[#allocation25_spill] sm:$0xff]  ;;  %v2637_v19 = vrot.slane %v6454_v17, 7 }
 0x67f   :  { %5154 = vpow2.f32 %v3787_v3  ;;  %v2648_v11 = vadd.f32 %v2633_v59, %v6912_v23  ;;  %v2649_v47 = vadd.f32 %v2634_v42, %v6913_v1 }
 0x680   :  { %5156 = vpow2.f32 %v3788_v54  ;;  %v2650_v52 = vadd.f32 %v2635_v2, %v6914_v63  ;;  %v2651_v16 = vadd.f32 %v2636_v36, %v6915_v46  ;;  %v6916_v36 = vld [vmem:[#allocation26_spill] sm:$0xff]  ;;  %v6920_v63 = vld [vmem:[#allocation29_spill] sm:$0xff] }
 0x681   :  { %5158 = vpow2.f32 %v3789_v8  ;;  %v3793_v39 = vmul.f32 -1.442695, %v2648_v11  ;;  %v3794_v3 = vmul.f32 -1.442695, %v2649_v47 }
 0x682   :  { %5160 = vpow2.f32 %v3791_v0  ;;  %v3795_v5 = vmul.f32 -1.442695, %v2650_v52  ;;  %v3796_v10 = vmul.f32 -1.442695, %v2651_v16  ;;  %v2638_v52 = vrot.slane %v6454_v17, 1 }
 0x683   :  { %5162 = vpow2.f32 %v3792_v55  ;;  %v2652_v55 = vadd.f32 %v2637_v19, %v6916_v36 }
 0x684   :  { %5164 = vpow2.f32 %v3793_v39 }
 0x685   :  { %5166 = vpow2.f32 %v3794_v3  ;;  %v2639_v3 = vrot.slane %v6454_v17, 2  ;;  %v3797_v19 = vmul.f32 -1.442695, %v2652_v55 }
 0x686   :  { %v5149_v15 = vpop.eup %5148  ;;  %5168 = vpow2.f32 %v3795_v5 }
 0x687   :  { %v5151_v54 = vpop.eup %5150  ;;  %v2613_v8 = vadd.f32 1.0, %v5149_v15  ;;  %5170 = vpow2.f32 %v3796_v10  ;;  %v2655_v1 = vadd.f32 %v2639_v3, %v6920_v63 }
 0x688   :  { %v5153_v59 = vpop.eup %5152  ;;  %v2608_v42 = vadd.f32 1.0, %v5151_v54 }
 0x689   :  { %v5155_v2 = vpop.eup %5154  ;;  %v2609_v0 = vadd.f32 1.0, %v5153_v59  ;;  %5172 = vrcp.f32 %v2613_v8  ;;  %v6917_v59 = vld [vmem:[#allocation27_spill] sm:$0xff] }
 0x68a   :  { %v5157_v11 = vpop.eup %5156  ;;  %v2610_v47 = vadd.f32 1.0, %v5155_v2  ;;  %5174 = vrcp.f32 %v2608_v42  ;;  %v2653_v8 = vadd.f32 %v6454_v17, %v6917_v59  ;;  %v6918_v42 = vld [vmem:[#allocation28_spill] sm:$0xff] }
 0x68b   :  { %v5159_v16 = vpop.eup %5158  ;;  %v2611_v39 = vadd.f32 1.0, %v5157_v11  ;;  %5176 = vrcp.f32 %v2609_v0  ;;  %v2654_v2 = vadd.f32 %v2638_v52, %v6918_v42  ;;  %v6919_v0 = vld [vmem:[#allocation30_spill] sm:$0xff] }
 0x68c   :  { %v5161_v15 = vpop.eup %5160  ;;  %v2612_v5 = vadd.f32 1.0, %v5159_v16  ;;  %5178 = vrcp.f32 %v2610_v47  ;;  %v2704_v11 = vadd.f32 %v6919_v0, %v6452_v48 }
 0x68d   :  { %v5163_v54 = vpop.eup %5162  ;;  %v2614_v10 = vadd.f32 1.0, %v5161_v15  ;;  %5180 = vrcp.f32 %v2611_v39  ;;  %v3798_v39 = vmul.f32 -1.442695, %v2653_v8  ;;  %v3799_v23 = vmul.f32 -1.442695, %v2654_v2 }
 0x68e   :  { %v2615_v36 = vadd.f32 1.0, %v5163_v54  ;;  %5182 = vrcp.f32 %v2612_v5  ;;  %v5165_v46 = vpop.eup %5164  ;;  %v2706_v55 = vrot.slane %v2704_v11, 3  ;;  %v3800_v54 = vmul.f32 -1.442695, %v2655_v1 }
 0x68f   :  { %5184 = vrcp.f32 %v2614_v10  ;;  %v5167_v16 = vpop.eup %5166  ;;  %v2707_v59 = vrot.slane %v2704_v11, 4  ;;  %v2680_v52 = vadd.f32 1.0, %v5165_v46  ;;  %v2708_v57 = vrot.slane %v2704_v11, 5 }
 0x690   :  { %5186 = vrcp.f32 %v2615_v36  ;;  %v5169_v47 = vpop.eup %5168  ;;  %v2709_v3 = vrot.slane %v2704_v11, 6  ;;  %v2710_v8 = vrot.slane %v2704_v11, 7  ;;  %v2711_v1 = vrot.slane %v2704_v11, 1 }
 0x691   :  { %5188 = vpow2.f32 %v3797_v19  ;;  %v5171_v15 = vpop.eup %5170  ;;  %v2712_v9 = vrot.slane %v2704_v11, 2 }
 0x692   :  { %5190 = vpow2.f32 %v3798_v39 }
 0x693   :  { %v5173_v17 = vpop.eup %5172  ;;  %5192 = vpow2.f32 %v3799_v23  ;;  %v2681_v23 = vadd.f32 1.0, %v5167_v16  ;;  %v6923_v16 = vld [vmem:[#allocation34_spill] sm:$0xff] }
 0x694   :  { %v5175_v5 = vpop.eup %5174  ;;  %v2726_v42 = vmul.f32 %v5173_v17, %v2704_v11  ;;  %5194 = vpow2.f32 %v3800_v54 }
 0x695   :  { %v5177_v10 = vpop.eup %5176  ;;  %v2721_v43 = vmul.f32 %v5175_v5, %v2706_v55  ;;  %5196 = vrcp.f32 %v2680_v52  ;;  %v6921_v52 = vld [vmem:[#allocation32_spill] sm:$0xff] }
 0x696   :  { %v5179_v48 = vpop.eup %5178  ;;  %v2722_v0 = vmul.f32 %v5177_v10, %v2707_v59 }
 0x697   :  { %v5181_v36 = vpop.eup %5180  ;;  %v2723_v19 = vmul.f32 %v5179_v48, %v2708_v57  ;;  %v2729_v2 = vadd.f32 %v2721_v43, %v5894_v14  ;;  %v2682_v43 = vadd.f32 1.0, %v5169_v47 }
 0x698   :  { %v5183_v63 = vpop.eup %5182  ;;  %v2724_v45 = vmul.f32 %v5181_v36, %v2709_v3  ;;  %v2730_v46 = vadd.f32 %v2722_v0, %v5890_v31  ;;  %v2683_v3 = vadd.f32 1.0, %v5171_v15 }
 0x699   :  { %v5185_v17 = vpop.eup %5184  ;;  %v2725_v55 = vmul.f32 %v5183_v63, %v2710_v8  ;;  %v2731_v39 = vadd.f32 %v2723_v19, %v5902_v56  ;;  %5198 = vtanh.f32 %v2729_v2  ;;  %v6922_v63 = vld [vmem:[#allocation33_spill] sm:$0xff] }
 0x69a   :  { %v5187_v59 = vpop.eup %5186  ;;  %v2727_v5 = vmul.f32 %v5185_v17, %v2711_v1  ;;  %v2732_v57 = vadd.f32 %v2724_v45, %v6898_v37  ;;  %5200 = vtanh.f32 %v2730_v46  ;;  %v2734_v11 = vadd.f32 %v2726_v42, %v6922_v63  ;;  %v6924_v45 = vld [vmem:[#allocation35_spill] sm:$0xff] }
 0x69b   :  { %v5189_v54 = vpop.eup %5188  ;;  %v2728_v10 = vmul.f32 %v5187_v59, %v2712_v9  ;;  %v2733_v48 = vadd.f32 %v2725_v55, %v6921_v52  ;;  %5202 = vtanh.f32 %v2731_v39 }
 0x69c   :  { %5204 = vtanh.f32 %v2732_v57  ;;  %v2684_v0 = vadd.f32 1.0, %v5189_v54  ;;  %v5191_v36 = vpop.eup %5190  ;;  %v2735_v19 = vadd.f32 %v2727_v5, %v6923_v16 }
 0x69d   :  { %5206 = vtanh.f32 %v2733_v48  ;;  %v5193_v8 = vpop.eup %5192  ;;  %v2736_v2 = vadd.f32 %v2728_v10, %v6924_v45  ;;  %v2685_v46 = vadd.f32 1.0, %v5191_v36 }
 0x69e   :  { %5208 = vrcp.f32 %v2681_v23  ;;  %v5195_v47 = vpop.eup %5194  ;;  %v2686_v42 = vadd.f32 1.0, %v5193_v8 }
 0x69f   :  { %5210 = vrcp.f32 %v2682_v43  ;;  %v5197_v9 = vpop.eup %5196  ;;  %v2687_v23 = vadd.f32 1.0, %v5195_v47 }
 0x6a0   :  { %5212 = vrcp.f32 %v2683_v3 }
 0x6a1   :  { %5214 = vrcp.f32 %v2684_v0 }
 0x6a2   :  { %5216 = vtanh.f32 %v2734_v11 }
 0x6a3   :  { %v5199_v1 = vpop.eup %5198  ;;  %5218 = vtanh.f32 %v2735_v19 }
 0x6a4   :  { %v5201_v15 = vpop.eup %5200  ;;  %5220 = vtanh.f32 %v2736_v2  ;;  %v2753_v17 = vrot.slane %v5199_v1, 1 }
 0x6a5   :  { %v5203_v55 = vpop.eup %5202  ;;  %v2754_v39 = vrot.slane %v5201_v15, 1  ;;  %5222 = vrcp.f32 %v2685_v46 }
 0x6a6   :  { %v5205_v59 = vpop.eup %5204  ;;  %v2755_v5 = vrot.slane %v5203_v55, 1  ;;  %v2769_v57 = vsub.f32 %v6383_v4, %v2753_v17  ;;  %5224 = vrcp.f32 %v2686_v42 }
 0x6a7   :  { %v5207_v54 = vpop.eup %5206  ;;  %v2756_v43 = vrot.slane %v5205_v59, 1  ;;  %v2770_v10 = vsub.f32 %v6385_v13, %v2754_v39  ;;  %5226 = vrcp.f32 %v2687_v23 }
 0x6a8   :  { %v5209_v48 = vpop.eup %5208  ;;  %v2757_v3 = vrot.slane %v5207_v54, 1  ;;  %v2771_v0 = vsub.f32 %v6387_v27, %v2755_v5  ;;  %v2785_v11 = vrot.slane %v2769_v57, 7 }
 0x6a9   :  { %v5211_v36 = vpop.eup %5210  ;;  %v2772_v19 = vsub.f32 %v6391_v50, %v2756_v43  ;;  %v2786_v8 = vrot.slane %v2770_v10, 7 }
 0x6aa   :  { %v5213_v2 = vpop.eup %5212  ;;  %v2773_v47 = vsub.f32 %v6395_v40, %v2757_v3  ;;  %v2787_v4 = vrot.slane %v2771_v0, 7  ;;  %v2801_v17 = vmul.f32 %v5197_v9, %v2785_v11 }
 0x6ab   :  { %v5215_v45 = vpop.eup %5214  ;;  %v2788_v16 = vrot.slane %v2772_v19, 7  ;;  %v2802_v13 = vmul.f32 %v5209_v48, %v2786_v8 }
 0x6ac   :  { %v5217_v39 = vpop.eup %5216  ;;  %v2789_v46 = vrot.slane %v2773_v47, 7  ;;  %v2803_v63 = vmul.f32 %v5211_v36, %v2787_v4  ;;  %v6495_v52 = vadd.f32 %v5199_v1, %v2801_v17 }
 0x6ad   :  { %v5219_v27 = vpop.eup %5218  ;;  %v2758_v5 = vrot.slane %v5217_v39, 1  ;;  %v2804_v42 = vmul.f32 %v5213_v2, %v2788_v16  ;;  %v6497_v57 = vadd.f32 %v5201_v15, %v2802_v13 }
 0x6ae   :  { %v5221_v50 = vpop.eup %5220  ;;  %v2759_v43 = vrot.slane %v5219_v27, 1  ;;  %v2805_v23 = vmul.f32 %v5215_v45, %v2789_v46  ;;  %v6499_v10 = vadd.f32 %v5203_v55, %v2803_v63  ;;  %v2825_v40 = vrot.slane %v6495_v52, 5 }
 0x6af   :  { %v2760_v9 = vrot.slane %v5221_v50, 1  ;;  %v2774_v48 = vsub.f32 %v6403_v62, %v2758_v5  ;;  %v6503_v3 = vadd.f32 %v5205_v59, %v2804_v42  ;;  %v2826_v1 = vrot.slane %v6497_v57, 4  ;;  %v5223_v36 = vpop.eup %5222 }
 0x6b0   :  { %v2775_v0 = vsub.f32 %v6405_v20, %v2759_v43  ;;  %v6507_v11 = vadd.f32 %v5207_v54, %v2805_v23  ;;  %v2828_v16 = vrot.slane %v6499_v10, 3  ;;  %v5225_v8 = vpop.eup %5224 }
 0x6b1   :  { %v2776_v15 = vsub.f32 %v6409_v34, %v2760_v9  ;;  %v2790_v45 = vrot.slane %v2774_v48, 7  ;;  %v2827_v63 = vsel %vm714_vm2, %v2826_v1, %v2825_v40  ;;  %v2830_v55 = vrot.slane %v6503_v3, 2  ;;  %v5227_v47 = vpop.eup %5226  ;;  %v6932_v48 = vld [vmem:[#allocation22_spill] sm:$0xff] }
 0x6b2   :  { %v2791_v19 = vrot.slane %v2775_v0, 7  ;;  %v2829_v62 = vsel %vm717_vm3, %v2828_v16, %v2827_v63  ;;  %v2832_v59 = vrot.slane %v6507_v11, 1  ;;  %v6933_v0 = vld [vmem:[#allocation24_spill] sm:$0xff] }
 0x6b3   :  { %v2792_v2 = vrot.slane %v2776_v15, 7  ;;  %v2806_v20 = vmul.f32 %v5223_v36, %v2790_v45  ;;  %v2831_v54 = vsel %vm720_vm4, %v2830_v55, %v2829_v62 }
 0x6b4   :  { %v2807_v4 = vmul.f32 %v5225_v8, %v2791_v19  ;;  %v2833_v34 = vsel %vm723_vm5, %v2832_v59, %v2831_v54 }
 0x6b5   :  { %v2808_v17 = vmul.f32 %v5227_v47, %v2792_v2  ;;  %v6517_v13 = vadd.f32 %v5217_v39, %v2806_v20  ;;  %v6934_v47 = vld [vmem:[#allocation16_spill] sm:$0xff] }
 0x6b6   :  { %v6519_v46 = vadd.f32 %v5219_v27, %v2807_v4  ;;  %v6931_v27 = vld [vmem:[#allocation21_spill] sm:$0xff] }
 0x6b7   :  { %v6521_v5 = vadd.f32 %v5221_v50, %v2808_v17  ;;  %v2834_v42 = vsel %vm726_vm6, %v6517_v13, %v2833_v34  ;;  %v6935_v34 = vld [vmem:[#allocation17_spill] sm:$0xff] }
 0x6b8   :  { %v2835_v43 = vrot.slane %v6519_v46, 7 }
 0x6b9   :  { %v2837_v23 = vrot.slane %v6521_v5, 6 }
 0x6ba   :  { %v2836_v40 = vsel %vm729_vm7, %v2835_v43, %v2834_v42  ;;  %v6936_v42 = vld [vmem:[#allocation19_spill] sm:$0xff] }
 0x6bb   :  { %v2838_v9 = vsel %vm732_vm8, %v2837_v23, %v2836_v40  ;;  %v6937_v23 = vld [vmem:[#allocation25_spill] sm:$0xff] }
 0x6bc   :  { %2905 = vmatmul.mubr.f32.vlgmr.msra.gmra.mrb[28].mxu0 %v2838_v9  ;;  %4244 = vmatmul.mubr.f32.vlgmr.msra.gmra.mrb[20].mxu1 %v2838_v9 }
 0x6bd   :  { %4692 = vmatpush1.bf16.msra.mxu0 %v5473_v21  ;;  %4723 = vmatpush3.bf16.msra.mxu1 %v5555_v49  ;;  %v6925_v21 = vld [vmem:[#allocation13_spill] sm:$0xff] }
 0x6be   :  { %4694 = vmatprep.subr.bf16.mxu0 %v5476_v22  ;;  %4724 = vmatprep.subr.bf16.mxu1 %v6819_v53  ;;  %v6926_v22 = vld [vmem:[#allocation9_spill] sm:$0xff] }
 0x6bf   :  { %3325 = vmatprep.mubr.f32.mxu0 %v6820_v61  ;;  %4278 = vmatprep.mubr.msk.f32.mxu1 %vm5393_vm1, %v6820_v61 }
 0x6c1   :  { %4696 = vmatpush1.bf16.msra.mxu0 %v5502_v30  ;;  %4726 = vmatpush3.bf16.msra.mxu1 %v5589_v60  ;;  %v6927_v30 = vld [vmem:[#allocation11_spill] sm:$0xff] }
 0x6c2   :  { %4698 = vmatprep.subr.bf16.mxu0 %v5508_v33  ;;  %4727 = vmatprep.subr.bf16.mxu1 %v6819_v53  ;;  %v6928_v33 = vld [vmem:[#allocation14_spill] sm:$0xff] }
 0x6c5   :  { %4700 = vmatpush1.bf16.msra.mxu0 %v5531_v41  ;;  %4729 = vmatpush3.bf16.msra.mxu1 %v5623_v7 }
 0x6c6   :  { %4702 = vmatprep.subr.bf16.mxu0 %v5540_v44  ;;  %4730 = vmatprep.subr.bf16.mxu1 %v6819_v53 }
 0x6c9   :  { %4704 = vmatpush1.bf16.msra.mxu0 %v5562_v51  ;;  %4732 = vmatpush3.bf16.msra.mxu1 %v5657_v18 }
 0x6ca   :  { %4706 = vmatprep.subr.bf16.mxu0 %v6833_v6  ;;  %4733 = vmatprep.subr.bf16.mxu1 %v6819_v53 }
 0x6cd   :  { %4708 = vmatpush1.bf16.msra.mxu0 %v6834_v38  ;;  %4735 = vmatpush3.bf16.msra.mxu1 %v6835_v26 }
 0x6ce   :  { %4710 = vmatprep.subr.bf16.mxu0 %v6836_v58  ;;  %4736 = vmatprep.subr.bf16.mxu1 %v6819_v53 }
 0x6d1   :  { %4712 = vmatpush1.bf16.msra.mxu0 %v6837_v32  ;;  %4738 = vmatpush3.bf16.msra.mxu1 %v6838_v28  ;;  %v6929_v28 = vld [vmem:[#allocation18_spill] sm:$0xff] }
 0x6d2   :  { %4714 = vmatprep.subr.bf16.mxu0 %v6856_v35  ;;  %4739 = vmatprep.subr.bf16.mxu1 %v6819_v53 }
 0x6d5   :  { %4716 = vmatpush1.bf16.msra.mxu0 %v6857_v24  ;;  %4741 = vmatpush3.bf16.msra.mxu1 %v6925_v21  ;;  %v6930_v24 = vld [vmem:[#allocation20_spill] sm:$0xff] }
 0x6d6   :  { %4718 = vmatprep.subr.bf16.mxu0 %v6926_v22  ;;  %4742 = vmatprep.subr.bf16.mxu1 %v6819_v53 }
 0x6d9   :  { %4720 = vmatpush1.bf16.msra.mxu0 %v6927_v30  ;;  %4744 = vmatpush3.bf16.msra.mxu1 %v6928_v33 }
 0x78f   :  { %v2906_v41 = vpop.f32.mrb[28].mxu0  ;;  %v6562_v44 = vpop.f32.mrb[20].mxu1 }
 0x790   :  { %v2982_v49 = vrot.slane %v2906_v41, 2  ;;  %v2983_v51 = vrot.slane %v2906_v41, 3  ;;  %v2984_v60 = vrot.slane %v2906_v41, 4  ;;  %v2985_v7 = vrot.slane %v2906_v41, 5  ;;  %v6564_v18 = vpop.f32.mrb[29].mxu0  ;;  %v4245_v61 = vpop.f32.mrb[21].mxu1 }
 0x791   :  { %v2986_v6 = vrot.slane %v2906_v41, 6  ;;  %v2987_v38 = vrot.slane %v2906_v41, 7  ;;  %v2988_v26 = vrot.slane %v2906_v41, 1  ;;  %v3003_v58 = vadd.f32 %v2906_v41, %v6910_v12 }
 0x792   :  { %v2997_v53 = vadd.f32 %v2982_v49, %v6828_v25  ;;  %v2998_v32 = vadd.f32 %v2983_v51, %v5810_v29  ;;  %v2999_v35 = vadd.f32 %v2984_v60, %v6929_v28  ;;  %v3000_v39 = vadd.f32 %v2985_v7, %v6930_v24 }
 0x793   :  { %v3001_v50 = vadd.f32 %v2986_v6, %v6931_v27  ;;  %v3002_v1 = vadd.f32 %v2987_v38, %v6932_v48  ;;  %v3004_v16 = vadd.f32 %v2988_v26, %v6933_v0  ;;  %v3807_v15 = vmul.f32 -1.442695, %v3003_v58  ;;  %v6938_v26 = vld [vmem:[#allocation26_spill] sm:$0xff] }
 0x794   :  { %v3801_v45 = vmul.f32 -1.442695, %v2997_v53  ;;  %v3802_v63 = vmul.f32 -1.442695, %v2998_v32  ;;  %v3803_v55 = vmul.f32 -1.442695, %v2999_v35 }
 0x795   :  { %v3804_v36 = vmul.f32 -1.442695, %v3000_v39  ;;  %5228 = vpow2.f32 %v3807_v15  ;;  %v3805_v19 = vmul.f32 -1.442695, %v3001_v50  ;;  %v3806_v62 = vmul.f32 -1.442695, %v3002_v1 }
 0x796   :  { %5230 = vpow2.f32 %v3801_v45  ;;  %v3808_v59 = vmul.f32 -1.442695, %v3004_v16  ;;  %v3054_v8 = vrot.slane %v6564_v18, 2  ;;  %v3055_v2 = vrot.slane %v6564_v18, 3 }
 0x797   :  { %5232 = vpow2.f32 %v3802_v63  ;;  %v3056_v20 = vrot.slane %v6564_v18, 4  ;;  %v3057_v54 = vrot.slane %v6564_v18, 5  ;;  %v3058_v33 = vrot.slane %v6564_v18, 6  ;;  %v6939_v63 = vld [vmem:[#allocation27_spill] sm:$0xff] }
 0x798   :  { %5234 = vpow2.f32 %v3803_v55  ;;  %v3069_v4 = vadd.f32 %v3054_v8, %v6934_v47  ;;  %v3070_v17 = vadd.f32 %v3055_v2, %v6935_v34  ;;  %v3059_v38 = vrot.slane %v6564_v18, 7  ;;  %v6592_v2 = vld [vmem:[%s6706_s4] ss:$0 sm:$0xff] }
 0x799   :  { %5236 = vpow2.f32 %v3804_v36  ;;  %v3071_v43 = vadd.f32 %v3056_v20, %v6936_v42  ;;  %v3072_v40 = vadd.f32 %v3057_v54, %v6937_v23  ;;  %v3073_v58 = vadd.f32 %v3058_v33, %v6938_v26  ;;  %v6941_v54 = vld [vmem:[#allocation29_spill] sm:$0xff] }
 0x79a   :  { %5238 = vpow2.f32 %v3805_v19  ;;  %v3809_v9 = vmul.f32 -1.442695, %v3069_v4  ;;  %v3810_v21 = vmul.f32 -1.442695, %v3070_v17  ;;  %v3060_v50 = vrot.slane %v6564_v18, 1 }
 0x79b   :  { %5240 = vpow2.f32 %v3806_v62  ;;  %v3811_v22 = vmul.f32 -1.442695, %v3071_v43  ;;  %v3812_v30 = vmul.f32 -1.442695, %v3072_v40  ;;  %v3074_v55 = vadd.f32 %v3059_v38, %v6939_v63  ;;  %v6940_v62 = vld [vmem:[#allocation28_spill] sm:$0xff] }
 0x79c   :  { %5242 = vpow2.f32 %v3808_v59  ;;  %v3813_v36 = vmul.f32 -1.442695, %v3073_v58  ;;  %v3075_v59 = vadd.f32 %v6564_v18, %v6940_v62  ;;  %v3125_v20 = vadd.f32 %v6592_v2, %v6562_v44 }
 0x79d   :  { %5244 = vpow2.f32 %v3809_v9  ;;  %v3076_v4 = vadd.f32 %v3060_v50, %v6941_v54  ;;  %v3814_v40 = vmul.f32 -1.442695, %v3074_v55 }
 0x79e   :  { %5246 = vpow2.f32 %v3810_v21  ;;  %v3815_v21 = vmul.f32 -1.442695, %v3075_v59  ;;  %v3132_v50 = vrot.slane %v3125_v20, 7 }
 0x79f   :  { %v5229_v41 = vpop.eup %5228  ;;  %5248 = vpow2.f32 %v3811_v22  ;;  %v3127_v22 = vrot.slane %v3125_v20, 2 }
 0x7a0   :  { %v5231_v49 = vpop.eup %5230  ;;  %v3035_v51 = vadd.f32 1.0, %v5229_v41  ;;  %5250 = vpow2.f32 %v3812_v30  ;;  %v3816_v30 = vmul.f32 -1.442695, %v3076_v4  ;;  %v3128_v41 = vrot.slane %v3125_v20, 3 }
 0x7a1   :  { %v5233_v60 = vpop.eup %5232  ;;  %v3029_v7 = vadd.f32 1.0, %v5231_v49 }
 0x7a2   :  { %v5235_v61 = vpop.eup %5234  ;;  %v3030_v6 = vadd.f32 1.0, %v5233_v60  ;;  %5252 = vrcp.f32 %v3035_v51 }
 0x7a3   :  { %v5237_v53 = vpop.eup %5236  ;;  %v3031_v32 = vadd.f32 1.0, %v5235_v61  ;;  %5254 = vrcp.f32 %v3029_v7  ;;  %v3129_v7 = vrot.slane %v3125_v20, 4 }
 0x7a4   :  { %v5239_v35 = vpop.eup %5238  ;;  %v3032_v39 = vadd.f32 1.0, %v5237_v53  ;;  %5256 = vrcp.f32 %v3030_v6  ;;  %v3130_v6 = vrot.slane %v3125_v20, 5 }
 0x7a5   :  { %v5241_v1 = vpop.eup %5240  ;;  %v3033_v16 = vadd.f32 1.0, %v5239_v35  ;;  %5258 = vrcp.f32 %v3031_v32  ;;  %v3131_v32 = vrot.slane %v3125_v20, 6 }
 0x7a6   :  { %v5243_v15 = vpop.eup %5242  ;;  %v3034_v45 = vadd.f32 1.0, %v5241_v1  ;;  %5260 = vrcp.f32 %v3032_v39 }
 0x7a7   :  { %v3036_v19 = vadd.f32 1.0, %v5243_v15  ;;  %5262 = vrcp.f32 %v3033_v16  ;;  %v5245_v8 = vpop.eup %5244 }
 0x7a8   :  { %5264 = vrcp.f32 %v3034_v45  ;;  %v5247_v17 = vpop.eup %5246  ;;  %v3101_v49 = vadd.f32 1.0, %v5245_v8  ;;  %v3133_v45 = vrot.slane %v3125_v20, 1 }
 0x7a9   :  { %5266 = vrcp.f32 %v3036_v19  ;;  %v5249_v43 = vpop.eup %5248  ;;  %v3102_v59 = vadd.f32 1.0, %v5247_v17  ;;  %v6944_v17 = vld [vmem:[#allocation34_spill] sm:$0xff] }
 0x7aa   :  { %5268 = vpow2.f32 %v3813_v36  ;;  %v5251_v9 = vpop.eup %5250 }
 0x7ab   :  { %5270 = vpow2.f32 %v3814_v40 }
 0x7ac   :  { %v5253_v18 = vpop.eup %5252  ;;  %5272 = vpow2.f32 %v3815_v21  ;;  %v3103_v21 = vadd.f32 1.0, %v5249_v43 }
 0x7ad   :  { %v5255_v33 = vpop.eup %5254  ;;  %v3148_v51 = vmul.f32 %v5253_v18, %v3125_v20  ;;  %5274 = vpow2.f32 %v3816_v30  ;;  %v6943_v20 = vld [vmem:[#allocation33_spill] sm:$0xff] }
 0x7ae   :  { %v5257_v60 = vpop.eup %5256  ;;  %v3142_v61 = vmul.f32 %v5255_v33, %v3127_v22  ;;  %5276 = vrcp.f32 %v3101_v49  ;;  %v6942_v22 = vld [vmem:[#allocation32_spill] sm:$0xff]  ;;  %v3104_v33 = vadd.f32 1.0, %v5251_v9 }
 0x7af   :  { %v5259_v44 = vpop.eup %5258  ;;  %v3143_v38 = vmul.f32 %v5257_v60, %v3128_v41 }
 0x7b0   :  { %v5261_v58 = vpop.eup %5260  ;;  %v3144_v53 = vmul.f32 %v5259_v44, %v3129_v7  ;;  %v3150_v35 = vadd.f32 %v3142_v61, %v5894_v14  ;;  %v3156_v7 = vadd.f32 %v3148_v51, %v6944_v17  ;;  %v6945_v44 = vld [vmem:[#allocation35_spill] sm:$0xff] }
 0x7b1   :  { %v5263_v39 = vpop.eup %5262  ;;  %v3145_v1 = vmul.f32 %v5261_v58, %v3130_v6  ;;  %v3151_v16 = vadd.f32 %v3143_v38, %v5890_v31 }
 0x7b2   :  { %v5265_v15 = vpop.eup %5264  ;;  %v3146_v55 = vmul.f32 %v5263_v39, %v3131_v32  ;;  %v3152_v36 = vadd.f32 %v3144_v53, %v5902_v56  ;;  %5278 = vtanh.f32 %v3150_v35 }
 0x7b3   :  { %v5267_v19 = vpop.eup %5266  ;;  %v3147_v8 = vmul.f32 %v5265_v15, %v3132_v50  ;;  %v3153_v4 = vadd.f32 %v3145_v1, %v6898_v37  ;;  %5280 = vtanh.f32 %v3151_v16 }
 0x7b4   :  { %v5269_v40 = vpop.eup %5268  ;;  %v3149_v18 = vmul.f32 %v5267_v19, %v3133_v45  ;;  %v3154_v30 = vadd.f32 %v3146_v55, %v6942_v22  ;;  %5282 = vtanh.f32 %v3152_v36 }
 0x7b5   :  { %5284 = vtanh.f32 %v3153_v4  ;;  %v3105_v41 = vadd.f32 1.0, %v5269_v40  ;;  %v3155_v49 = vadd.f32 %v3147_v8, %v6943_v20  ;;  %v5271_v60 = vpop.eup %5270 }
 0x7b6   :  { %5286 = vtanh.f32 %v3154_v30  ;;  %v5273_v61 = vpop.eup %5272  ;;  %v3157_v6 = vadd.f32 %v3149_v18, %v6945_v44  ;;  %v3106_v53 = vadd.f32 1.0, %v5271_v60 }
 0x7b7   :  { %5288 = vrcp.f32 %v3102_v59  ;;  %v5275_v43 = vpop.eup %5274  ;;  %v3107_v39 = vadd.f32 1.0, %v5273_v61 }
 0x7b8   :  { %5290 = vrcp.f32 %v3103_v21  ;;  %v5277_v38 = vpop.eup %5276  ;;  %v3108_v16 = vadd.f32 1.0, %v5275_v43 }
 0x7b9   :  { %5292 = vrcp.f32 %v3104_v33 }
 0x7ba   :  { %5294 = vrcp.f32 %v3105_v41 }
 0x7bb   :  { %5296 = vtanh.f32 %v3155_v49 }
 0x7bc   :  { %v5279_v58 = vpop.eup %5278  ;;  %5298 = vtanh.f32 %v3156_v7 }
 0x7bd   :  { %v5281_v9 = vpop.eup %5280  ;;  %5300 = vtanh.f32 %v3157_v6  ;;  %v3174_v32 = vrot.slane %v5279_v58, 1 }
 0x7be   :  { %v5283_v35 = vpop.eup %5282  ;;  %v3175_v50 = vrot.slane %v5281_v9, 1  ;;  %5302 = vrcp.f32 %v3106_v53 }
 0x7bf   :  { %v5285_v1 = vpop.eup %5284  ;;  %v3176_v51 = vrot.slane %v5283_v35, 1  ;;  %v3190_v15 = vsub.f32 %v6495_v52, %v3174_v32  ;;  %5304 = vrcp.f32 %v3107_v39 }
 0x7c0   :  { %v5287_v45 = vpop.eup %5286  ;;  %v3177_v55 = vrot.slane %v5285_v1, 1  ;;  %v3191_v36 = vsub.f32 %v6497_v57, %v3175_v50  ;;  %5306 = vrcp.f32 %v3108_v16 }
 0x7c1   :  { %v5289_v19 = vpop.eup %5288  ;;  %v3178_v59 = vrot.slane %v5287_v45, 1  ;;  %v3192_v8 = vsub.f32 %v6499_v10, %v3176_v51  ;;  %v3206_v4 = vrot.slane %v3190_v15, 7 }
 0x7c2   :  { %v5291_v40 = vpop.eup %5290  ;;  %v3193_v21 = vsub.f32 %v6503_v3, %v3177_v55  ;;  %v3207_v18 = vrot.slane %v3191_v36, 7 }
 0x7c3   :  { %v5293_v30 = vpop.eup %5292  ;;  %v3194_v33 = vsub.f32 %v6507_v11, %v3178_v59  ;;  %v3208_v52 = vrot.slane %v3192_v8, 7  ;;  %v3222_v41 = vmul.f32 %v5277_v38, %v3206_v4 }
 0x7c4   :  { %v5295_v49 = vpop.eup %5294  ;;  %v3209_v60 = vrot.slane %v3193_v21, 7  ;;  %v3223_v57 = vmul.f32 %v5289_v19, %v3207_v18 }
 0x7c5   :  { %v5297_v7 = vpop.eup %5296  ;;  %v3210_v61 = vrot.slane %v3194_v33, 7  ;;  %v3224_v6 = vmul.f32 %v5291_v40, %v3208_v52  ;;  %v6610_v43 = vadd.f32 %v5279_v58, %v3222_v41 }
 0x7c6   :  { %v5299_v10 = vpop.eup %5298  ;;  %v3179_v53 = vrot.slane %v5297_v7, 1  ;;  %v3225_v32 = vmul.f32 %v5293_v30, %v3209_v60  ;;  %v6612_v39 = vadd.f32 %v5281_v9, %v3223_v57 }
 0x7c7   :  { %v5301_v3 = vpop.eup %5300  ;;  %v3180_v50 = vrot.slane %v5299_v10, 1  ;;  %v3226_v16 = vmul.f32 %v5295_v49, %v3210_v61  ;;  %v6614_v51 = vadd.f32 %v5283_v35, %v3224_v6  ;;  %v3246_v11 = vrot.slane %v6610_v43, 6 }
 0x7c8   :  { %v3181_v38 = vrot.slane %v5301_v3, 1  ;;  %v3195_v15 = vsub.f32 %v6517_v13, %v3179_v53  ;;  %v6618_v55 = vadd.f32 %v5285_v1, %v3225_v32  ;;  %v3247_v58 = vrot.slane %v6612_v39, 5  ;;  %v5303_v40 = vpop.eup %5302 }
 0x7c9   :  { %v3196_v36 = vsub.f32 %v6519_v46, %v3180_v50  ;;  %v6622_v19 = vadd.f32 %v5287_v45, %v3226_v16  ;;  %v3249_v9 = vrot.slane %v6614_v51, 4  ;;  %v5305_v1 = vpop.eup %5304 }
 0x7ca   :  { %v3197_v59 = vsub.f32 %v6521_v5, %v3181_v38  ;;  %v3211_v8 = vrot.slane %v3195_v15, 7  ;;  %v3248_v35 = vsel %vm714_vm2, %v3247_v58, %v3246_v11  ;;  %v3251_v4 = vrot.slane %v6618_v55, 3  ;;  %v5307_v45 = vpop.eup %5306 }
 0x7cb   :  { %v3212_v21 = vrot.slane %v3196_v36, 7  ;;  %v3250_v13 = vsel %vm717_vm3, %v3249_v9, %v3248_v35  ;;  %v3253_v52 = vrot.slane %v6622_v19, 2 }
 0x7cc   :  { %v3213_v18 = vrot.slane %v3197_v59, 7  ;;  %v3227_v30 = vmul.f32 %v5303_v40, %v3211_v8  ;;  %v3252_v46 = vsel %vm720_vm4, %v3251_v4, %v3250_v13 }
 0x7cd   :  { %v3228_v33 = vmul.f32 %v5305_v1, %v3212_v21  ;;  %v3254_v60 = vsel %vm723_vm5, %v3253_v52, %v3252_v46 }
 0x7ce   :  { %v3229_v41 = vmul.f32 %v5307_v45, %v3213_v18  ;;  %v6631_v5 = vadd.f32 %v5297_v7, %v3227_v30 }
 0x7cf   :  { %v6633_v49 = vadd.f32 %v5299_v10, %v3228_v33 }
 0x7d0   :  { %v6636_v57 = vadd.f32 %v5301_v3, %v3229_v41  ;;  %v3255_v61 = vrot.slane %v6631_v5, 1 }
 0x7d2   :  { %v3256_v6 = vsel %vm726_vm6, %v3255_v61, %v3254_v60  ;;  %v3258_v53 = vrot.slane %v6636_v57, 7 }
 0x7d3   :  { %v3257_v32 = vsel %vm729_vm7, %v6633_v49, %v3256_v6 }
 0x7d4   :  { %v3259_v50 = vsel %vm732_vm8, %v3258_v53, %v3257_v32 }
 0x7d5   :  { %3326 = vmatmul.mubr.f32.vlgmr.msra.gmra.mrb[30].mxu0 %v3259_v50  ;;  %4279 = vmatmul.mubr.f32.vlgmr.msra.gmra.mrb[22].mxu1 %v3259_v50 }
 0x8a8   :  { %v3327_v7 = vpop.f32.mrb[30].mxu0  ;;  %v6644_v10 = vpop.f32.mrb[22].mxu1 }
 0x8a9   :  { %v3403_v16 = vrot.slane %v3327_v7, 1  ;;  %v3404_v11 = vrot.slane %v3327_v7, 2  ;;  %v3405_v3 = vrot.slane %v3327_v7, 3  ;;  %v3406_v38 = vrot.slane %v3327_v7, 4  ;;  %v6646_v15 = vpop.f32.mrb[31].mxu0  ;;  %v4280_v58 = vpop.f32.mrb[23].mxu1 }
 0x8aa   :  { %v3407_v36 = vrot.slane %v3327_v7, 5  ;;  %v3408_v9 = vrot.slane %v3327_v7, 6  ;;  %v3409_v59 = vrot.slane %v3327_v7, 7  ;;  %v3425_v8 = vadd.f32 %v3327_v7, %v6933_v0 }
 0x8ab   :  { %v3418_v35 = vadd.f32 %v3403_v16, %v6828_v25  ;;  %v3419_v4 = vadd.f32 %v3404_v11, %v5810_v29  ;;  %v3420_v40 = vadd.f32 %v3405_v3, %v6929_v28  ;;  %v3421_v21 = vadd.f32 %v3406_v38, %v6930_v24 }
 0x8ac   :  { %v3422_v13 = vadd.f32 %v3407_v36, %v6931_v27  ;;  %v3423_v1 = vadd.f32 %v3408_v9, %v6932_v48  ;;  %v3824_v18 = vmul.f32 -1.442695, %v3425_v8  ;;  %v3424_v30 = vadd.f32 %v3409_v59, %v6910_v12 }
 0x8ad   :  { %v3817_v46 = vmul.f32 -1.442695, %v3418_v35  ;;  %v3818_v45 = vmul.f32 -1.442695, %v3419_v4  ;;  %v3819_v33 = vmul.f32 -1.442695, %v3420_v40 }
 0x8ae   :  { %v3820_v52 = vmul.f32 -1.442695, %v3421_v21  ;;  %5308 = vpow2.f32 %v3824_v18  ;;  %v3821_v25 = vmul.f32 -1.442695, %v3422_v13  ;;  %v3822_v29 = vmul.f32 -1.442695, %v3423_v1 }
 0x8af   :  { %5310 = vpow2.f32 %v3817_v46  ;;  %v3823_v28 = vmul.f32 -1.442695, %v3424_v30  ;;  %v3475_v24 = vrot.slane %v6646_v15, 1  ;;  %v3476_v27 = vrot.slane %v6646_v15, 2 }
 0x8b0   :  { %5312 = vpow2.f32 %v3818_v45  ;;  %v3477_v48 = vrot.slane %v6646_v15, 3  ;;  %v3478_v6 = vrot.slane %v6646_v15, 4  ;;  %v3479_v50 = vrot.slane %v6646_v15, 5 }
 0x8b1   :  { %5314 = vpow2.f32 %v3819_v33  ;;  %v3490_v12 = vadd.f32 %v3475_v24, %v6934_v47  ;;  %v3491_v0 = vadd.f32 %v3476_v27, %v6935_v34  ;;  %v3480_v11 = vrot.slane %v6646_v15, 6 }
 0x8b2   :  { %5316 = vpow2.f32 %v3820_v52  ;;  %v3492_v41 = vadd.f32 %v3477_v48, %v6936_v42  ;;  %v3481_v34 = vrot.slane %v6646_v15, 7  ;;  %v3493_v58 = vadd.f32 %v3478_v6, %v6937_v23 }
 0x8b3   :  { %5318 = vpow2.f32 %v3821_v25  ;;  %v3825_v60 = vmul.f32 -1.442695, %v3490_v12  ;;  %v3826_v61 = vmul.f32 -1.442695, %v3491_v0  ;;  %v3494_v59 = vadd.f32 %v3479_v50, %v6938_v26 }
 0x8b4   :  { %5320 = vpow2.f32 %v3822_v29  ;;  %v3827_v53 = vmul.f32 -1.442695, %v3492_v41  ;;  %v3495_v4 = vadd.f32 %v3480_v11, %v6939_v63  ;;  %v3496_v13 = vadd.f32 %v3481_v34, %v6940_v62 }
 0x8b5   :  { %5322 = vpow2.f32 %v3823_v28  ;;  %v3497_v23 = vadd.f32 %v6646_v15, %v6941_v54  ;;  %v3828_v30 = vmul.f32 -1.442695, %v3493_v58  ;;  %v3829_v26 = vmul.f32 -1.442695, %v3494_v59 }
 0x8b6   :  { %5324 = vpow2.f32 %v3825_v60  ;;  %v3546_v45 = vadd.f32 %v6592_v2, %v6644_v10  ;;  %v3830_v63 = vmul.f32 -1.442695, %v3495_v4  ;;  %v3831_v52 = vmul.f32 -1.442695, %v3496_v13 }
 0x8b7   :  { %5326 = vpow2.f32 %v3826_v61  ;;  %v3832_v62 = vmul.f32 -1.442695, %v3497_v23 }
 0x8b8   :  { %v5309_v32 = vpop.eup %5308  ;;  %5328 = vpow2.f32 %v3827_v53  ;;  %v3548_v54 = vrot.slane %v3546_v45, 1  ;;  %v3549_v48 = vrot.slane %v3546_v45, 2  ;;  %v3550_v2 = vrot.slane %v3546_v45, 3 }
 0x8b9   :  { %v5311_v7 = vpop.eup %5310  ;;  %v3457_v16 = vadd.f32 1.0, %v5309_v32  ;;  %v3551_v60 = vrot.slane %v3546_v45, 4  ;;  %v3552_v32 = vrot.slane %v3546_v45, 5  ;;  %v3553_v11 = vrot.slane %v3546_v45, 6 }
 0x8ba   :  { %v5313_v47 = vpop.eup %5312  ;;  %v3450_v3 = vadd.f32 1.0, %v5311_v7 }
 0x8bb   :  { %v5315_v42 = vpop.eup %5314  ;;  %v3451_v38 = vadd.f32 1.0, %v5313_v47  ;;  %5330 = vrcp.f32 %v3457_v16 }
 0x8bc   :  { %v5317_v36 = vpop.eup %5316  ;;  %v3452_v9 = vadd.f32 1.0, %v5315_v42  ;;  %5332 = vrcp.f32 %v3450_v3  ;;  %v3554_v42 = vrot.slane %v3546_v45, 7 }
 0x8bd   :  { %v5319_v8 = vpop.eup %5318  ;;  %v3453_v35 = vadd.f32 1.0, %v5317_v36  ;;  %5334 = vrcp.f32 %v3451_v38 }
 0x8be   :  { %v5321_v40 = vpop.eup %5320  ;;  %v3454_v21 = vadd.f32 1.0, %v5319_v8  ;;  %5336 = vrcp.f32 %v3452_v9 }
 0x8bf   :  { %v5323_v1 = vpop.eup %5322  ;;  %v3455_v18 = vadd.f32 1.0, %v5321_v40  ;;  %5338 = vrcp.f32 %v3453_v35 }
 0x8c0   :  { %v3456_v46 = vadd.f32 1.0, %v5323_v1  ;;  %5340 = vrcp.f32 %v3454_v21  ;;  %v5325_v33 = vpop.eup %5324 }
 0x8c1   :  { %5342 = vrcp.f32 %v3455_v18  ;;  %v5327_v25 = vpop.eup %5326  ;;  %v3522_v28 = vadd.f32 1.0, %v5325_v33 }
 0x8c2   :  { %5344 = vrcp.f32 %v3456_v46  ;;  %v5329_v29 = vpop.eup %5328  ;;  %v3523_v15 = vadd.f32 1.0, %v5327_v25 }
 0x8c3   :  { %5346 = vpow2.f32 %v3828_v30  ;;  %v3524_v4 = vadd.f32 1.0, %v5329_v29 }
 0x8c4   :  { %5348 = vpow2.f32 %v3829_v26 }
 0x8c5   :  { %v5331_v24 = vpop.eup %5330  ;;  %5350 = vpow2.f32 %v3830_v63 }
 0x8c6   :  { %v5333_v27 = vpop.eup %5332  ;;  %v3570_v12 = vmul.f32 %v5331_v24, %v3546_v45  ;;  %5352 = vpow2.f32 %v3831_v52 }
 0x8c7   :  { %v5335_v0 = vpop.eup %5334  ;;  %v3563_v10 = vmul.f32 %v5333_v27, %v3548_v54  ;;  %5354 = vpow2.f32 %v3832_v62 }
 0x8c8   :  { %v5337_v41 = vpop.eup %5336  ;;  %v3564_v61 = vmul.f32 %v5335_v0, %v3549_v48  ;;  %v3578_v6 = vadd.f32 %v3570_v12, %v6945_v44  ;;  %5356 = vrcp.f32 %v3522_v28 }
 0x8c9   :  { %v5339_v53 = vpop.eup %5338  ;;  %v3565_v50 = vmul.f32 %v5337_v41, %v3550_v2  ;;  %v3571_v7 = vadd.f32 %v3563_v10, %v5894_v14  ;;  %5358 = vrcp.f32 %v3523_v15 }
 0x8ca   :  { %v5341_v16 = vpop.eup %5340  ;;  %v3566_v47 = vmul.f32 %v5339_v53, %v3551_v60  ;;  %v3572_v3 = vadd.f32 %v3564_v61, %v5890_v31  ;;  %5360 = vtanh.f32 %v3578_v6 }
 0x8cb   :  { %v5343_v34 = vpop.eup %5342  ;;  %v3567_v38 = vmul.f32 %v5341_v16, %v3552_v32  ;;  %v3573_v58 = vadd.f32 %v3565_v50, %v5902_v56  ;;  %5362 = vtanh.f32 %v3571_v7 }
 0x8cc   :  { %v5345_v44 = vpop.eup %5344  ;;  %v3568_v36 = vmul.f32 %v5343_v34, %v3553_v11  ;;  %v3574_v9 = vadd.f32 %v3566_v47, %v6898_v37  ;;  %5364 = vtanh.f32 %v3572_v3 }
 0x8cd   :  { %v5347_v59 = vpop.eup %5346  ;;  %v3569_v14 = vmul.f32 %v5345_v44, %v3554_v42  ;;  %v3575_v8 = vadd.f32 %v3567_v38, %v6942_v22  ;;  %5366 = vtanh.f32 %v3573_v58 }
 0x8ce   :  { %v5349_v35 = vpop.eup %5348  ;;  %v3576_v31 = vadd.f32 %v3568_v36, %v6943_v20  ;;  %5368 = vtanh.f32 %v3574_v9  ;;  %v3525_v56 = vadd.f32 1.0, %v5347_v59 }
 0x8cf   :  { %v5351_v40 = vpop.eup %5350  ;;  %v3577_v21 = vadd.f32 %v3569_v14, %v6944_v17  ;;  %5370 = vtanh.f32 %v3575_v8  ;;  %v3526_v1 = vadd.f32 1.0, %v5349_v35 }
 0x8d0   :  { %v5353_v13 = vpop.eup %5352  ;;  %5372 = vtanh.f32 %v3576_v31  ;;  %v3527_v18 = vadd.f32 1.0, %v5351_v40 }
 0x8d1   :  { %v5355_v37 = vpop.eup %5354  ;;  %5374 = vtanh.f32 %v3577_v21  ;;  %v3528_v30 = vadd.f32 1.0, %v5353_v13 }
 0x8d2   :  { %v5357_v23 = vpop.eup %5356  ;;  %5376 = vrcp.f32 %v3524_v4  ;;  %v3529_v46 = vadd.f32 1.0, %v5355_v37 }
 0x8d3   :  { %v5359_v22 = vpop.eup %5358  ;;  %5378 = vrcp.f32 %v3525_v56 }
 0x8d4   :  { %v5361_v20 = vpop.eup %5360  ;;  %5380 = vrcp.f32 %v3526_v1 }
 0x8d5   :  { %v5363_v26 = vpop.eup %5362  ;;  %5382 = vrcp.f32 %v3527_v18  ;;  %v3602_v45 = vrot.slane %v5361_v20, 1 }
 0x8d6   :  { %v5365_v17 = vpop.eup %5364  ;;  %5384 = vrcp.f32 %v3528_v30  ;;  %v3595_v63 = vrot.slane %v5363_v26, 1 }
 0x8d7   :  { %v5367_v33 = vpop.eup %5366  ;;  %5386 = vrcp.f32 %v3529_v46  ;;  %v3596_v52 = vrot.slane %v5365_v17, 1  ;;  %v3618_v15 = vsub.f32 %v6636_v57, %v3602_v45 }
 0x8d8   :  { %v5369_v25 = vpop.eup %5368  ;;  %v3597_v62 = vrot.slane %v5367_v33, 1  ;;  %v3611_v29 = vsub.f32 %v6610_v43, %v3595_v63 }
 0x8d9   :  { %v5371_v28 = vpop.eup %5370  ;;  %v3598_v24 = vrot.slane %v5369_v25, 1  ;;  %v3612_v54 = vsub.f32 %v6612_v39, %v3596_v52  ;;  %v3634_v7 = vrot.slane %v3618_v15, 7 }
 0x8da   :  { %v5373_v27 = vpop.eup %5372  ;;  %v3599_v48 = vrot.slane %v5371_v28, 1  ;;  %v3613_v12 = vsub.f32 %v6614_v51, %v3597_v62  ;;  %v3627_v0 = vrot.slane %v3611_v29, 7 }
 0x8db   :  { %v5375_v2 = vpop.eup %5374  ;;  %v3600_v10 = vrot.slane %v5373_v27, 1  ;;  %v3614_v41 = vsub.f32 %v6618_v55, %v3598_v24  ;;  %v3628_v60 = vrot.slane %v3612_v54, 7 }
 0x8dc   :  { %v5377_v61 = vpop.eup %5376  ;;  %v3601_v6 = vrot.slane %v5375_v2, 1  ;;  %v3615_v43 = vsub.f32 %v6622_v19, %v3599_v48  ;;  %v3629_v53 = vrot.slane %v3613_v12, 7  ;;  %v3643_v32 = vmul.f32 %v5357_v23, %v3627_v0 }
 0x8dd   :  { %v5379_v50 = vpop.eup %5378  ;;  %v3616_v39 = vsub.f32 %v6631_v5, %v3600_v10  ;;  %v3630_v57 = vrot.slane %v3614_v41, 7  ;;  %v3644_v16 = vmul.f32 %v5359_v22, %v3628_v60 }
 0x8de   :  { %v5381_v11 = vpop.eup %5380  ;;  %v3617_v51 = vsub.f32 %v6633_v49, %v3601_v6  ;;  %v3631_v47 = vrot.slane %v3615_v43, 7  ;;  %v3645_v3 = vmul.f32 %v5377_v61, %v3629_v53  ;;  %v3651_v34 = vadd.f32 %v5363_v26, %v3643_v32 }
 0x8df   :  { %v5383_v55 = vpop.eup %5382  ;;  %v3632_v42 = vrot.slane %v3616_v39, 7  ;;  %v3646_v38 = vmul.f32 %v5379_v50, %v3630_v57  ;;  %v3652_v58 = vadd.f32 %v5365_v17, %v3644_v16 }
 0x8e0   :  { %v5385_v44 = vpop.eup %5384  ;;  %v3633_v19 = vrot.slane %v3617_v51, 7  ;;  %v3647_v36 = vmul.f32 %v5381_v11, %v3631_v47  ;;  %v3653_v9 = vadd.f32 %v5367_v33, %v3645_v3  ;;  %3682 = vst [vmem:[%s6707_s5 - $0x7] sm:$0x80] %v3651_v34 }
 0x8e1   :  { %v5387_v5 = vpop.eup %5386  ;;  %v3648_v59 = vmul.f32 %v5383_v55, %v3632_v42  ;;  %v3654_v14 = vadd.f32 %v5369_v25, %v3646_v38  ;;  %v3667_v8 = vrot.slane %v3652_v58, 7 }
 0x8e2   :  { %v3649_v49 = vmul.f32 %v5385_v44, %v3633_v19  ;;  %v3650_v35 = vmul.f32 %v5387_v5, %v3634_v7  ;;  %v3655_v31 = vadd.f32 %v5371_v28, %v3647_v36  ;;  %v3668_v4 = vrot.slane %v3653_v9, 6 }
 0x8e3   :  { %v3656_v40 = vadd.f32 %v5373_v27, %v3648_v59  ;;  %v3670_v21 = vrot.slane %v3654_v14, 5 }
 0x8e4   :  { %v3657_v56 = vadd.f32 %v5375_v2, %v3649_v49  ;;  %v3658_v13 = vadd.f32 %v5361_v20, %v3650_v35  ;;  %v3669_v1 = vsel %vm714_vm2, %v3668_v4, %v3667_v8  ;;  %v3672_v37 = vrot.slane %v3655_v31, 4 }
 0x8e5   :  { %v3671_v18 = vsel %vm717_vm3, %v3670_v21, %v3669_v1  ;;  %v3674_v23 = vrot.slane %v3656_v40, 3 }
 0x8e6   :  { %v3673_v30 = vsel %vm720_vm4, %v3672_v37, %v3671_v18  ;;  %v3676_v22 = vrot.slane %v3657_v56, 2  ;;  %v3678_v26 = vrot.slane %v3658_v13, 1 }
 0x8e7   :  { %v3675_v46 = vsel %vm723_vm5, %v3674_v23, %v3673_v30 }
 0x8e8   :  { %v3677_v45 = vsel %vm726_vm6, %v3676_v22, %v3675_v46 }
 0x8e9   :  { %v3679_v17 = vsel %vm729_vm7, %v3678_v26, %v3677_v45 }
 0x8ea   :  { %3683 = vst [vmem:[%s6707_s5 + $0x1] sm:$0x7f] %v3679_v17 }

</bundles_post_ra>
